<compile_context>
chip_gen: v5e
topology: v5e:2x2
jax: 0.10.0
libtpu: 0.0.40
codegen_flags: <defaults>
</compile_context>

<pallas_src>
import functools

import jax
import jax.numpy as jnp
from jax.experimental import pallas as pl
from jax.experimental.pallas import tpu as pltpu


def _round_up(x, m):
    return ((x + m - 1) // m) * m


def _choose_d_block(D, r, H, W, itemsize, budget_bytes):
    """Largest depth chunk whose (padded) in+out VMEM tiles fit the budget."""

    def step_bytes(db):
        # Input tile (r^3, db, H, W): sublane pads to 8, lane pads to 128.
        in_b = (r ** 3) * db * _round_up(H, 8) * _round_up(W, 128) * itemsize
        # Output tile (db*r, H*r*W*r): lane-dense trailing dim.
        out_b = _round_up(db * r, 8) * _round_up(H * r * W * r, 128) * itemsize
        return in_b + out_b

    # Candidate chunks: divisors of D whose output block second-minor dim is
    # either the full D*r extent or a multiple of 8 (tiling constraint).
    cands = [d for d in range(1, D + 1)
             if D % d == 0 and (d == D or (d * r) % 8 == 0)]
    if not cands:
        cands = [D]
    # Largest candidate that fits (x3 slack for double-buffering + temps).
    for db in sorted(cands, reverse=True):
        if 3 * step_bytes(db) <= budget_bytes:
            return db
    return min(cands)


def _pixel_shuffle3d_kernel(x_ref, o_ref, *, r, d_blk, H, W):
    # x_ref block: (1, r^3, d_blk, H, W)
    # o_ref block: (1, 1, d_blk*r, H*r*W*r)   (lane-dense output)
    x = x_ref[...].reshape(r, r, r, d_blk, H, W)  # (r0, r1, r2, d, H, W)

    # Interleave r2 into W (lane dim): -> (r0, r1, d, H, W*r)
    xw = jnp.stack([x[:, :, j] for j in range(r)], axis=-1)
    xw = xw.reshape(r, r, d_blk, H, W * r)

    # Interleave r1 into H (sublane dim): -> (r0, d, H*r, W*r)
    xh = jnp.stack([xw[:, i] for i in range(r)], axis=3)
    xh = xh.reshape(r, d_blk, H * r, W * r)

    # Interleave r0 into d (major dims only -> cheap): -> (d*r, H*r, W*r)
    y = jnp.stack([xh[k] for k in range(r)], axis=1)
    y = y.reshape(d_blk * r, H * r, W * r)

    # Lane-dense store: merge (H*r, W*r) into a single >=128-wide trailing dim.
    o_ref[...] = y.reshape(1, 1, d_blk * r, H * r * W * r)


def pixel_shuffle_3d(x, upscale_factor, *, vmem_budget_bytes=12 * 1024 * 1024):
    """Pallas TPU implementation of PixelShuffle3D.forward (NCDHW)."""
    r = int(upscale_factor)
    r3 = r ** 3
    B, Cr3, D, H, W = x.shape
    assert Cr3 % r3 == 0, "channel dim must be divisible by upscale_factor**3"
    C = Cr3 // r3

    d_blk = _choose_d_block(D, r, H, W, x.dtype.itemsize, vmem_budget_bytes)
    grid = (B, C, D // d_blk)

    kernel = functools.partial(_pixel_shuffle3d_kernel,
                               r=r, d_blk=d_blk, H=H, W=W)

    # Output presented to pallas_call with merged trailing spatial dims so the
    # last block dim is large (dense vector stores + contiguous output DMA).
    out_shape = jax.ShapeDtypeStruct((B, C, D * r, H * r * W * r), x.dtype)

    in_spec = pl.BlockSpec((1, r3, d_blk, H, W),
                           lambda b, c, d: (b, c, d, 0, 0))
    out_spec = pl.BlockSpec((1, 1, d_blk * r, H * r * W * r),
                            lambda b, c, d: (b, c, d, 0))

    bytes_accessed = 2 * x.size * x.dtype.itemsize

    out4 = pl.pallas_call(
        kernel,
        out_shape=out_shape,
        grid_spec=pltpu.PrefetchScalarGridSpec(
            num_scalar_prefetch=0,
            grid=grid,
            in_specs=[in_spec],
            out_specs=out_spec,
        ),
        compiler_params=pltpu.CompilerParams(
            # No cross-step carry anywhere -> every axis is parallel (lets v7x
            # shard the grid over both TensorCores).
            dimension_semantics=("parallel", "parallel", "parallel"),
            # Above the 16/32 MiB scoped defaults, below v7x's 64 MiB physical.
            vmem_limit_bytes=48 * 1024 * 1024,
        ),
        cost_estimate=pl.CostEstimate(
            flops=0, transcendentals=0, bytes_accessed=bytes_accessed),
    )(x)

    # Metadata-only reshape back to the 5-D NCDHW output.
    return out4.reshape(B, C, D * r, H * r, W * r)


def pixel_shuffle_3d_ref(x, r):
    """Pure-JAX reference mirroring the PyTorch view/permute/view."""
    B, Cr3, D, H, W = x.shape
    C = Cr3 // (r ** 3)
    v = x.reshape(B, C, r, r, r, D, H, W)
    v = jnp.transpose(v, (0, 1, 5, 2, 6, 3, 7, 4))
    return v.reshape(B, C, D * r, H * r, W * r)


if __name__ == "__main__":
    upscale = 2
    B, C, D, H, W = 2, 4, 4, 8, 8            # output channels C; input channels C*r^3 = 32
    in_ch = C * upscale ** 3

    key = jax.random.PRNGKey(0)
    x = jax.random.normal(key, (B, in_ch, D, H, W), dtype=jnp.float32)

    out = pixel_shuffle_3d(x, upscale)
    out = jax.block_until_ready(out)

    ref = pixel_shuffle_3d_ref(x, upscale)
    assert out.shape == (B, C, D * upscale, H * upscale, W * upscale), out.shape
    assert out.dtype == x.dtype
    assert jnp.allclose(out, ref), "Pallas output mismatch vs reference"

    print("KERNEL_OK")
</pallas_src>

<mosaic_0001>
module attributes {stable_mosaic.version = 11 : i64} {
  func.func @_pixel_shuffle3d_kernel(%arg0: i32, %arg1: i32, %arg2: i32, %arg3: memref<1x8x4x8x8xf32, #tpu.memory_space<vmem>>, %arg4: memref<1x1x8x256xf32, #tpu.memory_space<vmem>>) attributes {dimension_semantics = [#tpu.dimension_semantics<parallel>, #tpu.dimension_semantics<parallel>, #tpu.dimension_semantics<parallel>], iteration_bounds = array<i64: 2, 4, 1>, scalar_prefetch = 0 : i64, scratch_operands = 0 : i64, tpu.core_type = #tpu.core_type<tc>, window_params = [{transform_indices = @transform_0, window_bounds = array<i64: 1, 8, 4, 8, 8>}, {transform_indices = @transform_1, window_bounds = array<i64: 1, 1, 8, 256>}]} {
    %c0 = arith.constant 0 : index
    %c0_0 = arith.constant 0 : index
    %c0_1 = arith.constant 0 : index
    %c0_2 = arith.constant 0 : index
    %c0_3 = arith.constant 0 : index
    %0 = vector.load %arg3[%c0, %c0_0, %c0_1, %c0_2, %c0_3] : memref<1x8x4x8x8xf32, #tpu.memory_space<vmem>>, vector<1x8x4x8x8xf32>
    %1 = vector.shape_cast %0 : vector<1x8x4x8x8xf32> to vector<2x2x2x4x8x8xf32>
    %2 = vector.extract_strided_slice %1 {offsets = [0, 0, 0, 0, 0, 0], sizes = [2, 2, 1, 4, 8, 8], strides = [1, 1, 1, 1, 1, 1]} : vector<2x2x2x4x8x8xf32> to vector<2x2x1x4x8x8xf32>
    %3 = vector.shape_cast %2 : vector<2x2x1x4x8x8xf32> to vector<2x2x4x8x8xf32>
    %4 = vector.extract_strided_slice %1 {offsets = [0, 0, 1, 0, 0, 0], sizes = [2, 2, 1, 4, 8, 8], strides = [1, 1, 1, 1, 1, 1]} : vector<2x2x2x4x8x8xf32> to vector<2x2x1x4x8x8xf32>
    %5 = vector.shape_cast %4 : vector<2x2x1x4x8x8xf32> to vector<2x2x4x8x8xf32>
    %6 = vector.shape_cast %3 : vector<2x2x4x8x8xf32> to vector<2x2x4x8x8x1xf32>
    %7 = vector.shape_cast %5 : vector<2x2x4x8x8xf32> to vector<2x2x4x8x8x1xf32>
    %8 = tpu.concatenate %6, %7 in 5 : vector<2x2x4x8x8x1xf32>, vector<2x2x4x8x8x1xf32> -> vector<2x2x4x8x8x2xf32>
    %9 = vector.shape_cast %8 : vector<2x2x4x8x8x2xf32> to vector<2x2x4x8x16xf32>
    %10 = vector.extract_strided_slice %9 {offsets = [0, 0, 0, 0, 0], sizes = [2, 1, 4, 8, 16], strides = [1, 1, 1, 1, 1]} : vector<2x2x4x8x16xf32> to vector<2x1x4x8x16xf32>
    %11 = vector.shape_cast %10 : vector<2x1x4x8x16xf32> to vector<2x4x8x16xf32>
    %12 = vector.extract_strided_slice %9 {offsets = [0, 1, 0, 0, 0], sizes = [2, 1, 4, 8, 16], strides = [1, 1, 1, 1, 1]} : vector<2x2x4x8x16xf32> to vector<2x1x4x8x16xf32>
    %13 = vector.shape_cast %12 : vector<2x1x4x8x16xf32> to vector<2x4x8x16xf32>
    %14 = vector.shape_cast %11 : vector<2x4x8x16xf32> to vector<2x4x8x1x16xf32>
    %15 = vector.shape_cast %13 : vector<2x4x8x16xf32> to vector<2x4x8x1x16xf32>
    %16 = tpu.concatenate %14, %15 in 3 : vector<2x4x8x1x16xf32>, vector<2x4x8x1x16xf32> -> vector<2x4x8x2x16xf32>
    %17 = vector.shape_cast %16 : vector<2x4x8x2x16xf32> to vector<2x4x16x16xf32>
    %18 = vector.extract_strided_slice %17 {offsets = [0, 0, 0, 0], sizes = [1, 4, 16, 16], strides = [1, 1, 1, 1]} : vector<2x4x16x16xf32> to vector<1x4x16x16xf32>
    %19 = vector.shape_cast %18 : vector<1x4x16x16xf32> to vector<4x16x16xf32>
    %20 = vector.extract_strided_slice %17 {offsets = [1, 0, 0, 0], sizes = [1, 4, 16, 16], strides = [1, 1, 1, 1]} : vector<2x4x16x16xf32> to vector<1x4x16x16xf32>
    %21 = vector.shape_cast %20 : vector<1x4x16x16xf32> to vector<4x16x16xf32>
    %22 = vector.shape_cast %19 : vector<4x16x16xf32> to vector<4x1x16x16xf32>
    %23 = vector.shape_cast %21 : vector<4x16x16xf32> to vector<4x1x16x16xf32>
    %24 = tpu.concatenate %22, %23 in 1 : vector<4x1x16x16xf32>, vector<4x1x16x16xf32> -> vector<4x2x16x16xf32>
    %25 = vector.shape_cast %24 : vector<4x2x16x16xf32> to vector<8x16x16xf32>
    %26 = vector.shape_cast %25 : vector<8x16x16xf32> to vector<1x1x8x256xf32>
    %c0_4 = arith.constant 0 : index
    %c0_5 = arith.constant 0 : index
    %c0_6 = arith.constant 0 : index
    %c0_7 = arith.constant 0 : index
    %27 = vector.load %arg4[%c0_4, %c0_5, %c0_6, %c0_7] : memref<1x1x8x256xf32, #tpu.memory_space<vmem>>, vector<1x1x8x256xf32>
    tpu.vector_store %arg4[%c0_4, %c0_5, %c0_6, %c0_7], %26 {strides = array<i32>} : memref<1x1x8x256xf32, #tpu.memory_space<vmem>>, vector<1x1x8x256xf32>,
    return
  }
  func.func @transform_0(%arg0: i32, %arg1: i32, %arg2: i32) -> (i32, i32, i32, i32, i32) {
    %c0_i32 = arith.constant 0 : i32
    %c0_i32_0 = arith.constant 0 : i32
    %c0_i32_1 = arith.constant 0 : i32
    return %arg0, %arg1, %arg2, %c0_i32, %c0_i32_0 : i32, i32, i32, i32, i32
  }
  func.func @transform_1(%arg0: i32, %arg1: i32, %arg2: i32) -> (i32, i32, i32, i32) {
    %c0_i32 = arith.constant 0 : i32
    %c0_i32_0 = arith.constant 0 : i32
    return %arg0, %arg1, %arg2, %c0_i32 : i32, i32, i32, i32
  }
}

</mosaic_0001>

<bundles_post_ra>
// kernel: tpu_custom_call.1
= control target key start
LH: loop header
LB: loop body
LE: loop exit
PB: predicated region body
PF: predicated region fallthrough
CT: control target
= control target key end

     0   :  { %6 = vsyncpa [#allocation3], 0  ;;  %s8673_s0 = inlined_call_operand.vmem [shape: f32[2,32,4,8,8], index: 0, kind: input, shape index: {}]   ;;  %s8674_s1 = inlined_call_operand.hbm [shape: f32[2,4,8,256], index: 1, kind: output, shape index: {}]  }
   0x1   :  { %8 = vsyncpa [#allocation3 + $0x1], 0  ;;  %s5717_s6 = smov 0   ;;  %s5719_s7 = smov 0  }
   0x2   :  { %s5721_s8 = smov 0   ;;  %s5723_s9 = smov 0  }
   0x3   :  { %s5725_s10 = smov 0   ;;  %s5727_s11 = smov 0  }
   0x4   :  { %s5729_s12 = smov 0   ;;  %s5731_s13 = smov 0  }
   0x5 LB: > { %s5489_s14 = sadd.s32 4294967295, %s5689_s13   ;;  %s5490_s15 = sadd.s32 4294967294, %s5689_s13   ;;  %s5689_s13 = sphi %s5731_s13, %s14_s13   ;;  %s5685_s12 = sphi %s5729_s12, %s9025_s12   ;;  %s5681_s11 = sphi %s5727_s11, %s9024_s11   ;;  %s5677_s10 = sphi %s5725_s10, %s9023_s10   ;;  %s5673_s9 = sphi %s5723_s9, %s9022_s9   ;;  %s5669_s8 = sphi %s5721_s8, %s9021_s8   ;;  %s5665_s7 = sphi %s5719_s7, %s9020_s7   ;;  %s5661_s6 = sphi %s5717_s6, %s9019_s6  }
   0x6   : > { %s29_s16 = sadd.s32 1, %s5681_s11  ;;  %s33_s17 = sadd.s32 1, %s5685_s12 }
   0x7   : > { %p31_p0 = scmp.ge.s32.totalorder %s29_s16, 4  ;;  %p84_p1 = scmp.ne.s32.totalorder %s5669_s8, %s5665_s7 }
   0x8   : > { %p85_p2 = scmp.eq.s32.totalorder %s5489_s14, 7  ;;  %p90_p5 = scmp.ne.s32.totalorder %s5665_s7, %s5661_s6 }
   0x9   : > { %s9027_s16 = smov (%p31_p0, %s29_s16), 0  ;;  %s9029_s17 = smov (!%p31_p0, %s33_s17), %s5685_s12 }
   0xa   : > { %s68_s18 = ssub.s32 %s5681_s11, %s9027_s16  ;;  %p5768_p3 = por %p85_p2, %p84_p1 }
   0xb   : > { %p35_p4 = scmp.ge.s32.totalorder %s9029_s17, 2  ;;  %p91_p6 = scmp.eq.s32.totalorder %s5490_s15, 7 }
   0xc   : > { %p5493_p7 = scmp.ge.s32.totalorder %s5689_s13, 1  ;;  %p128_p9 = scmp.lt.s32.totalorder %s5689_s13, 9 }
   0xd   : > { %s9031_s17 = smov (%p35_p4, %s9029_s17), 0  ;;  %p5777_p8 = por %p91_p6, %p90_p5 }
   0xe   : > { %s67_s21 = ssub.s32 %s5685_s12, %s9031_s17  ;;  %s74_s22 = sadd.s32 1, %s5669_s8 }
   0xf   : > { %s69_s23 = sor.u32 %s68_s18, %s67_s21  ;;  %p129_p10 = pnand %p5493_p7, %p128_p9 }
  0x10   : > { %p72_p11 = scmp.eq.s32.totalorder %s69_s23, 0 }
  0x11   : > { %132 = sbr.rel (%p129_p10) target bundleno = 1531 (0x5fb), region = 24 }
  0x12   : > { %s5786_s24 = scalar_select %p72_p11, %s5669_s8, %s74_s22  }
  0x16   : > { %v206_v0 = vlaneseq  ;;  %s5495_s25 = sshll.u32 %s5673_s9, 3  ;;  %p159_p12 = scmp.lt.s32.totalorder %s5677_s10, 1  ;;  %vm1997_vm0 = vcmask 7168   ;;  %vm2127_vm1 = vcmask 1047556   ;;  %vm4367_vm2 = vcmask 15360  }
  0x17   : > { %p161_p13 = scmp.lt.s32.totalorder %s5495_s25, 31  ;;  %s5693_s5 = smov 2   ;;  %vm4384_vm3 = vcmask 31744   ;;  %vm4401_vm4 = vcmask 48128   ;;  %vm4418_vm5 = vcmask 64512   ;;  %vm4435_vm6 = vcmask 80896  }
  0x18   : > { %v207_v1 = vshrl.u32 %v206_v0, 7  ;;  %s160_s26 = scalar_select %p159_p12, %s5677_s10, 1  ;;  %vm4452_vm7 = vcmask 97280   ;;  %vm4469_vm8 = vcmask 113664   ;;  %vm4798_vm9 = vcmask 1040384  }
  0x19   : > { %s9033_s25 = smov (!%p161_p13, %s5495_s25), 31  ;;  %s5694_s14 = smov 4   ;;  %vm5355_vm10 = vcmask 130048   ;;  %vm5357_vm11 = vcmask 261120   ;;  %vm5359_vm12 = vcmask 392192   ;;  %vm5361_vm13 = vcmask 523264  }
  0x1a   : > { %5594 = vset.pattern.permute.xlu2 %v207_v1  ;;  %5593 = vset.pattern.permute.xlu1 %v207_v1  ;;  %s5497_s27 = sshll.u32 %s160_s26, 7  ;;  %s5496_s28 = sshll.u32 %s9033_s25, 2  ;;  %vm5363_vm14 = vcmask 654336   ;;  %vm5365_vm15 = vcmask 785408  }
  0x1b   : > { %5592 = vset.pattern.permute.xlu0 %v207_v1  ;;  %s168_s29 = sadd.s32 %s5497_s27, %s5496_s28  ;;  %s5695_s15 = smov 6  }
  0x1c   : > { %s5498_s30 = sshll.u32 %s168_s29, 3  ;;  %s5696_s18 = smov 8  }
  0x1d   : > { %s5794_s4 = scalar_lea.vmem %s8673_s0, %s5498_s30  ;;  %s5697_s21 = smov 10  }
  0x1e   : > { %v173_v2 = vld [vmem:[%s5794_s4] sm:$0xff]  ;;  %v174_v9 = vld [vmem:[%s5794_s4 + $0x8] sm:$0xff]  ;;  %v175_v19 = vld [vmem:[%s5794_s4 + $0x10] sm:$0xff]  ;;  %s5698_s22 = smov 12   ;;  %s5699_s23 = smov 14  }
  0x1f   : > { %v233_v3 = vperm.slane %v173_v2, 4  ;;  %v219_v4 = vperm.slane %v173_v2, 2  ;;  %v205_v5 = vperm.slane %v173_v2, 0  ;;  %v240_v6 = vperm.slane %v173_v2, 5  ;;  %v176_v29 = vld [vmem:[%s5794_s4 + $0x18] sm:$0xff]  ;;  %v181_v36 = vld [vmem:[%s5794_s4 + $0x40] sm:$0xff] }
  0x20   : > { %v226_v7 = vperm.slane %v173_v2, 3  ;;  %v212_v8 = vperm.slane %v173_v2, 1  ;;  %v261_v10 = vperm.slane %v174_v9, 0  ;;  %v254_v11 = vperm.slane %v173_v2, 7  ;;  %v182_v47 = vld [vmem:[%s5794_s4 + $0x48] sm:$0xff]  ;;  %v183_v62 = vld [vmem:[%s5794_s4 + $0x50] sm:$0xff] }
  0x21   : > { %v247_v12 = vperm.slane %v173_v2, 6  ;;  %v282_v13 = vperm.slane %v174_v9, 3  ;;  %v275_v14 = vperm.slane %v174_v9, 2  ;;  %v268_v15 = vperm.slane %v174_v9, 1  ;;  %s5700_s25 = smov 16   ;;  %s5701_s26 = smov 32  }
  0x22   : > { %238 = vperm.xlu2 %5594, %v233_v3   ;;  %224 = vperm.xlu1 %5593, %v219_v4   ;;  %v303_v16 = vperm.slane %v174_v9, 6  ;;  %v296_v17 = vperm.slane %v174_v9, 5  ;;  %v289_v18 = vperm.slane %v174_v9, 4  ;;  %v324_v20 = vperm.slane %v175_v19, 1  ;;  %s5702_s27 = smov 48   ;;  %s5703_s28 = smov 64  }
  0x23   : > { %210 = vperm.xlu0 %5592, %v205_v5   ;;  %v317_v21 = vperm.slane %v175_v19, 0  ;;  %v310_v22 = vperm.slane %v174_v9, 7  ;;  %v345_v23 = vperm.slane %v175_v19, 4  ;;  %v338_v24 = vperm.slane %v175_v19, 3  ;;  %s5704_s29 = smov 80   ;;  %s5705_s30 = smov 96  }
  0x24   : > { %v331_v25 = vperm.slane %v175_v19, 2  ;;  %v366_v26 = vperm.slane %v175_v19, 7  ;;  %v359_v27 = vperm.slane %v175_v19, 6  ;;  %v352_v28 = vperm.slane %v175_v19, 5  ;;  %s5706_s2 = smov 112   ;;  %s154_s3 = sand.u32 1, %s5665_s7  }
  0x25   : > { %v387_v30 = vperm.slane %v176_v29, 2  ;;  %v380_v31 = vperm.slane %v176_v29, 1  ;;  %v373_v32 = vperm.slane %v176_v29, 0  ;;  %v408_v33 = vperm.slane %v176_v29, 5 }
  0x26   : > { %v401_v34 = vperm.slane %v176_v29, 4  ;;  %v394_v35 = vperm.slane %v176_v29, 3  ;;  %v429_v37 = vperm.slane %v181_v36, 0  ;;  %v422_v38 = vperm.slane %v176_v29, 7 }
  0x27   : > { %v415_v39 = vperm.slane %v176_v29, 6  ;;  %v450_v40 = vperm.slane %v181_v36, 3  ;;  %v443_v41 = vperm.slane %v181_v36, 2  ;;  %v436_v42 = vperm.slane %v181_v36, 1 }
  0x28   : > { %v471_v44 = vperm.slane %v181_v36, 6  ;;  %v464_v45 = vperm.slane %v181_v36, 5  ;;  %v457_v46 = vperm.slane %v181_v36, 4  ;;  %v492_v49 = vperm.slane %v182_v47, 1 }
  0x29   : > { %v485_v50 = vperm.slane %v182_v47, 0  ;;  %v478_v51 = vperm.slane %v181_v36, 7  ;;  %v513_v53 = vperm.slane %v182_v47, 4  ;;  %v506_v54 = vperm.slane %v182_v47, 3 }
  0x2a   : > { %245 = vperm.xlu2 %5594, %v240_v6   ;;  %231 = vperm.xlu1 %5593, %v226_v7   ;;  %v499_v55 = vperm.slane %v182_v47, 2  ;;  %v534_v59 = vperm.slane %v182_v47, 7  ;;  %v527_v60 = vperm.slane %v182_v47, 6  ;;  %v520_v61 = vperm.slane %v182_v47, 5 }
  0x2b   : > { %217 = vperm.xlu0 %5592, %v212_v8   ;;  %v555_v2 = vperm.slane %v183_v62, 2  ;;  %v548_v3 = vperm.slane %v183_v62, 1  ;;  %v541_v4 = vperm.slane %v183_v62, 0  ;;  %v576_v8 = vperm.slane %v183_v62, 5 }
  0x2c   : > { %v569_v9 = vperm.slane %v183_v62, 4 }
  0x32   : > { %266 = vperm.xlu2 %5594, %v261_v10   ;;  %259 = vperm.xlu1 %5593, %v254_v11   ;;  %v562_v10 = vperm.slane %v183_v62, 3  ;;  %v184_v11 = vld [vmem:[%s5794_s4 + $0x58] sm:$0xff] }
  0x33   : > { %252 = vperm.xlu0 %5592, %v247_v12   ;;  %v625_v29 = vperm.slane %v184_v11, 4  ;;  %v646_v36 = vperm.slane %v184_v11, 7 }
  0x3a   : > { %287 = vperm.xlu2 %5594, %v282_v13   ;;  %280 = vperm.xlu1 %5593, %v275_v14  }
  0x3b   : > { %273 = vperm.xlu0 %5592, %v268_v15   ;;  %v597_v15 = vperm.slane %v184_v11, 0 }
  0x42   : > { %308 = vperm.xlu2 %5594, %v303_v16   ;;  %301 = vperm.xlu1 %5593, %v296_v17   ;;  %v590_v16 = vperm.slane %v183_v62, 7  ;;  %v583_v17 = vperm.slane %v183_v62, 6 }
  0x43   : > { %294 = vperm.xlu0 %5592, %v289_v18  }
  0x4a   : > { %329 = vperm.xlu2 %5594, %v324_v20   ;;  %322 = vperm.xlu1 %5593, %v317_v21   ;;  %v618_v21 = vperm.slane %v184_v11, 3 }
  0x4b   : > { %315 = vperm.xlu0 %5592, %v310_v22   ;;  %v611_v22 = vperm.slane %v184_v11, 2 }
  0x52   : > { %350 = vperm.xlu2 %5594, %v345_v23   ;;  %343 = vperm.xlu1 %5593, %v338_v24   ;;  %v604_v23 = vperm.slane %v184_v11, 1 }
  0x53   : > { %336 = vperm.xlu0 %5592, %v331_v25  }
  0x5a   : > { %371 = vperm.xlu2 %5594, %v366_v26   ;;  %364 = vperm.xlu1 %5593, %v359_v27   ;;  %v639_v27 = vperm.slane %v184_v11, 6 }
  0x5b   : > { %357 = vperm.xlu0 %5592, %v352_v28   ;;  %v632_v28 = vperm.slane %v184_v11, 5 }
  0x62   : > { %392 = vperm.xlu2 %5594, %v387_v30   ;;  %385 = vperm.xlu1 %5593, %v380_v31   ;;  %v189_v30 = vld [vmem:[%s5794_s4 + $0x80] sm:$0xff] }
  0x63   : > { %378 = vperm.xlu0 %5592, %v373_v32   ;;  %v702_v47 = vperm.slane %v189_v30, 7 }
  0x6a   : > { %413 = vperm.xlu2 %5594, %v408_v33   ;;  %406 = vperm.xlu1 %5593, %v401_v34   ;;  %v660_v34 = vperm.slane %v189_v30, 1 }
  0x6b   : > { %399 = vperm.xlu0 %5592, %v394_v35   ;;  %v653_v35 = vperm.slane %v189_v30, 0 }
  0x72   : > { %434 = vperm.xlu2 %5594, %v429_v37   ;;  %427 = vperm.xlu1 %5593, %v422_v38  }
  0x73   : > { %420 = vperm.xlu0 %5592, %v415_v39  }
  0x7a   : > { %455 = vperm.xlu2 %5594, %v450_v40   ;;  %448 = vperm.xlu1 %5593, %v443_v41   ;;  %v681_v40 = vperm.slane %v189_v30, 4  ;;  %v674_v41 = vperm.slane %v189_v30, 3 }
  0x7b   : > { %441 = vperm.xlu0 %5592, %v436_v42   ;;  %v667_v42 = vperm.slane %v189_v30, 2 }
  0x7c   : > { %v5801_v43 = vpop.permute.xlu2 %238 }
  0x82   : > { %476 = vperm.xlu2 %5594, %v471_v44   ;;  %469 = vperm.xlu1 %5593, %v464_v45  }
  0x83   : > { %462 = vperm.xlu0 %5592, %v457_v46  }
  0x84   : > { %v5804_v48 = vpop.permute.xlu2 %245 }
  0x8a   : > { %497 = vperm.xlu2 %5594, %v492_v49   ;;  %490 = vperm.xlu1 %5593, %v485_v50   ;;  %v695_v49 = vperm.slane %v189_v30, 6  ;;  %v688_v50 = vperm.slane %v189_v30, 5 }
  0x8b   : > { %483 = vperm.xlu0 %5592, %v478_v51   ;;  %v190_v51 = vld [vmem:[%s5794_s4 + $0x88] sm:$0xff] }
  0x8c   : > { %v5806_v52 = vpop.permute.xlu2 %266 }
  0x92   : > { %518 = vperm.xlu2 %5594, %v513_v53   ;;  %511 = vperm.xlu1 %5593, %v506_v54  }
  0x93   : > { %504 = vperm.xlu0 %5592, %v499_v55  }
  0x94   : > { %v5808_v56 = vpop.permute.xlu2 %287  ;;  %v5810_v57 = vpop.permute.xlu1 %224 }
  0x95   : > { %v5812_v58 = vpop.permute.xlu0 %210 }
  0x9a   : > { %539 = vperm.xlu2 %5594, %v534_v59   ;;  %532 = vperm.xlu1 %5593, %v527_v60   ;;  %v723_v59 = vperm.slane %v190_v51, 2  ;;  %v716_v60 = vperm.slane %v190_v51, 1 }
  0x9b   : > { %525 = vperm.xlu0 %5592, %v520_v61   ;;  %v709_v61 = vperm.slane %v190_v51, 0 }
  0x9c   : > { %v5815_v63 = vpop.permute.xlu2 %308  ;;  %v5817_v0 = vpop.permute.xlu1 %231 }
  0x9d   : > { %v5819_v1 = vpop.permute.xlu0 %217 }
  0xa2   : > { %560 = vperm.xlu2 %5594, %v555_v2   ;;  %553 = vperm.xlu1 %5593, %v548_v3  }
  0xa3   : > { %546 = vperm.xlu0 %5592, %v541_v4   ;;  %v744_v4 = vperm.slane %v190_v51, 5 }
  0xa4   : > { %v5821_v5 = vpop.permute.xlu2 %329  ;;  %v5823_v6 = vpop.permute.xlu1 %259 }
  0xa5   : > { %v5825_v7 = vpop.permute.xlu0 %252 }
  0xaa   : > { %581 = vperm.xlu2 %5594, %v576_v8   ;;  %574 = vperm.xlu1 %5593, %v569_v9   ;;  %v737_v8 = vperm.slane %v190_v51, 4  ;;  %v730_v9 = vperm.slane %v190_v51, 3 }
  0xab   : > { %567 = vperm.xlu0 %5592, %v562_v10   ;;  %v191_v10 = vld [vmem:[%s5794_s4 + $0x90] sm:$0xff] }
  0xac   : > { %v5828_v12 = vpop.permute.xlu2 %350  ;;  %v5830_v13 = vpop.permute.xlu1 %280  ;;  %v779_v30 = vperm.slane %v191_v10, 2 }
  0xad   : > { %v5832_v14 = vpop.permute.xlu0 %273 }
  0xb2   : > { %602 = vperm.xlu2 %5594, %v597_v15   ;;  %595 = vperm.xlu1 %5593, %v590_v16  }
  0xb3   : > { %588 = vperm.xlu0 %5592, %v583_v17   ;;  %v765_v17 = vperm.slane %v191_v10, 0 }
  0xb4   : > { %v5834_v18 = vpop.permute.xlu2 %371  ;;  %v5836_v19 = vpop.permute.xlu1 %301 }
  0xb5   : > { %v5838_v20 = vpop.permute.xlu0 %294 }
  0xba   : > { %623 = vperm.xlu2 %5594, %v618_v21   ;;  %616 = vperm.xlu1 %5593, %v611_v22   ;;  %v758_v21 = vperm.slane %v190_v51, 7  ;;  %v751_v22 = vperm.slane %v190_v51, 6 }
  0xbb   : > { %609 = vperm.xlu0 %5592, %v604_v23  }
  0xbc   : > { %v5840_v24 = vpop.permute.xlu2 %392  ;;  %v5842_v25 = vpop.permute.xlu1 %322 }
  0xbd   : > { %v5844_v26 = vpop.permute.xlu0 %315 }
  0xc2   : > { %644 = vperm.xlu2 %5594, %v639_v27   ;;  %637 = vperm.xlu1 %5593, %v632_v28  }
  0xc3   : > { %630 = vperm.xlu0 %5592, %v625_v29   ;;  %v786_v29 = vperm.slane %v191_v10, 3 }
  0xc4   : > { %v5847_v31 = vpop.permute.xlu2 %413  ;;  %v5849_v32 = vpop.permute.xlu1 %343 }
  0xc5   : > { %v5851_v33 = vpop.permute.xlu0 %336 }
  0xca   : > { %665 = vperm.xlu2 %5594, %v660_v34   ;;  %658 = vperm.xlu1 %5593, %v653_v35   ;;  %v772_v34 = vperm.slane %v191_v10, 1 }
  0xcb   : > { %651 = vperm.xlu0 %5592, %v646_v36  }
  0xcc   : > { %v5853_v37 = vpop.permute.xlu2 %434  ;;  %v5855_v38 = vpop.permute.xlu1 %364 }
  0xcd   : > { %v5857_v39 = vpop.permute.xlu0 %357 }
  0xd2   : > { %686 = vperm.xlu2 %5594, %v681_v40   ;;  %679 = vperm.xlu1 %5593, %v674_v41   ;;  %v807_v41 = vperm.slane %v191_v10, 6 }
  0xd3   : > { %672 = vperm.xlu0 %5592, %v667_v42   ;;  %v800_v42 = vperm.slane %v191_v10, 5 }
  0xd4   : > { %v5859_v44 = vpop.permute.xlu2 %455  ;;  %v5861_v45 = vpop.permute.xlu1 %385 }
  0xd5   : > { %v5863_v46 = vpop.permute.xlu0 %378 }
  0xda   : > { %707 = vperm.xlu2 %5594, %v702_v47   ;;  %700 = vperm.xlu1 %5593, %v695_v49   ;;  %v793_v47 = vperm.slane %v191_v10, 4  ;;  %v192_v49 = vld [vmem:[%s5794_s4 + $0x98] sm:$0xff] }
  0xdb   : > { %693 = vperm.xlu0 %5592, %v688_v50  }
  0xdc   : > { %v5866_v53 = vpop.permute.xlu2 %476  ;;  %v5868_v54 = vpop.permute.xlu1 %406 }
  0xdd   : > { %8677 = vst [vmem:[#allocation5_spill] sm:$0xff] %v5866_v53  ;;  %v5870_v55 = vpop.permute.xlu0 %399 }
  0xe2   : > { %728 = vperm.xlu2 %5594, %v723_v59   ;;  %721 = vperm.xlu1 %5593, %v716_v60   ;;  %v828_v60 = vperm.slane %v192_v49, 1 }
  0xe3   : > { %714 = vperm.xlu0 %5592, %v709_v61   ;;  %v821_v61 = vperm.slane %v192_v49, 0 }
  0xe4   : > { %v5872_v62 = vpop.permute.xlu2 %497  ;;  %v5874_v2 = vpop.permute.xlu1 %427 }
  0xe5   : > { %8678 = vst [vmem:[#allocation6_spill] sm:$0xff] %v5872_v62  ;;  %v5876_v3 = vpop.permute.xlu0 %420 }
  0xea   : > { %749 = vperm.xlu2 %5594, %v744_v4   ;;  %742 = vperm.xlu1 %5593, %v737_v8   ;;  %v814_v4 = vperm.slane %v191_v10, 7 }
  0xeb   : > { %735 = vperm.xlu0 %5592, %v730_v9  }
  0xec   : > { %v5879_v11 = vpop.permute.xlu2 %518  ;;  %v5881_v15 = vpop.permute.xlu1 %448 }
  0xed   : > { %8679 = vst [vmem:[#allocation7_spill] sm:$0xff] %v5879_v11  ;;  %v5883_v16 = vpop.permute.xlu0 %441 }
  0xf2   : > { %770 = vperm.xlu2 %5594, %v765_v17   ;;  %763 = vperm.xlu1 %5593, %v758_v21   ;;  %v849_v21 = vperm.slane %v192_v49, 4 }
  0xf3   : > { %756 = vperm.xlu0 %5592, %v751_v22   ;;  %v842_v22 = vperm.slane %v192_v49, 3 }
  0xf4   : > { %v5885_v23 = vpop.permute.xlu2 %539  ;;  %v5887_v27 = vpop.permute.xlu1 %469 }
  0xf5   : > { %8680 = vst [vmem:[#allocation8_spill] sm:$0xff] %v5885_v23  ;;  %v5889_v28 = vpop.permute.xlu0 %462 }
  0xf6   : > { %8681 = vst [vmem:[#allocation9_spill] sm:$0xff] %v5887_v27 }
  0xfa   : > { %791 = vperm.xlu2 %5594, %v786_v29   ;;  %784 = vperm.xlu1 %5593, %v779_v30   ;;  %v835_v29 = vperm.slane %v192_v49, 2 }
  0xfb   : > { %777 = vperm.xlu0 %5592, %v772_v34  }
  0xfc   : > { %v5891_v35 = vpop.permute.xlu2 %560  ;;  %v5893_v36 = vpop.permute.xlu1 %490 }
  0xfd   : > { %8682 = vst [vmem:[#allocation10_spill] sm:$0xff] %v5891_v35  ;;  %v5895_v40 = vpop.permute.xlu0 %483 }
  0xfe   : > { %8683 = vst [vmem:[#allocation11_spill] sm:$0xff] %v5893_v36 }
 0x102   : > { %812 = vperm.xlu2 %5594, %v807_v41   ;;  %805 = vperm.xlu1 %5593, %v800_v42   ;;  %v870_v41 = vperm.slane %v192_v49, 7  ;;  %v863_v42 = vperm.slane %v192_v49, 6 }
 0x103   : > { %798 = vperm.xlu0 %5592, %v793_v47   ;;  %v856_v47 = vperm.slane %v192_v49, 5 }
 0x104   : > { %v5898_v50 = vpop.permute.xlu2 %581  ;;  %v5900_v51 = vpop.permute.xlu1 %511 }
 0x105   : > { %8684 = vst [vmem:[#allocation12_spill] sm:$0xff] %v5898_v50  ;;  %v5902_v59 = vpop.permute.xlu0 %504  ;;  %v198_v50 = vld [vmem:[%s5794_s4 + $0xc8] sm:$0xff] }
 0x106   : > { %8685 = vst [vmem:[#allocation13_spill] sm:$0xff] %v5900_v51 }
 0x107   : > { %8686 = vst [vmem:[#allocation14_spill] sm:$0xff] %v5902_v59 }
 0x10a   : > { %833 = vperm.xlu2 %5594, %v828_v60   ;;  %826 = vperm.xlu1 %5593, %v821_v61   ;;  %v197_v60 = vld [vmem:[%s5794_s4 + $0xc0] sm:$0xff] }
 0x10b   : > { %819 = vperm.xlu0 %5592, %v814_v4  }
 0x10c   : > { %v5904_v8 = vpop.permute.xlu2 %602  ;;  %v5906_v9 = vpop.permute.xlu1 %532 }
 0x10d   : > { %8687 = vst [vmem:[#allocation15_spill] sm:$0xff] %v5904_v8  ;;  %v5908_v17 = vpop.permute.xlu0 %525 }
 0x10e   : > { %8688 = vst [vmem:[#allocation16_spill] sm:$0xff] %v5906_v9 }
 0x10f   : > { %8689 = vst [vmem:[#allocation17_spill] sm:$0xff] %v5908_v17 }
 0x112   : > { %854 = vperm.xlu2 %5594, %v849_v21   ;;  %847 = vperm.xlu1 %5593, %v842_v22   ;;  %v891_v22 = vperm.slane %v197_v60, 2 }
 0x113   : > { %840 = vperm.xlu0 %5592, %v835_v29   ;;  %v884_v29 = vperm.slane %v197_v60, 1 }
 0x114   : > { %v5910_v30 = vpop.permute.xlu2 %623  ;;  %v5912_v34 = vpop.permute.xlu1 %553 }
 0x115   : > { %8690 = vst [vmem:[#allocation18_spill] sm:$0xff] %v5910_v30  ;;  %v5914_v10 = vpop.permute.xlu0 %546  ;;  %v877_v30 = vperm.slane %v197_v60, 0 }
 0x116   : > { %8691 = vst [vmem:[#allocation19_spill] sm:$0xff] %v5912_v34 }
 0x117   : > { %8692 = vst [vmem:[#allocation20_spill] sm:$0xff] %v5914_v10 }
 0x11a   : > { %875 = vperm.xlu2 %5594, %v870_v41   ;;  %868 = vperm.xlu1 %5593, %v863_v42   ;;  %v912_v42 = vperm.slane %v197_v60, 5 }
 0x11b   : > { %861 = vperm.xlu0 %5592, %v856_v47   ;;  %v905_v47 = vperm.slane %v197_v60, 4 }
 0x11c   : > { %v5917_v61 = vpop.permute.xlu2 %644  ;;  %v5919_v4 = vpop.permute.xlu1 %574 }
 0x11d   : > { %8693 = vst [vmem:[#allocation21_spill] sm:$0xff] %v5917_v61  ;;  %v5921_v21 = vpop.permute.xlu0 %567  ;;  %v898_v61 = vperm.slane %v197_v60, 3 }
 0x11e   : > { %8694 = vst [vmem:[#allocation22_spill] sm:$0xff] %v5919_v4 }
 0x11f   : > { %8695 = vst [vmem:[#allocation23_spill] sm:$0xff] %v5921_v21 }
 0x122   : > { %896 = vperm.xlu2 %5594, %v891_v22   ;;  %889 = vperm.xlu1 %5593, %v884_v29   ;;  %v926_v29 = vperm.slane %v197_v60, 7 }
 0x123   : > { %882 = vperm.xlu0 %5592, %v877_v30   ;;  %v933_v30 = vperm.slane %v198_v50, 0 }
 0x124   : > { %v5923_v8 = vpop.permute.xlu2 %665  ;;  %v5925_v49 = vpop.permute.xlu1 %595 }
 0x125   : > { %8696 = vst [vmem:[#allocation24_spill] sm:$0xff] %v5923_v8  ;;  %v5927_v41 = vpop.permute.xlu0 %588  ;;  %v919_v8 = vperm.slane %v197_v60, 6 }
 0x126   : > { %8697 = vst [vmem:[#allocation25_spill] sm:$0xff] %v5925_v49 }
 0x127   : > { %8698 = vst [vmem:[#allocation26_spill] sm:$0xff] %v5927_v41 }
 0x12a   : > { %917 = vperm.xlu2 %5594, %v912_v42   ;;  %910 = vperm.xlu1 %5593, %v905_v47   ;;  %v947_v47 = vperm.slane %v198_v50, 2 }
 0x12b   : > { %903 = vperm.xlu0 %5592, %v898_v61   ;;  %v954_v61 = vperm.slane %v198_v50, 3 }
 0x12c   : > { %v5930_v4 = vpop.permute.xlu2 %686  ;;  %v5932_v34 = vpop.permute.xlu1 %616 }
 0x12d   : > { %8699 = vst [vmem:[#allocation27_spill] sm:$0xff] %v5930_v4  ;;  %v5934_v22 = vpop.permute.xlu0 %609  ;;  %v940_v4 = vperm.slane %v198_v50, 1 }
 0x12e   : > { %8700 = vst [vmem:[#allocation28_spill] sm:$0xff] %v5932_v34 }
 0x12f   : > { %8701 = vst [vmem:[#allocation29_spill] sm:$0xff] %v5934_v22 }
 0x132   : > { %938 = vperm.xlu2 %5594, %v933_v30   ;;  %931 = vperm.xlu1 %5593, %v926_v29   ;;  %v968_v30 = vperm.slane %v198_v50, 5  ;;  %v961_v29 = vperm.slane %v198_v50, 4 }
 0x133   : > { %924 = vperm.xlu0 %5592, %v919_v8   ;;  %v975_v8 = vperm.slane %v198_v50, 6 }
 0x134   : > { %v5936_v49 = vpop.permute.xlu2 %707  ;;  %v5938_v41 = vpop.permute.xlu1 %637 }
 0x135   : > { %8702 = vst [vmem:[#allocation30_spill] sm:$0xff] %v5936_v49  ;;  %v5940_v42 = vpop.permute.xlu0 %630  ;;  %v199_v49 = vld [vmem:[%s5794_s4 + $0xd0] sm:$0xff] }
 0x136   : > { %8703 = vst [vmem:[#allocation31_spill] sm:$0xff] %v5938_v41 }
 0x137   : > { %8704 = vst [vmem:[#allocation32_spill] sm:$0xff] %v5940_v42 }
 0x13a   : > { %959 = vperm.xlu2 %5594, %v954_v61   ;;  %952 = vperm.xlu1 %5593, %v947_v47   ;;  %v989_v47 = vperm.slane %v199_v49, 0 }
 0x13b   : > { %945 = vperm.xlu0 %5592, %v940_v4   ;;  %v996_v4 = vperm.slane %v199_v49, 1 }
 0x13c   : > { %v5942_v34 = vpop.permute.xlu2 %728  ;;  %v5944_v22 = vpop.permute.xlu1 %658 }
 0x13d   : > { %8705 = vst [vmem:[#allocation33_spill] sm:$0xff] %v5942_v34  ;;  %v5946_v60 = vpop.permute.xlu0 %651  ;;  %v982_v34 = vperm.slane %v198_v50, 7 }
 0x13e   : > { %8706 = vst [vmem:[#allocation34_spill] sm:$0xff] %v5944_v22 }
 0x13f   : > { %8707 = vst [vmem:[#allocation35_spill] sm:$0xff] %v5946_v60 }
 0x142   : > { %980 = vperm.xlu2 %5594, %v975_v8   ;;  %973 = vperm.xlu1 %5593, %v968_v30   ;;  %v1017_v30 = vperm.slane %v199_v49, 4 }
 0x143   : > { %966 = vperm.xlu0 %5592, %v961_v29   ;;  %v1010_v29 = vperm.slane %v199_v49, 3 }
 0x144   : > { %v5949_v41 = vpop.permute.xlu2 %749  ;;  %v5951_v42 = vpop.permute.xlu1 %679 }
 0x145   : > { %8708 = vst [vmem:[#allocation36_spill] sm:$0xff] %v5949_v41  ;;  %v5953_v61 = vpop.permute.xlu0 %672  ;;  %v1003_v41 = vperm.slane %v199_v49, 2 }
 0x146   : > { %8709 = vst [vmem:[#allocation37_spill] sm:$0xff] %v5951_v42 }
 0x147   : > { %8710 = vst [vmem:[#allocation38_spill] sm:$0xff] %v5953_v61 }
 0x14a   : > { %1001 = vperm.xlu2 %5594, %v996_v4   ;;  %994 = vperm.xlu1 %5593, %v989_v47   ;;  %v1031_v4 = vperm.slane %v199_v49, 6  ;;  %v1024_v47 = vperm.slane %v199_v49, 5 }
 0x14b   : > { %987 = vperm.xlu0 %5592, %v982_v34   ;;  %v1038_v34 = vperm.slane %v199_v49, 7 }
 0x14c   : > { %v5955_v22 = vpop.permute.xlu2 %770  ;;  %v5957_v60 = vpop.permute.xlu1 %700 }
 0x14d   : > { %8711 = vst [vmem:[#allocation39_spill] sm:$0xff] %v5955_v22  ;;  %v5959_v8 = vpop.permute.xlu0 %693  ;;  %v200_v22 = vld [vmem:[%s5794_s4 + $0xd8] sm:$0xff] }
 0x14e   : > { %8712 = vst [vmem:[#allocation40_spill] sm:$0xff] %v5957_v60 }
 0x14f   : > { %8713 = vst [vmem:[#allocation41_spill] sm:$0xff] %v5959_v8 }
 0x152   : > { %1022 = vperm.xlu2 %5594, %v1017_v30   ;;  %1015 = vperm.xlu1 %5593, %v1010_v29   ;;  %v1052_v29 = vperm.slane %v200_v22, 1 }
 0x153   : > { %1008 = vperm.xlu0 %5592, %v1003_v41   ;;  %v1059_v41 = vperm.slane %v200_v22, 2 }
 0x154   : > { %v5961_v42 = vpop.permute.xlu2 %791  ;;  %v5963_v61 = vpop.permute.xlu1 %721 }
 0x155   : > { %8714 = vst [vmem:[#allocation42_spill] sm:$0xff] %v5961_v42  ;;  %v5965_v50 = vpop.permute.xlu0 %714  ;;  %v1045_v42 = vperm.slane %v200_v22, 0 }
 0x156   : > { %8715 = vst [vmem:[#allocation43_spill] sm:$0xff] %v5963_v61 }
 0x157   : > { %8716 = vst [vmem:[#allocation44_spill] sm:$0xff] %v5965_v50 }
 0x15a   : > { %1043 = vperm.xlu2 %5594, %v1038_v34   ;;  %1036 = vperm.xlu1 %5593, %v1031_v4   ;;  %v1080_v4 = vperm.slane %v200_v22, 5 }
 0x15b   : > { %1029 = vperm.xlu0 %5592, %v1024_v47   ;;  %v1073_v47 = vperm.slane %v200_v22, 4 }
 0x15c   : > { %v5968_v60 = vpop.permute.xlu2 %812  ;;  %v5970_v8 = vpop.permute.xlu1 %742 }
 0x15d   : > { %8717 = vst [vmem:[#allocation45_spill] sm:$0xff] %v5968_v60  ;;  %v5972_v30 = vpop.permute.xlu0 %735  ;;  %v1066_v60 = vperm.slane %v200_v22, 3 }
 0x15e   : > { %8718 = vst [vmem:[#allocation46_spill] sm:$0xff] %v5970_v8  ;;  %v177_v8 = vld [vmem:[%s5794_s4 + $0x20] sm:$0xff] }
 0x15f   : > { %8719 = vst [vmem:[#allocation47_spill] sm:$0xff] %v5972_v30 }
 0x162   : > { %1064 = vperm.xlu2 %5594, %v1059_v41   ;;  %1057 = vperm.xlu1 %5593, %v1052_v29   ;;  %v1094_v29 = vperm.slane %v200_v22, 7 }
 0x163   : > { %1050 = vperm.xlu0 %5592, %v1045_v42   ;;  %v1101_v42 = vperm.slane %v177_v8, 0 }
 0x164   : > { %v5974_v61 = vpop.permute.xlu2 %833  ;;  %v5976_v49 = vpop.permute.xlu1 %763 }
 0x165   : > { %8720 = vst [vmem:[#allocation48_spill] sm:$0xff] %v5974_v61  ;;  %v5978_v34 = vpop.permute.xlu0 %756  ;;  %v1087_v61 = vperm.slane %v200_v22, 6 }
 0x166   : > { %8721 = vst [vmem:[#allocation49_spill] sm:$0xff] %v5976_v49 }
 0x167   : > { %8722 = vst [vmem:[#allocation50_spill] sm:$0xff] %v5978_v34 }
 0x16a   : > { %1085 = vperm.xlu2 %5594, %v1080_v4   ;;  %1078 = vperm.xlu1 %5593, %v1073_v47   ;;  %v1115_v47 = vperm.slane %v177_v8, 2 }
 0x16b   : > { %1071 = vperm.xlu0 %5592, %v1066_v60   ;;  %v1122_v60 = vperm.slane %v177_v8, 3 }
 0x16c   : > { %v5981_v30 = vpop.permute.xlu2 %854  ;;  %v5983_v50 = vpop.permute.xlu1 %784 }
 0x16d   : > { %8723 = vst [vmem:[#allocation51_spill] sm:$0xff] %v5981_v30  ;;  %v5985_v41 = vpop.permute.xlu0 %777  ;;  %v1108_v30 = vperm.slane %v177_v8, 1 }
 0x16e   : > { %8724 = vst [vmem:[#allocation52_spill] sm:$0xff] %v5983_v50 }
 0x16f   : > { %8725 = vst [vmem:[#allocation53_spill] sm:$0xff] %v5985_v41 }
 0x172   : > { %1106 = vperm.xlu2 %5594, %v1101_v42   ;;  %1099 = vperm.xlu1 %5593, %v1094_v29   ;;  %v1136_v42 = vperm.slane %v177_v8, 5  ;;  %v1129_v29 = vperm.slane %v177_v8, 4 }
 0x173   : > { %1092 = vperm.xlu0 %5592, %v1087_v61   ;;  %v1143_v61 = vperm.slane %v177_v8, 6 }
 0x174   : > { %v5987_v49 = vpop.permute.xlu2 %875  ;;  %v5989_v34 = vpop.permute.xlu1 %805 }
 0x175   : > { %8726 = vst [vmem:[#allocation54_spill] sm:$0xff] %v5987_v49  ;;  %v5991_v4 = vpop.permute.xlu0 %798  ;;  %v178_v49 = vld [vmem:[%s5794_s4 + $0x28] sm:$0xff] }
 0x176   : > { %8727 = vst [vmem:[#allocation55_spill] sm:$0xff] %v5989_v34 }
 0x177   : > { %8728 = vst [vmem:[#allocation56_spill] sm:$0xff] %v5991_v4 }
 0x17a   : > { %1127 = vperm.xlu2 %5594, %v1122_v60   ;;  %1120 = vperm.xlu1 %5593, %v1115_v47   ;;  %v1157_v47 = vperm.slane %v178_v49, 0 }
 0x17b   : > { %1113 = vperm.xlu0 %5592, %v1108_v30   ;;  %v1164_v30 = vperm.slane %v178_v49, 1 }
 0x17c   : > { %v5993_v50 = vpop.permute.xlu2 %896  ;;  %v5995_v41 = vpop.permute.xlu1 %826 }
 0x17d   : > { %8729 = vst [vmem:[#allocation57_spill] sm:$0xff] %v5993_v50  ;;  %v5997_v22 = vpop.permute.xlu0 %819  ;;  %v1150_v50 = vperm.slane %v177_v8, 7 }
 0x17e   : > { %8730 = vst [vmem:[#allocation58_spill] sm:$0xff] %v5995_v41 }
 0x17f   : > { %8731 = vst [vmem:[#allocation59_spill] sm:$0xff] %v5997_v22 }
 0x182   : > { %1148 = vperm.xlu2 %5594, %v1143_v61   ;;  %1141 = vperm.xlu1 %5593, %v1136_v42   ;;  %v1185_v42 = vperm.slane %v178_v49, 4 }
 0x183   : > { %1134 = vperm.xlu0 %5592, %v1129_v29   ;;  %v1178_v29 = vperm.slane %v178_v49, 3 }
 0x184   : > { %v6000_v34 = vpop.permute.xlu2 %917  ;;  %v6002_v4 = vpop.permute.xlu1 %847 }
 0x185   : > { %8732 = vst [vmem:[#allocation60_spill] sm:$0xff] %v6000_v34  ;;  %v6004_v60 = vpop.permute.xlu0 %840  ;;  %v1171_v34 = vperm.slane %v178_v49, 2 }
 0x186   : > { %8733 = vst [vmem:[#allocation61_spill] sm:$0xff] %v6002_v4 }
 0x187   : > { %8734 = vst [vmem:[#allocation62_spill] sm:$0xff] %v6004_v60 }
 0x18a   : > { %1169 = vperm.xlu2 %5594, %v1164_v30   ;;  %1162 = vperm.xlu1 %5593, %v1157_v47   ;;  %v1199_v30 = vperm.slane %v178_v49, 6  ;;  %v1192_v47 = vperm.slane %v178_v49, 5 }
 0x18b   : > { %1155 = vperm.xlu0 %5592, %v1150_v50   ;;  %v1206_v50 = vperm.slane %v178_v49, 7 }
 0x18c   : > { %v6006_v41 = vpop.permute.xlu2 %938  ;;  %v6008_v22 = vpop.permute.xlu1 %868 }
 0x18d   : > { %8735 = vst [vmem:[#allocation63_spill] sm:$0xff] %v6006_v41  ;;  %v6010_v61 = vpop.permute.xlu0 %861  ;;  %v179_v41 = vld [vmem:[%s5794_s4 + $0x30] sm:$0xff] }
 0x18e   : > { %8736 = vst [vmem:[#allocation64_spill] sm:$0xff] %v6008_v22 }
 0x18f   : > { %8737 = vst [vmem:[#allocation65_spill] sm:$0xff] %v6010_v61 }
 0x192   : > { %1190 = vperm.xlu2 %5594, %v1185_v42   ;;  %1183 = vperm.xlu1 %5593, %v1178_v29   ;;  %v1220_v29 = vperm.slane %v179_v41, 1 }
 0x193   : > { %1176 = vperm.xlu0 %5592, %v1171_v34   ;;  %v1227_v34 = vperm.slane %v179_v41, 2 }
 0x194   : > { %v6012_v4 = vpop.permute.xlu2 %959  ;;  %v6014_v60 = vpop.permute.xlu1 %889 }
 0x195   : > { %8738 = vst [vmem:[#allocation66_spill] sm:$0xff] %v6012_v4  ;;  %v6016_v8 = vpop.permute.xlu0 %882  ;;  %v1213_v4 = vperm.slane %v179_v41, 0 }
 0x196   : > { %8739 = vst [vmem:[#allocation67_spill] sm:$0xff] %v6014_v60 }
 0x197   : > { %8740 = vst [vmem:[#allocation68_spill] sm:$0xff] %v6016_v8 }
 0x19a   : > { %1211 = vperm.xlu2 %5594, %v1206_v50   ;;  %1204 = vperm.xlu1 %5593, %v1199_v30   ;;  %v1248_v30 = vperm.slane %v179_v41, 5 }
 0x19b   : > { %1197 = vperm.xlu0 %5592, %v1192_v47   ;;  %v1241_v47 = vperm.slane %v179_v41, 4 }
 0x19c   : > { %v6019_v22 = vpop.permute.xlu2 %980  ;;  %v6021_v61 = vpop.permute.xlu1 %910 }
 0x19d   : > { %8741 = vst [vmem:[#allocation69_spill] sm:$0xff] %v6019_v22  ;;  %v6023_v42 = vpop.permute.xlu0 %903  ;;  %v1234_v22 = vperm.slane %v179_v41, 3 }
 0x19e   : > { %8742 = vst [vmem:[#allocation70_spill] sm:$0xff] %v6021_v61  ;;  %v180_v61 = vld [vmem:[%s5794_s4 + $0x38] sm:$0xff] }
 0x19f   : > { %8743 = vst [vmem:[#allocation71_spill] sm:$0xff] %v6023_v42 }
 0x1a2   : > { %1232 = vperm.xlu2 %5594, %v1227_v34   ;;  %1225 = vperm.xlu1 %5593, %v1220_v29   ;;  %v1262_v29 = vperm.slane %v179_v41, 7 }
 0x1a3   : > { %1218 = vperm.xlu0 %5592, %v1213_v4   ;;  %v1269_v4 = vperm.slane %v180_v61, 0 }
 0x1a4   : > { %v6025_v60 = vpop.permute.xlu2 %1001  ;;  %v6027_v49 = vpop.permute.xlu1 %931 }
 0x1a5   : > { %8744 = vst [vmem:[#allocation72_spill] sm:$0xff] %v6025_v60  ;;  %v6029_v50 = vpop.permute.xlu0 %924  ;;  %v1255_v60 = vperm.slane %v179_v41, 6 }
 0x1a6   : > { %8745 = vst [vmem:[#allocation73_spill] sm:$0xff] %v6027_v49 }
 0x1a7   : > { %8746 = vst [vmem:[#allocation74_spill] sm:$0xff] %v6029_v50 }
 0x1aa   : > { %1253 = vperm.xlu2 %5594, %v1248_v30   ;;  %1246 = vperm.xlu1 %5593, %v1241_v47   ;;  %v1283_v47 = vperm.slane %v180_v61, 2 }
 0x1ab   : > { %1239 = vperm.xlu0 %5592, %v1234_v22   ;;  %v1290_v22 = vperm.slane %v180_v61, 3 }
 0x1ac   : > { %v6032_v42 = vpop.permute.xlu2 %1022  ;;  %v6034_v8 = vpop.permute.xlu1 %952 }
 0x1ad   : > { %8747 = vst [vmem:[#allocation75_spill] sm:$0xff] %v6032_v42  ;;  %v6036_v34 = vpop.permute.xlu0 %945  ;;  %v1276_v42 = vperm.slane %v180_v61, 1 }
 0x1ae   : > { %8748 = vst [vmem:[#allocation76_spill] sm:$0xff] %v6034_v8 }
 0x1af   : > { %8749 = vst [vmem:[#allocation77_spill] sm:$0xff] %v6036_v34 }
 0x1b2   : > { %1274 = vperm.xlu2 %5594, %v1269_v4   ;;  %1267 = vperm.xlu1 %5593, %v1262_v29   ;;  %v1304_v4 = vperm.slane %v180_v61, 5  ;;  %v1297_v29 = vperm.slane %v180_v61, 4 }
 0x1b3   : > { %1260 = vperm.xlu0 %5592, %v1255_v60   ;;  %v1311_v60 = vperm.slane %v180_v61, 6 }
 0x1b4   : > { %v6038_v49 = vpop.permute.xlu2 %1043  ;;  %v6040_v50 = vpop.permute.xlu1 %973 }
 0x1b5   : > { %8750 = vst [vmem:[#allocation78_spill] sm:$0xff] %v6038_v49  ;;  %v6042_v30 = vpop.permute.xlu0 %966  ;;  %v185_v49 = vld [vmem:[%s5794_s4 + $0x60] sm:$0xff] }
 0x1b6   : > { %8751 = vst [vmem:[#allocation79_spill] sm:$0xff] %v6040_v50 }
 0x1b7   : > { %8752 = vst [vmem:[#allocation80_spill] sm:$0xff] %v6042_v30 }
 0x1ba   : > { %1295 = vperm.xlu2 %5594, %v1290_v22   ;;  %1288 = vperm.xlu1 %5593, %v1283_v47   ;;  %v1325_v47 = vperm.slane %v185_v49, 0 }
 0x1bb   : > { %1281 = vperm.xlu0 %5592, %v1276_v42   ;;  %v1332_v42 = vperm.slane %v185_v49, 1 }
 0x1bc   : > { %v6044_v8 = vpop.permute.xlu2 %1064  ;;  %v6046_v34 = vpop.permute.xlu1 %994 }
 0x1bd   : > { %8753 = vst [vmem:[#allocation81_spill] sm:$0xff] %v6044_v8  ;;  %v6048_v41 = vpop.permute.xlu0 %987  ;;  %v1318_v8 = vperm.slane %v180_v61, 7  ;;  %v1374_v61 = vperm.slane %v185_v49, 7 }
 0x1be   : > { %8754 = vst [vmem:[#allocation82_spill] sm:$0xff] %v6046_v34 }
 0x1bf   : > { %8755 = vst [vmem:[#allocation83_spill] sm:$0xff] %v6048_v41 }
 0x1c2   : > { %1316 = vperm.xlu2 %5594, %v1311_v60   ;;  %1309 = vperm.xlu1 %5593, %v1304_v4   ;;  %v1353_v60 = vperm.slane %v185_v49, 4  ;;  %v1346_v4 = vperm.slane %v185_v49, 3 }
 0x1c3   : > { %1302 = vperm.xlu0 %5592, %v1297_v29   ;;  %v1339_v29 = vperm.slane %v185_v49, 2 }
 0x1c4   : > { %v6051_v50 = vpop.permute.xlu2 %1085  ;;  %v6053_v30 = vpop.permute.xlu1 %1015 }
 0x1c5   : > { %8756 = vst [vmem:[#allocation84_spill] sm:$0xff] %v6051_v50  ;;  %v6055_v22 = vpop.permute.xlu0 %1008 }
 0x1c6   : > { %8757 = vst [vmem:[#allocation85_spill] sm:$0xff] %v6053_v30 }
 0x1c7   : > { %8758 = vst [vmem:[#allocation86_spill] sm:$0xff] %v6055_v22 }
 0x1ca   : > { %1337 = vperm.xlu2 %5594, %v1332_v42   ;;  %1330 = vperm.xlu1 %5593, %v1325_v47   ;;  %v1367_v42 = vperm.slane %v185_v49, 6  ;;  %v186_v47 = vld [vmem:[%s5794_s4 + $0x68] sm:$0xff] }
 0x1cb   : > { %1323 = vperm.xlu0 %5592, %v1318_v8   ;;  %v1360_v8 = vperm.slane %v185_v49, 5 }
 0x1cc   : > { %v1107_v34 = vpop.permute.xlu2 %1106  ;;  %v6057_v41 = vpop.permute.xlu1 %1036 }
 0x1cd   : > { %8759 = vst [vmem:[#allocation87_spill] sm:$0xff] %v6057_v41  ;;  %v6059_v35 = vpop.permute.xlu0 %1029 }
 0x1ce   : > { %8760 = vst [vmem:[#allocation88_spill] sm:$0xff] %v6059_v35 }
 0x1d2   : > { %1358 = vperm.xlu2 %5594, %v1353_v60   ;;  %1351 = vperm.xlu1 %5593, %v1346_v4   ;;  %v1395_v60 = vperm.slane %v186_v47, 2  ;;  %v1388_v4 = vperm.slane %v186_v47, 1 }
 0x1d3   : > { %1344 = vperm.xlu0 %5592, %v1339_v29   ;;  %v1381_v29 = vperm.slane %v186_v47, 0 }
 0x1d4   : > { %v1128_v50 = vpop.permute.xlu2 %1127  ;;  %v6061_v30 = vpop.permute.xlu1 %1057 }
 0x1d5   : > { %8761 = vst [vmem:[#allocation89_spill] sm:$0xff] %v6061_v30  ;;  %v6063_v22 = vpop.permute.xlu0 %1050 }
 0x1d6   : > { %8762 = vst [vmem:[#allocation90_spill] sm:$0xff] %v6063_v22 }
 0x1da   : > { %1379 = vperm.xlu2 %5594, %v1374_v61   ;;  %1372 = vperm.xlu1 %5593, %v1367_v42   ;;  %v1416_v61 = vperm.slane %v186_v47, 5  ;;  %v1409_v42 = vperm.slane %v186_v47, 4 }
 0x1db   : > { %1365 = vperm.xlu0 %5592, %v1360_v8   ;;  %v1402_v8 = vperm.slane %v186_v47, 3 }
 0x1dc   : > { %v1149_v41 = vpop.permute.xlu2 %1148  ;;  %v6066_v35 = vpop.permute.xlu1 %1078 }
 0x1dd   : > { %8763 = vst [vmem:[#allocation91_spill] sm:$0xff] %v6066_v35  ;;  %v6068_v21 = vpop.permute.xlu0 %1071  ;;  %v5691_v35 = vmov 1983009808  }
 0x1de   : > { %8764 = vst [vmem:[#allocation92_spill] sm:$0xff] %v6068_v21  ;;  %v2132_v10 = vunpack.c.l.s4 %v5691_v35  ;;  %v1998_v21 = vsel %vm1997_vm0, %v5812_v58, %v1107_v34  ;;  %v1430_v34 = vperm.slane %v186_v47, 7 }
 0x1e2   : > { %1400 = vperm.xlu2 %5594, %v1395_v60   ;;  %1393 = vperm.xlu1 %5593, %v1388_v4   ;;  %v6079_v60 = vld [vmem:[%s5794_s4 + $0x70] sm:$0xff]  ;;  %v2001_v4 = vsel %vm1997_vm0, %v5817_v0, %v1128_v50 }
 0x1e3   : > { %1386 = vperm.xlu0 %5592, %v1381_v29   ;;  %v6083_v29 = vunpack.c.0.s8 %v2132_v10  ;;  %v1437_v58 = vperm.slane %v6079_v60, 0 }
 0x1e4   : > { %v6070_v30 = vpop.permute.xlu2 %1169  ;;  %v6072_v22 = vpop.permute.xlu1 %1099 }
 0x1e5   : > { %8765 = vst [vmem:[#allocation93_spill] sm:$0xff] %v6072_v22  ;;  %v6074_v49 = vpop.permute.xlu0 %1092  ;;  %v2129_v22 = vrot.slane %v1998_v21, 4 }
 0x1e6   : > { %8766 = vst [vmem:[#allocation94_spill] sm:$0xff] %v6074_v49 }
 0x1ea   : > { %1421 = vperm.xlu2 %5594, %v1416_v61   ;;  %1414 = vperm.xlu1 %5593, %v1409_v42   ;;  %v2139_v61 = vrot.slane %v2001_v4, 4 }
 0x1eb   : > { %1407 = vperm.xlu0 %5592, %v1402_v8   ;;  %v1423_v8 = vperm.slane %v186_v47, 6  ;;  %v2004_v47 = vsel %vm1997_vm0, %v5825_v7, %v1149_v41 }
 0x1ec   : > { %v1191_v49 = vpop.permute.xlu2 %1190  ;;  %v1121_v9 = vpop.permute.xlu1 %1120 }
 0x1ed   : > { %v2000_v35 = vsel %vm1997_vm0, %v5810_v57, %v1121_v9  ;;  %v1114_v23 = vpop.permute.xlu0 %1113 }
 0x1ee   : > { %v2126_v42 = vrot.slane %v2000_v35, 4  ;;  %v2130_v11 = vsel %vm2127_vm1, %v2000_v35, %v2129_v22  ;;  %v1999_v0 = vsel %vm1997_vm0, %v5819_v1, %v1114_v23  ;;  %v1458_v35 = vperm.slane %v6079_v60, 3 }
 0x1ef   : > { %v2138_v10 = vperm.slane %v2130_v11, %v6083_v29  ;;  %v2141_v50 = vrot.slane %v1999_v0, 4  ;;  %v2140_v51 = vsel %vm2127_vm1, %v2139_v61, %v1999_v0  ;;  %v1444_v61 = vperm.slane %v6079_v60, 1 }
 0x1f0   : > { %v2128_v17 = vsel %vm2127_vm1, %v2126_v42, %v1998_v21  ;;  %v6101_v11 = vperm.slane %v2140_v51, %v6083_v29  ;;  %v2151_v42 = vrot.slane %v2004_v47, 4 }
 0x1f1   : > { %v6095_v57 = vperm.slane %v2128_v17, %v6083_v29  ;;  %v2189_v9 = vrot.slane %v2138_v10, 4  ;;  %v2142_v62 = vsel %vm2127_vm1, %v2001_v4, %v2141_v50 }
 0x1f2   : > { %v2150_v36 = vperm.slane %v2142_v62, %v6083_v29  ;;  %1442 = vperm.xlu2 %5594, %v1437_v58   ;;  %1435 = vperm.xlu1 %5593, %v1430_v34   ;;  %v1451_v58 = vperm.slane %v6079_v60, 2 }
 0x1f3   : > { %v2177_v1 = vrot.slane %v6095_v57, 4  ;;  %1428 = vperm.xlu0 %5592, %v1423_v8  }
 0x1f4   : > { %v2187_v23 = vrot.slane %v2150_v36, 4  ;;  %v6103_v21 = vpop.permute.xlu2 %1211  ;;  %v1142_v22 = vpop.permute.xlu1 %1141  ;;  %v6106_v17 = vsel %vm2127_vm1, %v2150_v36, %v2189_v9 }
 0x1f5   : > { %v1135_v4 = vpop.permute.xlu0 %1134  ;;  %v6112_v62 = vsel %vm2127_vm1, %v6101_v11, %v2177_v1  ;;  %v2003_v41 = vsel %vm1997_vm0, %v5804_v48, %v1142_v22  ;;  %v2007_v48 = vsel %vm1997_vm0, %v5832_v14, %v6070_v30  ;;  %v6145_v14 = vld [vmem:[%s5794_s4 + $0x78] sm:$0xff] }
 0x1f6   : > { %v2002_v51 = vsel %vm1997_vm0, %v5801_v43, %v1135_v4  ;;  %v6120_v36 = vsel %vm2127_vm1, %v2187_v23, %v2138_v10  ;;  %v2165_v9 = vrot.slane %v2003_v41, 4  ;;  %v5692_v23 = vmov 1934713408  }
 0x1f7   : > { %v2153_v34 = vrot.slane %v2002_v51, 4  ;;  %v2152_v0 = vsel %vm2127_vm1, %v2151_v42, %v2002_v51  ;;  %v1479_v4 = vperm.slane %v6079_v60, 6  ;;  %v1472_v51 = vperm.slane %v6079_v60, 5 }
 0x1f8   : > { %v2158_v10 = vperm.slane %v2152_v0, %v6083_v29  ;;  %v2253_v30 = vrot.slane %v2007_v48, 4  ;;  %v1521_v59 = vperm.slane %v6145_v14, 4 }
 0x1f9   : > { %v2154_v7 = vsel %vm2127_vm1, %v2004_v47, %v2153_v34  ;;  %v2180_v47 = vunpack.c.l.s4 %v5692_v23  ;;  %v1465_v34 = vperm.slane %v6079_v60, 4 }
 0x1fa   : > { %1463 = vperm.xlu2 %5594, %v1458_v35   ;;  %1456 = vperm.xlu1 %5593, %v1451_v58   ;;  %v2162_v43 = vperm.slane %v2154_v7, %v6083_v29 }
 0x1fb   : > { %1449 = vperm.xlu0 %5592, %v1444_v61   ;;  %v6141_v61 = vsel %vm1997_vm0, %v5838_v20, %v1191_v49 }
 0x1fc   : > { %v6127_v50 = vpop.permute.xlu2 %1232  ;;  %v1163_v8 = vpop.permute.xlu1 %1162  ;;  %v2213_v42 = vrot.slane %v2162_v43, 4  ;;  %v2265_v49 = vrot.slane %v6141_v61, 4 }
 0x1fd   : > { %v1156_v1 = vpop.permute.xlu0 %1155 }
 0x1fe   : > { %v2005_v22 = vsel %vm1997_vm0, %v5823_v6, %v1156_v1  ;;  %v2201_v6 = vrot.slane %v2158_v10, 4  ;;  %v6148_v1 = vunpack.c.0.s8 %v2180_v47  ;;  %v1486_v47 = vperm.slane %v6079_v60, 7 }
 0x1ff   : > { %v2163_v35 = vrot.slane %v2005_v22, 4  ;;  %v2166_v58 = vsel %vm2127_vm1, %v2005_v22, %v2165_v9  ;;  %v2006_v9 = vsel %vm1997_vm0, %v5806_v52, %v1163_v8 }
 0x200   : > { %v2174_v7 = vperm.slane %v2166_v58, %v6083_v29  ;;  %v1500_v58 = vperm.slane %v6145_v14, 1 }
 0x201   : > { %v2164_v0 = vsel %vm2127_vm1, %v2163_v35, %v2003_v41  ;;  %v1493_v41 = vperm.slane %v6145_v14, 0  ;;  %v2175_v35 = vrot.slane %v6101_v11, 4 }
 0x202   : > { %v2170_v23 = vperm.slane %v2164_v0, %v6083_v29  ;;  %v2211_v22 = vrot.slane %v2174_v7, 4  ;;  %v6154_v20 = vsel %vm2127_vm1, %v2174_v7, %v2213_v42  ;;  %1484 = vperm.xlu2 %5594, %v1479_v4   ;;  %1477 = vperm.xlu1 %5593, %v1472_v51   ;;  %v2241_v51 = vrot.slane %v2006_v9, 4 }
 0x203   : > { %1470 = vperm.xlu0 %5592, %v1465_v34  }
 0x204   : > { %v2199_v52 = vrot.slane %v2170_v23, 4  ;;  %v6161_v8 = vpop.permute.xlu2 %1253  ;;  %v1184_v0 = vpop.permute.xlu1 %1183  ;;  %v2202_v42 = vsel %vm2127_vm1, %v2170_v23, %v2201_v6  ;;  %v2212_v4 = vsel %vm2127_vm1, %v2211_v22, %v2162_v43  ;;  %v2186_v6 = vperm.slane %v6112_v62, %v6148_v1 }
 0x205   : > { %v2009_v34 = vsel %vm1997_vm0, %v5808_v56, %v1184_v0  ;;  %v1177_v7 = vpop.permute.xlu0 %1176  ;;  %v2210_v27 = vperm.slane %v2202_v42, %v6148_v1  ;;  %v1514_v0 = vperm.slane %v6145_v14, 3  ;;  %v2176_v42 = vsel %vm2127_vm1, %v2175_v35, %v6095_v57 }
 0x206   : > { %v2251_v60 = vrot.slane %v2009_v34, 4  ;;  %v2254_v11 = vsel %vm2127_vm1, %v2009_v34, %v2253_v30  ;;  %v2008_v53 = vsel %vm1997_vm0, %v5830_v13, %v1177_v7  ;;  %v2200_v22 = vsel %vm2127_vm1, %v2199_v52, %v2158_v10 }
 0x207   : > { %v6175_v43 = vperm.slane %v2254_v11, %v6083_v29  ;;  %v2239_v23 = vrot.slane %v2008_v53, 4  ;;  %v2242_v56 = vsel %vm2127_vm1, %v2008_v53, %v2241_v51  ;;  %v6183_v30 = vperm.slane %v2200_v22, %v6148_v1 }
 0x208   : > { %v2227_v13 = vrot.slane %v2210_v27, 4  ;;  %v2013_v62 = vsel %vm1997_vm0, %v5844_v26, %v6103_v21  ;;  %v1507_v53 = vperm.slane %v6145_v14, 2  ;;  %v2252_v10 = vsel %vm2127_vm1, %v2251_v60, %v2007_v48 }
 0x209   : > { %v2299_v34 = vrot.slane %v6175_v43, 4  ;;  %v2240_v7 = vsel %vm2127_vm1, %v2239_v23, %v2006_v9  ;;  %v2250_v57 = vperm.slane %v2242_v56, %v6083_v29  ;;  %v2229_v35 = vrot.slane %v2186_v6, 4 }
 0x20a   : > { %v2246_v52 = vperm.slane %v2240_v7, %v6083_v29  ;;  %1505 = vperm.xlu2 %5594, %v1500_v58   ;;  %1498 = vperm.xlu1 %5593, %v1493_v41   ;;  %v6195_v51 = vperm.slane %v2176_v42, %v6148_v1  ;;  %v6198_v26 = vsel %vm2127_vm1, %v2227_v13, %v2186_v6  ;;  %v2223_v21 = vrot.slane %v6183_v30, 4 }
 0x20b   : > { %1491 = vperm.xlu0 %5592, %v1486_v47   ;;  %v2218_v9 = vperm.slane %v2212_v4, %v6148_v1  ;;  %v2275_v11 = vrot.slane %v2013_v62, 4  ;;  %v6205_v58 = vsel %vm2127_vm1, %v2210_v27, %v2229_v35  ;;  %v2300_v41 = vsel %vm2127_vm1, %v2299_v34, %v2250_v57 }
 0x20c   : > { %v2289_v48 = vrot.slane %v2246_v52, 4  ;;  %v6202_v60 = vpop.permute.xlu2 %1274  ;;  %v1205_v23 = vpop.permute.xlu1 %1204  ;;  %8767 = vst [vmem:[#allocation95_spill] sm:$0xff] %v6205_v58  ;;  %v2258_v47 = vperm.slane %v2252_v10, %v6083_v29  ;;  %v6213_v22 = vsel %vm2127_vm1, %v2223_v21, %v6195_v51  ;;  %v2194_v4 = vperm.slane %v6120_v36, %v6148_v1 }
 0x20d   : > { %v2012_v6 = vsel %vm1997_vm0, %v5815_v63, %v1205_v23  ;;  %v1198_v56 = vpop.permute.xlu0 %1197  ;;  %v6222_v34 = vperm.slane %v6106_v17, %v6148_v1  ;;  %v1542_v10 = vperm.slane %v6145_v14, 7  ;;  %v2231_v35 = vrot.slane %v2218_v9, 4 }
 0x20e   : > { %v2263_v42 = vrot.slane %v2012_v6, 4  ;;  %v2266_v13 = vsel %vm2127_vm1, %v2012_v6, %v2265_v49  ;;  %v2011_v27 = vsel %vm1997_vm0, %v5836_v19, %v1198_v56  ;;  %v2301_v21 = vrot.slane %v2250_v57, 4 }
 0x20f   : > { %v2276_v63 = vsel %vm2127_vm1, %v2275_v11, %v2011_v27  ;;  %v2277_v7 = vrot.slane %v2011_v27, 4  ;;  %v2290_v49 = vsel %vm2127_vm1, %v2258_v47, %v2289_v48  ;;  %v2287_v6 = vrot.slane %v2258_v47, 4 }
 0x210   : > { %v2264_v36 = vsel %vm2127_vm1, %v2263_v42, %v6141_v61  ;;  %v2282_v23 = vperm.slane %v2276_v63, %v6083_v29  ;;  %v1535_v56 = vperm.slane %v6145_v14, 6  ;;  %v1528_v57 = vperm.slane %v6145_v14, 5 }
 0x211   : > { %v2270_v19 = vperm.slane %v2264_v36, %v6083_v29  ;;  %v2278_v17 = vsel %vm2127_vm1, %v2013_v62, %v2277_v7  ;;  %v2233_v58 = vrot.slane %v2194_v4, 4  ;;  %v2016_v61 = vsel %vm1997_vm0, %v5851_v33, %v6127_v50 }
 0x212   : > { %v2286_v11 = vperm.slane %v2278_v17, %v6083_v29  ;;  %v2311_v27 = vrot.slane %v2282_v23, 4  ;;  %1526 = vperm.xlu2 %5594, %v1521_v59   ;;  %1519 = vperm.xlu1 %5593, %v1514_v0   ;;  %v2274_v48 = vperm.slane %v2266_v13, %v6083_v29  ;;  %v6240_v62 = vsel %vm2127_vm1, %v2231_v35, %v2194_v4 }
 0x213   : > { %v2313_v47 = vrot.slane %v2270_v19, 4  ;;  %1512 = vperm.xlu0 %5592, %v1507_v53   ;;  %8768 = vst [vmem:[#allocation96_spill] sm:$0xff] %v6240_v62  ;;  %v6246_v14 = vsel %vm2127_vm1, %v2218_v9, %v2233_v58  ;;  %v2302_v33 = vsel %vm2127_vm1, %v6175_v43, %v2301_v21  ;;  %v2288_v53 = vsel %vm2127_vm1, %v2287_v6, %v2246_v52  ;;  %v6261_v21 = vld [vmem:[%s5794_s4 + $0xa0] sm:$0xff] }
 0x214   : > { %v2323_v42 = vrot.slane %v2286_v11, 4  ;;  %v6242_v63 = vpop.permute.xlu2 %1295  ;;  %v1226_v59 = vpop.permute.xlu1 %1225  ;;  %v2312_v0 = vsel %vm2127_vm1, %v2311_v27, %v2270_v19  ;;  %8769 = vst [vmem:[#allocation97_spill] sm:$0xff] %v6246_v14  ;;  %v2298_v7 = vperm.slane %v2290_v49, %v6148_v1  ;;  %v2351_v35 = vrot.slane %v2016_v61, 4 }
 0x215   : > { %v2314_v50 = vsel %vm2127_vm1, %v2282_v23, %v2313_v47  ;;  %v1219_v13 = vpop.permute.xlu0 %1218  ;;  %v6253_v4 = vperm.slane %v2312_v0, %v6148_v1  ;;  %v2237_v58 = vrot.slane %v6222_v34, 4  ;;  %v2325_v19 = vrot.slane %v2274_v48, 4 }
 0x216   : > { %v2014_v36 = vsel %vm1997_vm0, %v5842_v25, %v1219_v13  ;;  %v2322_v9 = vperm.slane %v2314_v50, %v6148_v1  ;;  %v2222_v52 = vperm.slane %v6154_v20, %v6148_v1  ;;  %v6267_v6 = vperm.slane %v2288_v53, %v6148_v1 }
 0x217   : > { %v2353_v43 = vrot.slane %v2014_v36, 4  ;;  %v2335_v23 = vrot.slane %v6253_v4, 4  ;;  %v2306_v17 = vperm.slane %v2300_v41, %v6148_v1  ;;  %v2324_v25 = vsel %vm2127_vm1, %v2323_v42, %v2274_v48 }
 0x218   : > { %v2339_v49 = vrot.slane %v2322_v9, 4  ;;  %v2015_v27 = vsel %vm1997_vm0, %v5821_v5, %v1226_v59  ;;  %v2352_v47 = vsel %vm2127_vm1, %v2351_v35, %v2014_v36  ;;  %v2341_v50 = vrot.slane %v2298_v7, 4 }
 0x219   : > { %v2354_v0 = vsel %vm2127_vm1, %v2016_v61, %v2353_v43  ;;  %v1563_v20 = vperm.slane %v6261_v21, 2  ;;  %v6279_v53 = vsel %vm2127_vm1, %v2335_v23, %v6267_v6  ;;  %v2330_v5 = vperm.slane %v2324_v25, %v6148_v1 }
 0x21a   : > { %v2362_v13 = vperm.slane %v2354_v0, %v6083_v29  ;;  %1547 = vperm.xlu2 %5594, %v1542_v10   ;;  %1540 = vperm.xlu1 %5593, %v1535_v56   ;;  %v6282_v41 = vsel %vm2127_vm1, %v2339_v49, %v2298_v7  ;;  %v6286_v48 = vsel %vm2127_vm1, %v2322_v9, %v2341_v50  ;;  %v1556_v59 = vperm.slane %v6261_v21, 1 }
 0x21b   : > { %1533 = vperm.xlu0 %5592, %v1528_v57   ;;  %8770 = vst [vmem:[#allocation98_spill] sm:$0xff] %v6286_v48  ;;  %v2310_v61 = vperm.slane %v2302_v33, %v6148_v1  ;;  %v2326_v10 = vsel %vm2127_vm1, %v2286_v11, %v2325_v19  ;;  %v2345_v36 = vrot.slane %v2306_v17, 4  ;;  %v2235_v7 = vrot.slane %v2222_v52, 4 }
 0x21c   : > { %v6290_v56 = vpop.permute.xlu2 %1316  ;;  %v1247_v42 = vpop.permute.xlu1 %1246  ;;  %v2334_v35 = vperm.slane %v2326_v10, %v6148_v1  ;;  %v2365_v43 = vrot.slane %v2015_v27, 4  ;;  %v6295_v57 = vperm.slane %v2352_v47, %v6083_v29  ;;  %v2343_v9 = vrot.slane %v2330_v5, 4 }
 0x21d   : > { %v1240_v23 = vpop.permute.xlu0 %1239  ;;  %v2349_v49 = vrot.slane %v2310_v61, 4  ;;  %v2413_v25 = vrot.slane %v2362_v13, 4  ;;  %v1549_v33 = vperm.slane %v6261_v21, 0  ;;  %v6301_v19 = vsel %vm2127_vm1, %v2330_v5, %v2345_v36 }
 0x21e   : > { %v2017_v11 = vsel %vm1997_vm0, %v5849_v32, %v1240_v23  ;;  %8771 = vst [vmem:[#allocation99_spill] sm:$0xff] %v6301_v19  ;;  %v6305_v10 = vsel %vm2127_vm1, %v2343_v9, %v2306_v17  ;;  %v6313_v62 = vsel %vm2127_vm1, %v2235_v7, %v6222_v34  ;;  %v2347_v32 = vrot.slane %v2334_v35, 4 }
 0x21f   : > { %v2363_v0 = vrot.slane %v2017_v11, 4  ;;  %v2366_v50 = vsel %vm2127_vm1, %v2017_v11, %v2365_v43  ;;  %8772 = vst [vmem:[#allocation100_spill] sm:$0xff] %v6305_v10  ;;  %v6308_v47 = vsel %vm2127_vm1, %v2334_v35, %v2349_v49  ;;  %v6316_v23 = vsel %vm2127_vm1, %v2222_v52, %v2237_v58  ;;  %v8823_v10 = vld [vmem:[#allocation28_spill] sm:$0xff] }
 0x220   : > { %8773 = vst [vmem:[#allocation101_spill] sm:$0xff] %v6308_v47  ;;  %v2374_v14 = vperm.slane %v2366_v50, %v6083_v29  ;;  %v2019_v5 = vsel %vm1997_vm0, %v5857_v39, %v6161_v8  ;;  %v2401_v17 = vrot.slane %v6295_v57, 4  ;;  %v2018_v36 = vsel %vm1997_vm0, %v5828_v12, %v1247_v42 }
 0x221   : > { %8774 = vst [vmem:[#allocation102_spill] sm:$0xff] %v6313_v62  ;;  %v2364_v43 = vsel %vm2127_vm1, %v2363_v0, %v2015_v27  ;;  %v6332_v52 = vsel %vm2127_vm1, %v2347_v32, %v2310_v61  ;;  %v2389_v39 = vrot.slane %v2019_v5, 4  ;;  %v2377_v42 = vrot.slane %v2018_v36, 4 }
 0x222   : > { %8775 = vst [vmem:[#allocation103_spill] sm:$0xff] %v6316_v23  ;;  %v6326_v9 = vperm.slane %v2364_v43, %v6083_v29  ;;  %v2411_v34 = vrot.slane %v2374_v14, 4  ;;  %1568 = vperm.xlu2 %5594, %v1563_v20   ;;  %1561 = vperm.xlu1 %5593, %v1556_v59   ;;  %v6329_v58 = vsel %vm2127_vm1, %v2374_v14, %v2413_v25  ;;  %v1584_v59 = vperm.slane %v6261_v21, 5  ;;  %v8786_v23 = vld [vmem:[#allocation9_spill] sm:$0xff] }
 0x223   : > { %8776 = vst [vmem:[#allocation104_spill] sm:$0xff] %v6332_v52  ;;  %1554 = vperm.xlu0 %5592, %v1549_v33   ;;  %v1577_v25 = vperm.slane %v6261_v21, 4  ;;  %v1570_v0 = vperm.slane %v6261_v21, 3 }
 0x224   : > { %v6334_v8 = vpop.permute.xlu2 %1337  ;;  %v1268_v35 = vpop.permute.xlu1 %1267  ;;  %v2402_v12 = vsel %vm2127_vm1, %v6326_v9, %v2401_v17  ;;  %v2412_v27 = vsel %vm2127_vm1, %v2411_v34, %v2362_v13  ;;  %v6355_v17 = vld [vmem:[%s5794_s4 + $0xa8] sm:$0xff] }
 0x225   : > { %v2021_v20 = vsel %vm1997_vm0, %v5834_v18, %v1268_v35  ;;  %v1261_v14 = vpop.permute.xlu0 %1260  ;;  %v2022_v18 = vsel %vm1997_vm0, %v5863_v46, %v6202_v60 }
 0x226   : > { %v2387_v61 = vrot.slane %v2021_v20, 4  ;;  %v2390_v7 = vsel %vm2127_vm1, %v2021_v20, %v2389_v39  ;;  %v2020_v49 = vsel %vm1997_vm0, %v5855_v38, %v1261_v14  ;;  %v2025_v39 = vsel %vm1997_vm0, %v5870_v55, %v6242_v63 }
 0x227   : > { %v2398_v11 = vperm.slane %v2390_v7, %v6083_v29  ;;  %v2375_v33 = vrot.slane %v2020_v49, 4  ;;  %v2378_v13 = vsel %vm2127_vm1, %v2020_v49, %v2377_v42  ;;  %v2465_v46 = vrot.slane %v2022_v18, 4 }
 0x228   : > { %v2388_v50 = vsel %vm2127_vm1, %v2387_v61, %v2019_v5  ;;  %v2386_v32 = vperm.slane %v2378_v13, %v6083_v29  ;;  %v1605_v20 = vperm.slane %v6355_v17, 0  ;;  %v1598_v7 = vperm.slane %v6261_v21, 7 }
 0x229   : > { %v2394_v38 = vperm.slane %v2388_v50, %v6083_v29  ;;  %v2435_v43 = vrot.slane %v2398_v11, 4  ;;  %v2376_v34 = vsel %vm2127_vm1, %v2375_v33, %v2018_v36  ;;  %v2475_v49 = vrot.slane %v2025_v39, 4 }
 0x22a   : > { %v2382_v35 = vperm.slane %v2376_v34, %v6083_v29  ;;  %v2437_v42 = vrot.slane %v2386_v32, 4  ;;  %1589 = vperm.xlu2 %5594, %v1584_v59   ;;  %1582 = vperm.xlu1 %5593, %v1577_v25   ;;  %v2399_v59 = vrot.slane %v6326_v9, 4 }
 0x22b   : > { %v2423_v60 = vrot.slane %v2394_v38, 4  ;;  %v2436_v5 = vsel %vm2127_vm1, %v2435_v43, %v2386_v32  ;;  %1575 = vperm.xlu0 %5592, %v1570_v0   ;;  %v2418_v43 = vperm.slane %v2412_v27, %v6148_v1  ;;  %v1626_v27 = vperm.slane %v6355_v17, 3 }
 0x22c   : > { %v2425_v14 = vrot.slane %v2382_v35, 4  ;;  %v6365_v61 = vpop.permute.xlu2 %1358  ;;  %v1289_v36 = vpop.permute.xlu1 %1288  ;;  %v2442_v55 = vperm.slane %v2436_v5, %v6148_v1  ;;  %v2438_v63 = vsel %vm2127_vm1, %v2398_v11, %v2437_v42  ;;  %v1591_v11 = vperm.slane %v6261_v21, 6 }
 0x22d   : > { %v2024_v25 = vsel %vm1997_vm0, %v5840_v24, %v1289_v36  ;;  %v1282_v33 = vpop.permute.xlu0 %1281  ;;  %v2424_v13 = vsel %vm2127_vm1, %v2423_v60, %v2382_v35  ;;  %v2400_v21 = vsel %vm2127_vm1, %v2399_v59, %v6295_v57  ;;  %v2457_v36 = vrot.slane %v2418_v43, 4 }
 0x22e   : > { %v2463_v0 = vrot.slane %v2024_v25, 4  ;;  %v2466_v50 = vsel %vm2127_vm1, %v2024_v25, %v2465_v46  ;;  %v2023_v32 = vsel %vm1997_vm0, %v5861_v45, %v1282_v33  ;;  %v6380_v42 = vperm.slane %v2424_v13, %v6148_v1 }
 0x22f   : > { %v2477_v34 = vrot.slane %v2023_v32, 4  ;;  %v2476_v24 = vsel %vm2127_vm1, %v2475_v49, %v2023_v32  ;;  %v2426_v35 = vsel %vm2127_vm1, %v2394_v38, %v2425_v14  ;;  %v2455_v60 = vrot.slane %v2442_v55, 4 }
 0x230   : > { %v2464_v9 = vsel %vm2127_vm1, %v2463_v0, %v2022_v18  ;;  %v2410_v18 = vperm.slane %v2402_v12, %v6148_v1  ;;  %v2474_v38 = vperm.slane %v2466_v50, %v6083_v29  ;;  %v6397_v49 = vperm.slane %v2476_v24, %v6083_v29 }
 0x231   : > { %v6386_v46 = vperm.slane %v2464_v9, %v6083_v29  ;;  %v2478_v45 = vsel %vm2127_vm1, %v2025_v39, %v2477_v34  ;;  %v2447_v39 = vrot.slane %v6380_v42, 4  ;;  %v2434_v57 = vperm.slane %v2426_v35, %v6148_v1 }
 0x232   : > { %v2486_v5 = vperm.slane %v2478_v45, %v6083_v29  ;;  %1610 = vperm.xlu2 %5594, %v1605_v20   ;;  %1603 = vperm.xlu1 %5593, %v1598_v7   ;;  %v1619_v7 = vperm.slane %v6355_v17, 2  ;;  %v6405_v12 = vsel %vm2127_vm1, %v2455_v60, %v2418_v43  ;;  %v6408_v59 = vsel %vm2127_vm1, %v2442_v55, %v2457_v36 }
 0x233   : > { %v2513_v14 = vrot.slane %v6386_v46, 4  ;;  %1596 = vperm.xlu0 %5592, %v1591_v11   ;;  %8777 = vst [vmem:[#allocation105_spill] sm:$0xff] %v6405_v12  ;;  %v2028_v33 = vsel %vm1997_vm0, %v5876_v3, %v6290_v56  ;;  %v6414_v0 = vperm.slane %v2400_v21, %v6148_v1  ;;  %v2422_v32 = vperm.slane %v6329_v58, %v6148_v1 }
 0x234   : > { %v6400_v25 = vpop.permute.xlu2 %1379  ;;  %v1310_v20 = vpop.permute.xlu1 %1309  ;;  %8778 = vst [vmem:[#allocation106_spill] sm:$0xff] %v6408_v59  ;;  %v2523_v43 = vrot.slane %v2486_v5, 4  ;;  %v1612_v34 = vperm.slane %v6355_v17, 1  ;;  %v2453_v11 = vrot.slane %v2410_v18, 4  ;;  %v2525_v9 = vrot.slane %v2474_v38, 4 }
 0x235   : > { %v1303_v13 = vpop.permute.xlu0 %1302  ;;  %v6418_v50 = vsel %vm2127_vm1, %v6397_v49, %v2513_v14  ;;  %v6427_v56 = vsel %vm2127_vm1, %v2447_v39, %v6414_v0  ;;  %v2446_v24 = vperm.slane %v2438_v63, %v6148_v1  ;;  %v2487_v35 = vrot.slane %v2028_v33, 4 }
 0x236   : > { %v2026_v55 = vsel %vm1997_vm0, %v5868_v54, %v1303_v13  ;;  %8779 = vst [vmem:[#allocation107_spill] sm:$0xff] %v6427_v56  ;;  %v6431_v60 = vsel %vm2127_vm1, %v2434_v57, %v2453_v11  ;;  %v2451_v58 = vrot.slane %v2434_v57, 4  ;;  %v2027_v45 = vsel %vm1997_vm0, %v5847_v31, %v1310_v20  ;;  %v8850_v56 = vld [vmem:[#allocation43_spill] sm:$0xff] }
 0x237   : > { %v2489_v3 = vrot.slane %v2026_v55, 4  ;;  %8780 = vst [vmem:[#allocation108_spill] sm:$0xff] %v6431_v60  ;;  %v2461_v21 = vrot.slane %v2422_v32, 4  ;;  %v2488_v36 = vsel %vm2127_vm1, %v2487_v35, %v2026_v55  ;;  %v6441_v63 = vsel %vm2127_vm1, %v2523_v43, %v2474_v38 }
 0x238   : > { %v6438_v14 = vsel %vm2127_vm1, %v2451_v58, %v2410_v18  ;;  %v2459_v39 = vrot.slane %v2446_v24, 4  ;;  %v6444_v57 = vsel %vm2127_vm1, %v2486_v5, %v2525_v9  ;;  %v2494_v18 = vperm.slane %v2488_v36, %v6083_v29 }
 0x239   : > { %v2490_v54 = vsel %vm2127_vm1, %v2028_v33, %v2489_v3  ;;  %8781 = vst [vmem:[#allocation109_spill] sm:$0xff] %v6438_v14  ;;  %v6447_v31 = vsel %vm2127_vm1, %v2446_v24, %v2461_v21  ;;  %v2031_v5 = vsel %vm1997_vm0, %v5883_v16, %v6334_v8  ;;  %v1647_v55 = vperm.slane %v6355_v17, 6  ;;  %v6472_v8 = vld [vmem:[%s5794_s4 + $0xb0] sm:$0xff] }
 0x23a   : > { %1631 = vperm.xlu2 %5594, %v1626_v27   ;;  %1624 = vperm.xlu1 %5593, %v1619_v7   ;;  %8782 = vst [vmem:[#allocation110_spill] sm:$0xff] %v6447_v31  ;;  %v2498_v20 = vperm.slane %v2490_v54, %v6083_v29  ;;  %v2501_v7 = vrot.slane %v2027_v45, 4  ;;  %v6454_v38 = vsel %vm2127_vm1, %v2459_v39, %v2422_v32  ;;  %v1633_v3 = vperm.slane %v6355_v17, 4 }
 0x23b   : > { %1617 = vperm.xlu0 %5592, %v1612_v34   ;;  %8783 = vst [vmem:[#allocation111_spill] sm:$0xff] %v6454_v38  ;;  %v1640_v34 = vperm.slane %v6355_v17, 5  ;;  %v6468_v32 = vsel %vm1997_vm0, %v5889_v28, %v6365_v61  ;;  %v2537_v35 = vrot.slane %v2494_v18, 4  ;;  %v1668_v61 = vperm.slane %v6472_v8, 1 }
 0x23c   : > { %v6450_v33 = vpop.permute.xlu2 %1400  ;;  %v1331_v27 = vpop.permute.xlu1 %1330  ;;  %v2549_v24 = vrot.slane %v2498_v20, 4  ;;  %v2601_v28 = vrot.slane %v6468_v32, 4 }
 0x23d   : > { %v1324_v13 = vpop.permute.xlu0 %1323  ;;  %v2030_v54 = vsel %vm1997_vm0, %v5853_v37, %v1331_v27 }
 0x23e   : > { %v2029_v43 = vsel %vm1997_vm0, %v5874_v2, %v1324_v13  ;;  %v2589_v2 = vrot.slane %v2031_v5, 4  ;;  %v2511_v13 = vrot.slane %v6397_v49, 4 }
 0x23f   : > { %v2499_v11 = vrot.slane %v2029_v43, 4  ;;  %v2502_v9 = vsel %vm2127_vm1, %v2029_v43, %v2501_v7  ;;  %v1661_v7 = vperm.slane %v6472_v8, 0 }
 0x240   : > { %v2510_v16 = vperm.slane %v2502_v9, %v6083_v29 }
 0x241   : > { %v2500_v58 = vsel %vm2127_vm1, %v2499_v11, %v2027_v45  ;;  %v1654_v45 = vperm.slane %v6355_v17, 7 }
 0x242   : > { %v2506_v21 = vperm.slane %v2500_v58, %v6083_v29  ;;  %v2547_v36 = vrot.slane %v2510_v16, 4  ;;  %v6479_v39 = vsel %vm2127_vm1, %v2510_v16, %v2549_v24  ;;  %1652 = vperm.xlu2 %5594, %v1647_v55   ;;  %1645 = vperm.xlu1 %5593, %v1640_v34   ;;  %v2577_v34 = vrot.slane %v2030_v54, 4 }
 0x243   : > { %1638 = vperm.xlu0 %5592, %v1633_v3   ;;  %v1689_v24 = vperm.slane %v6472_v8, 4 }
 0x244   : > { %v2535_v37 = vrot.slane %v2506_v21, 4  ;;  %v6486_v27 = vpop.permute.xlu2 %1421  ;;  %v1352_v43 = vpop.permute.xlu1 %1351  ;;  %v2538_v11 = vsel %vm2127_vm1, %v2506_v21, %v2537_v35  ;;  %v2548_v55 = vsel %vm2127_vm1, %v2547_v36, %v2498_v20  ;;  %v2522_v35 = vperm.slane %v6418_v50, %v6148_v1 }
 0x245   : > { %v2033_v9 = vsel %vm1997_vm0, %v5859_v44, %v1352_v43  ;;  %v1345_v3 = vpop.permute.xlu0 %1344  ;;  %v2546_v16 = vperm.slane %v2538_v11, %v6148_v1  ;;  %v1682_v43 = vperm.slane %v6472_v8, 3  ;;  %v2512_v11 = vsel %vm2127_vm1, %v2511_v13, %v6386_v46 }
 0x246   : > { %v2587_v17 = vrot.slane %v2033_v9, 4  ;;  %v2590_v49 = vsel %vm2127_vm1, %v2033_v9, %v2589_v2  ;;  %v2032_v58 = vsel %vm1997_vm0, %v5881_v15, %v1345_v3  ;;  %v2536_v36 = vsel %vm2127_vm1, %v2535_v37, %v2494_v18 }
 0x247   : > { %v6500_v20 = vperm.slane %v2590_v49, %v6083_v29  ;;  %v2575_v21 = vrot.slane %v2032_v58, 4  ;;  %v2578_v44 = vsel %vm2127_vm1, %v2032_v58, %v2577_v34  ;;  %v6508_v2 = vperm.slane %v2536_v36, %v6148_v1 }
 0x248   : > { %v2563_v15 = vrot.slane %v2546_v16, 4  ;;  %v2037_v50 = vsel %vm1997_vm0, %v5895_v40, %v6400_v25  ;;  %v1675_v34 = vperm.slane %v6472_v8, 2  ;;  %v2588_v18 = vsel %vm2127_vm1, %v2587_v17, %v2031_v5 }
 0x249   : > { %v2635_v9 = vrot.slane %v6500_v20, 4  ;;  %v2576_v3 = vsel %vm2127_vm1, %v2575_v21, %v2030_v54  ;;  %v2586_v46 = vperm.slane %v2578_v44, %v6083_v29  ;;  %v2565_v13 = vrot.slane %v2522_v35, 4  ;;  %v8785_v44 = vld [vmem:[#allocation5_spill] sm:$0xff] }
 0x24a   : > { %v2582_v37 = vperm.slane %v2576_v3, %v6083_v29  ;;  %1673 = vperm.xlu2 %5594, %v1668_v61   ;;  %1666 = vperm.xlu1 %5593, %v1661_v7   ;;  %v6520_v49 = vperm.slane %v2512_v11, %v6148_v1  ;;  %v6523_v40 = vsel %vm2127_vm1, %v2563_v15, %v2522_v35  ;;  %v2559_v25 = vrot.slane %v6508_v2, 4 }
 0x24b   : > { %1659 = vperm.xlu0 %5592, %v1654_v45   ;;  %v6527_v54 = vperm.slane %v2548_v55, %v6148_v1  ;;  %v2611_v5 = vrot.slane %v2037_v50, 4  ;;  %v6532_v61 = vsel %vm2127_vm1, %v2546_v16, %v2565_v13  ;;  %v2636_v7 = vsel %vm2127_vm1, %v2635_v9, %v2586_v46 }
 0x24c   : > { %v2625_v17 = vrot.slane %v2582_v37, 4  ;;  %v6529_v58 = vpop.permute.xlu2 %1442  ;;  %v1373_v21 = vpop.permute.xlu1 %1372  ;;  %8784 = vst [vmem:[#allocation112_spill] sm:$0xff] %v6532_v61  ;;  %v2594_v45 = vperm.slane %v2588_v18, %v6083_v29  ;;  %v1710_v11 = vperm.slane %v6472_v8, 7  ;;  %v6541_v55 = vsel %vm2127_vm1, %v2559_v25, %v6520_v49 }
 0x24d   : > { %v2036_v35 = vsel %vm1997_vm0, %v8785_v44, %v1373_v21  ;;  %v1366_v36 = vpop.permute.xlu0 %1365  ;;  %v1703_v9 = vperm.slane %v6472_v8, 6  ;;  %v6550_v21 = vperm.slane %v6441_v63, %v6148_v1  ;;  %v2567_v44 = vrot.slane %v6527_v54, 4 }
 0x24e   : > { %v2599_v15 = vrot.slane %v2036_v35, 4  ;;  %v2602_v3 = vsel %vm2127_vm1, %v2036_v35, %v2601_v28  ;;  %v2035_v16 = vsel %vm1997_vm0, %v8786_v23, %v1366_v36  ;;  %v2637_v52 = vrot.slane %v2586_v46, 4  ;;  %v8787_v23 = vld [vmem:[#allocation14_spill] sm:$0xff] }
 0x24f   : > { %v2612_v18 = vsel %vm2127_vm1, %v2611_v5, %v2035_v16  ;;  %v2613_v13 = vrot.slane %v2035_v16, 4  ;;  %v2626_v35 = vsel %vm2127_vm1, %v2594_v45, %v2625_v17  ;;  %v2040_v36 = vsel %vm1997_vm0, %v8787_v23, %v6450_v33 }
 0x250   : > { %v2600_v25 = vsel %vm2127_vm1, %v2599_v15, %v6468_v32  ;;  %v2618_v28 = vperm.slane %v2612_v18, %v6083_v29  ;;  %v2623_v5 = vrot.slane %v2594_v45, 4  ;;  %v1696_v32 = vperm.slane %v6472_v8, 5  ;;  %v6577_v8 = vld [vmem:[%s5794_s4 + $0xb8] sm:$0xff] }
 0x251   : > { %v2606_v16 = vperm.slane %v2600_v25, %v6083_v29  ;;  %v2614_v63 = vsel %vm2127_vm1, %v2037_v50, %v2613_v13  ;;  %v6566_v17 = vperm.slane %v6444_v57, %v6148_v1  ;;  %v2610_v15 = vperm.slane %v2602_v3, %v6083_v29 }
 0x252   : > { %v2622_v31 = vperm.slane %v2614_v63, %v6083_v29  ;;  %v2647_v46 = vrot.slane %v2618_v28, 4  ;;  %1694 = vperm.xlu2 %5594, %v1689_v24   ;;  %1687 = vperm.xlu1 %5593, %v1682_v43   ;;  %v6571_v45 = vsel %vm2127_vm1, %v2567_v44, %v6550_v21  ;;  %v2569_v50 = vrot.slane %v6550_v21, 4  ;;  %v8789_v63 = vld [vmem:[#allocation11_spill] sm:$0xff] }
 0x253   : > { %v2649_v33 = vrot.slane %v2606_v16, 4  ;;  %1680 = vperm.xlu0 %5592, %v1675_v34   ;;  %8788 = vst [vmem:[#allocation5_spill] sm:$0xff] %v6571_v45  ;;  %v2687_v18 = vrot.slane %v2040_v36, 4  ;;  %v2638_v3 = vsel %vm2127_vm1, %v6500_v20, %v2637_v52  ;;  %v2624_v44 = vsel %vm2127_vm1, %v2623_v5, %v2582_v37 }
 0x254   : > { %v2659_v13 = vrot.slane %v2622_v31, 4  ;;  %v6574_v24 = vpop.permute.xlu2 %1463  ;;  %v1394_v43 = vpop.permute.xlu1 %1393  ;;  %v2648_v57 = vsel %vm2127_vm1, %v2647_v46, %v2606_v16  ;;  %v2634_v21 = vperm.slane %v2626_v35, %v6148_v1  ;;  %v2642_v16 = vperm.slane %v2636_v7, %v6148_v1 }
 0x255   : > { %v2650_v34 = vsel %vm2127_vm1, %v2618_v28, %v2649_v33  ;;  %v1387_v25 = vpop.permute.xlu0 %1386  ;;  %v6585_v23 = vperm.slane %v2648_v57, %v6148_v1  ;;  %v2573_v46 = vrot.slane %v6566_v17, 4  ;;  %v2661_v52 = vrot.slane %v2610_v15, 4 }
 0x256   : > { %v2038_v62 = vsel %vm1997_vm0, %v8789_v63, %v1387_v25  ;;  %v2658_v19 = vperm.slane %v2650_v34, %v6148_v1  ;;  %v1731_v28 = vperm.slane %v6577_v8, 2  ;;  %v6596_v5 = vperm.slane %v2624_v44, %v6148_v1  ;;  %v8790_v34 = vld [vmem:[#allocation6_spill] sm:$0xff] }
 0x257   : > { %v2689_v20 = vrot.slane %v2038_v62, 4  ;;  %v2671_v37 = vrot.slane %v6585_v23, 4  ;;  %v2660_v35 = vsel %vm2127_vm1, %v2659_v13, %v2610_v15  ;;  %v2558_v57 = vperm.slane %v6479_v39, %v6148_v1 }
 0x258   : > { %v2675_v33 = vrot.slane %v2658_v19, 4  ;;  %v2039_v7 = vsel %vm1997_vm0, %v8790_v34, %v1394_v43  ;;  %v2688_v25 = vsel %vm2127_vm1, %v2687_v18, %v2038_v62  ;;  %v2677_v47 = vrot.slane %v2634_v21, 4 }
 0x259   : > { %v2690_v63 = vsel %vm2127_vm1, %v2040_v36, %v2689_v20  ;;  %v6608_v44 = vsel %vm2127_vm1, %v2671_v37, %v6596_v5  ;;  %v2681_v39 = vrot.slane %v2642_v16, 4  ;;  %v2666_v13 = vperm.slane %v2660_v35, %v6148_v1 }
 0x25a   : > { %v2698_v38 = vperm.slane %v2690_v63, %v6083_v29  ;;  %1715 = vperm.xlu2 %5594, %v1710_v11   ;;  %1708 = vperm.xlu1 %5593, %v1703_v9   ;;  %v6611_v15 = vsel %vm2127_vm1, %v2675_v33, %v2634_v21  ;;  %v6615_v62 = vsel %vm2127_vm1, %v2658_v19, %v2677_v47  ;;  %v1724_v43 = vperm.slane %v6577_v8, 1  ;;  %v8794_v33 = vld [vmem:[#allocation13_spill] sm:$0xff] }
 0x25b   : > { %1701 = vperm.xlu0 %5592, %v1696_v32   ;;  %8791 = vst [vmem:[#allocation9_spill] sm:$0xff] %v6615_v62  ;;  %v2646_v36 = vperm.slane %v2638_v3, %v6148_v1  ;;  %v2662_v18 = vsel %vm2127_vm1, %v2622_v31, %v2661_v52  ;;  %v6625_v21 = vsel %vm2127_vm1, %v6527_v54, %v2569_v50  ;;  %v2571_v32 = vrot.slane %v2558_v57, 4 }
 0x25c   : > { %v6619_v11 = vpop.permute.xlu2 %1484  ;;  %v1415_v9 = vpop.permute.xlu1 %1414  ;;  %v2670_v20 = vperm.slane %v2662_v18, %v6148_v1  ;;  %8792 = vst [vmem:[#allocation14_spill] sm:$0xff] %v6625_v21  ;;  %v2701_v37 = vrot.slane %v2039_v7, 4  ;;  %v6628_v19 = vperm.slane %v2688_v25, %v6083_v29  ;;  %v2679_v3 = vrot.slane %v2666_v13, 4 }
 0x25d   : > { %v1408_v47 = vpop.permute.xlu0 %1407  ;;  %v6631_v31 = vsel %vm2127_vm1, %v2666_v13, %v2681_v39  ;;  %v2749_v52 = vrot.slane %v2698_v38, 4  ;;  %v1717_v34 = vperm.slane %v6577_v8, 0  ;;  %v2685_v25 = vrot.slane %v2646_v36, 4 }
 0x25e   : > { %8793 = vst [vmem:[#allocation11_spill] sm:$0xff] %v6631_v31  ;;  %v2041_v35 = vsel %vm1997_vm0, %v8794_v33, %v1408_v47  ;;  %v2683_v63 = vrot.slane %v2670_v20, 4  ;;  %v6638_v50 = vsel %vm2127_vm1, %v2679_v3, %v2642_v16  ;;  %v6646_v39 = vsel %vm2127_vm1, %v2571_v32, %v6566_v17  ;;  %v8799_v47 = vld [vmem:[#allocation17_spill] sm:$0xff]  ;;  %v8800_v3 = vld [vmem:[#allocation7_spill] sm:$0xff] }
 0x25f   : > { %v2699_v18 = vrot.slane %v2041_v35, 4  ;;  %v2702_v54 = vsel %vm2127_vm1, %v2041_v35, %v2701_v37  ;;  %8795 = vst [vmem:[#allocation6_spill] sm:$0xff] %v6638_v50  ;;  %v6649_v13 = vsel %vm2127_vm1, %v2558_v57, %v2573_v46  ;;  %v2043_v37 = vsel %vm1997_vm0, %v8799_v47, %v6486_v27  ;;  %v8807_v31 = vld [vmem:[#allocation19_spill] sm:$0xff] }
 0x260   : > { %v2710_v21 = vperm.slane %v2702_v54, %v6083_v29  ;;  %v6642_v59 = vsel %vm2127_vm1, %v2683_v63, %v2646_v36  ;;  %8797 = vst [vmem:[#allocation113_spill] sm:$0xff] %v6646_v39  ;;  %v2737_v16 = vrot.slane %v6628_v19, 4  ;;  %v2042_v33 = vsel %vm1997_vm0, %v8800_v3, %v1415_v9  ;;  %v8803_v54 = vld [vmem:[#allocation16_spill] sm:$0xff] }
 0x261   : > { %8796 = vst [vmem:[#allocation13_spill] sm:$0xff] %v6642_v59  ;;  %v2700_v35 = vsel %vm2127_vm1, %v2699_v18, %v2039_v7  ;;  %v6665_v46 = vsel %vm2127_vm1, %v2670_v20, %v2685_v25  ;;  %v2725_v27 = vrot.slane %v2043_v37, 4  ;;  %v2713_v18 = vrot.slane %v2042_v33, 4 }
 0x262   : > { %8798 = vst [vmem:[#allocation114_spill] sm:$0xff] %v6649_v13  ;;  %v6659_v36 = vperm.slane %v2700_v35, %v6083_v29  ;;  %v2747_v63 = vrot.slane %v2710_v21, 4  ;;  %1736 = vperm.xlu2 %5594, %v1731_v28   ;;  %1729 = vperm.xlu1 %5593, %v1724_v43   ;;  %v6662_v17 = vsel %vm2127_vm1, %v2710_v21, %v2749_v52  ;;  %v8802_v28 = vld [vmem:[#allocation8_spill] sm:$0xff]  ;;  %v1752_v52 = vperm.slane %v6577_v8, 5  ;;  %v8805_v13 = vld [vmem:[#allocation23_spill] sm:$0xff] }
 0x263   : > { %8801 = vst [vmem:[#allocation17_spill] sm:$0xff] %v6665_v46  ;;  %1722 = vperm.xlu0 %5592, %v1717_v34   ;;  %v1745_v47 = vperm.slane %v6577_v8, 4  ;;  %v1738_v35 = vperm.slane %v6577_v8, 3 }
 0x264   : > { %v6667_v57 = vpop.permute.xlu2 %1505  ;;  %v1436_v32 = vpop.permute.xlu1 %1435  ;;  %v2738_v7 = vsel %vm2127_vm1, %v6659_v36, %v2737_v16  ;;  %v2748_v9 = vsel %vm2127_vm1, %v2747_v63, %v2698_v38  ;;  %v8804_v63 = vld [vmem:[#allocation20_spill] sm:$0xff] }
 0x265   : > { %v2045_v43 = vsel %vm1997_vm0, %v8802_v28, %v1436_v32  ;;  %v1429_v21 = vpop.permute.xlu0 %1428  ;;  %v2046_v32 = vsel %vm1997_vm0, %v8804_v63, %v6529_v58  ;;  %v2754_v12 = vperm.slane %v2748_v9, %v6148_v1 }
 0x266   : > { %v2723_v20 = vrot.slane %v2045_v43, 4  ;;  %v2726_v34 = vsel %vm2127_vm1, %v2045_v43, %v2725_v27  ;;  %v2044_v25 = vsel %vm1997_vm0, %v8803_v54, %v1429_v21  ;;  %v6688_v43 = vld [vmem:[%s5794_s4 + $0xe0] sm:$0xff]  ;;  %v2801_v58 = vrot.slane %v2046_v32, 4 }
 0x267   : > { %v2734_v16 = vperm.slane %v2726_v34, %v6083_v29  ;;  %v2711_v3 = vrot.slane %v2044_v25, 4  ;;  %v2714_v38 = vsel %vm2127_vm1, %v2044_v25, %v2713_v18  ;;  %v2049_v18 = vsel %vm1997_vm0, %v8805_v13, %v6574_v24 }
 0x268   : > { %v2724_v28 = vsel %vm2127_vm1, %v2723_v20, %v2043_v37  ;;  %v2722_v27 = vperm.slane %v2714_v38, %v6083_v29  ;;  %v1773_v38 = vperm.slane %v6688_v43, 0  ;;  %v1794_v9 = vperm.slane %v6688_v43, 3 }
 0x269   : > { %v2730_v21 = vperm.slane %v2724_v28, %v6083_v29  ;;  %v2771_v54 = vrot.slane %v2734_v16, 4  ;;  %v2712_v34 = vsel %vm2127_vm1, %v2711_v3, %v2042_v33  ;;  %v1766_v3 = vperm.slane %v6577_v8, 7 }
 0x26a   : > { %v2718_v25 = vperm.slane %v2712_v34, %v6083_v29  ;;  %v2773_v39 = vrot.slane %v2722_v27, 4  ;;  %1757 = vperm.xlu2 %5594, %v1752_v52   ;;  %1750 = vperm.xlu1 %5593, %v1745_v47   ;;  %v2811_v34 = vrot.slane %v2049_v18, 4  ;;  %v2735_v52 = vrot.slane %v6659_v36, 4  ;;  %v8806_v47 = vld [vmem:[#allocation10_spill] sm:$0xff] }
 0x26b   : > { %v2759_v37 = vrot.slane %v2730_v21, 4  ;;  %v2772_v20 = vsel %vm2127_vm1, %v2771_v54, %v2722_v27  ;;  %1743 = vperm.xlu0 %5592, %v1738_v35  }
 0x26c   : > { %v2761_v63 = vrot.slane %v2718_v25, 4  ;;  %v6698_v28 = vpop.permute.xlu2 %1526  ;;  %v1457_v33 = vpop.permute.xlu1 %1456  ;;  %v2778_v24 = vperm.slane %v2772_v20, %v6148_v1  ;;  %v2774_v13 = vsel %vm2127_vm1, %v2734_v16, %v2773_v39  ;;  %v1759_v39 = vperm.slane %v6577_v8, 6 }
 0x26d   : > { %v2048_v46 = vsel %vm1997_vm0, %v8806_v47, %v1457_v33  ;;  %v1450_v27 = vpop.permute.xlu0 %1449  ;;  %v2760_v35 = vsel %vm2127_vm1, %v2759_v37, %v2718_v25  ;;  %v2736_v8 = vsel %vm2127_vm1, %v2735_v52, %v6628_v19  ;;  %v8810_v52 = vld [vmem:[#allocation26_spill] sm:$0xff] }
 0x26e   : > { %v2799_v54 = vrot.slane %v2048_v46, 4  ;;  %v2802_v59 = vsel %vm2127_vm1, %v2048_v46, %v2801_v58  ;;  %v2047_v45 = vsel %vm1997_vm0, %v8807_v31, %v1450_v27  ;;  %v6713_v16 = vperm.slane %v2760_v35, %v6148_v1 }
 0x26f   : > { %v2813_v20 = vrot.slane %v2047_v45, 4  ;;  %v2812_v33 = vsel %vm2127_vm1, %v2811_v34, %v2047_v45  ;;  %v2762_v25 = vsel %vm2127_vm1, %v2730_v21, %v2761_v63  ;;  %v2791_v37 = vrot.slane %v2778_v24, 4 }
 0x270   : > { %v2800_v36 = vsel %vm2127_vm1, %v2799_v54, %v2046_v32  ;;  %v2746_v32 = vperm.slane %v2738_v7, %v6148_v1  ;;  %v2793_v45 = vrot.slane %v2754_v12, 4  ;;  %v2810_v21 = vperm.slane %v2802_v59, %v6083_v29 }
 0x271   : > { %v6719_v46 = vperm.slane %v2800_v36, %v6083_v29  ;;  %v2814_v31 = vsel %vm2127_vm1, %v2049_v18, %v2813_v20  ;;  %v6730_v34 = vperm.slane %v2812_v33, %v6083_v29  ;;  %v2783_v18 = vrot.slane %v6713_v16, 4  ;;  %v8811_v36 = vld [vmem:[#allocation22_spill] sm:$0xff] }
 0x272   : > { %v2822_v58 = vperm.slane %v2814_v31, %v6083_v29  ;;  %1778 = vperm.xlu2 %5594, %v1773_v38   ;;  %1771 = vperm.xlu1 %5593, %v1766_v3   ;;  %v1787_v3 = vperm.slane %v6688_v43, 2  ;;  %v2770_v19 = vperm.slane %v2762_v25, %v6148_v1  ;;  %v6738_v7 = vsel %vm2127_vm1, %v2791_v37, %v2754_v12 }
 0x273   : > { %v2849_v63 = vrot.slane %v6719_v46, 4  ;;  %1764 = vperm.xlu0 %5592, %v1759_v39   ;;  %8808 = vst [vmem:[#allocation7_spill] sm:$0xff] %v6738_v7  ;;  %v6741_v59 = vsel %vm2127_vm1, %v2778_v24, %v2793_v45  ;;  %v2052_v27 = vsel %vm1997_vm0, %v8810_v52, %v6619_v11  ;;  %v6747_v54 = vperm.slane %v2736_v8, %v6148_v1  ;;  %v8814_v52 = vld [vmem:[#allocation12_spill] sm:$0xff] }
 0x274   : > { %v6733_v47 = vpop.permute.xlu2 %1547  ;;  %v1478_v38 = vpop.permute.xlu1 %1477  ;;  %8809 = vst [vmem:[#allocation8_spill] sm:$0xff] %v6741_v59  ;;  %v2758_v39 = vperm.slane %v6662_v17, %v6148_v1  ;;  %v2859_v12 = vrot.slane %v2822_v58, 4  ;;  %v1780_v33 = vperm.slane %v6688_v43, 1  ;;  %v2789_v25 = vrot.slane %v2746_v32, 4 }
 0x275   : > { %v1471_v35 = vpop.permute.xlu0 %1470  ;;  %v6751_v20 = vsel %vm2127_vm1, %v6730_v34, %v2849_v63  ;;  %v2861_v37 = vrot.slane %v2810_v21, 4  ;;  %v6760_v31 = vsel %vm2127_vm1, %v2783_v18, %v6747_v54  ;;  %v2782_v8 = vperm.slane %v2774_v13, %v6148_v1 }
 0x276   : > { %v2050_v24 = vsel %vm1997_vm0, %v8811_v36, %v1471_v35  ;;  %8812 = vst [vmem:[#allocation16_spill] sm:$0xff] %v6760_v31  ;;  %v2823_v45 = vrot.slane %v2052_v27, 4  ;;  %v6764_v63 = vsel %vm2127_vm1, %v2770_v19, %v2789_v25  ;;  %v2787_v17 = vrot.slane %v2770_v19, 4 }
 0x277   : > { %v2825_v11 = vrot.slane %v2050_v24, 4  ;;  %8813 = vst [vmem:[#allocation20_spill] sm:$0xff] %v6764_v63  ;;  %v2051_v59 = vsel %vm1997_vm0, %v8814_v52, %v1478_v38  ;;  %v2797_v36 = vrot.slane %v2758_v39, 4  ;;  %v6774_v13 = vsel %vm2127_vm1, %v2859_v12, %v2810_v21  ;;  %v8818_v12 = vld [vmem:[#allocation25_spill] sm:$0xff] }
 0x278   : > { %v2824_v7 = vsel %vm2127_vm1, %v2823_v45, %v2050_v24  ;;  %v6771_v18 = vsel %vm2127_vm1, %v2787_v17, %v2746_v32  ;;  %v2795_v25 = vrot.slane %v2782_v8, 4  ;;  %v6777_v19 = vsel %vm2127_vm1, %v2822_v58, %v2861_v37  ;;  %v8819_v52 = vld [vmem:[#allocation29_spill] sm:$0xff] }
 0x279   : > { %v2826_v35 = vsel %vm2127_vm1, %v2052_v27, %v2825_v11  ;;  %8815 = vst [vmem:[#allocation23_spill] sm:$0xff] %v6771_v18  ;;  %v6780_v38 = vsel %vm2127_vm1, %v2782_v8, %v2797_v36  ;;  %v2830_v32 = vperm.slane %v2824_v7, %v6083_v29  ;;  %v1808_v37 = vperm.slane %v6688_v43, 5  ;;  %v6800_v36 = vld [vmem:[%s5794_s4 + $0xe8] sm:$0xff] }
 0x27a   : > { %1799 = vperm.xlu2 %5594, %v1794_v9   ;;  %1792 = vperm.xlu1 %5593, %v1787_v3   ;;  %8816 = vst [vmem:[#allocation10_spill] sm:$0xff] %v6780_v38  ;;  %v2834_v27 = vperm.slane %v2826_v35, %v6083_v29  ;;  %v2837_v3 = vrot.slane %v2051_v59, 4  ;;  %v6787_v21 = vsel %vm2127_vm1, %v2795_v25, %v2758_v39  ;;  %v1801_v17 = vperm.slane %v6688_v43, 4  ;;  %v8820_v25 = vld [vmem:[#allocation32_spill] sm:$0xff] }
 0x27b   : > { %1785 = vperm.xlu0 %5592, %v1780_v33   ;;  %8817 = vst [vmem:[#allocation19_spill] sm:$0xff] %v6787_v21  ;;  %v1815_v33 = vperm.slane %v6688_v43, 6  ;;  %v2055_v7 = vsel %vm1997_vm0, %v8819_v52, %v6667_v57  ;;  %v1836_v52 = vperm.slane %v6800_v36, 1  ;;  %v1843_v63 = vperm.slane %v6800_v36, 2 }
 0x27c   : > { %v6783_v24 = vpop.permute.xlu2 %1568  ;;  %v1499_v9 = vpop.permute.xlu1 %1498  ;;  %v2885_v35 = vrot.slane %v2834_v27, 4 }
 0x27d   : > { %v1492_v11 = vpop.permute.xlu0 %1491 }
 0x27e   : > { %v2053_v58 = vsel %vm1997_vm0, %v8818_v12, %v1492_v11  ;;  %v6805_v11 = vsel %vm1997_vm0, %v8820_v25, %v6698_v28  ;;  %v2873_v12 = vrot.slane %v2830_v32, 4  ;;  %v1829_v28 = vperm.slane %v6800_v36, 0 }
 0x27f   : > { %v2835_v8 = vrot.slane %v2053_v58, 4  ;;  %v2838_v45 = vsel %vm2127_vm1, %v2053_v58, %v2837_v3  ;;  %v8821_v3 = vld [vmem:[#allocation15_spill] sm:$0xff]  ;;  %v1822_v25 = vperm.slane %v6688_v43, 7 }
 0x280   : > { %v2846_v39 = vperm.slane %v2838_v45, %v6083_v29  ;;  %v2054_v58 = vsel %vm1997_vm0, %v8821_v3, %v1499_v9  ;;  %v2925_v45 = vrot.slane %v2055_v7, 4 }
 0x281   : > { %v2836_v38 = vsel %vm2127_vm1, %v2835_v8, %v2051_v59  ;;  %v2847_v59 = vrot.slane %v6730_v34, 4 }
 0x282   : > { %v2842_v21 = vperm.slane %v2836_v38, %v6083_v29  ;;  %v2883_v62 = vrot.slane %v2846_v39, 4  ;;  %v6812_v57 = vsel %vm2127_vm1, %v2846_v39, %v2885_v35  ;;  %1820 = vperm.xlu2 %5594, %v1815_v33   ;;  %1813 = vperm.xlu1 %5593, %v1808_v37   ;;  %v2937_v33 = vrot.slane %v6805_v11, 4 }
 0x283   : > { %1806 = vperm.xlu0 %5592, %v1801_v17   ;;  %v2913_v37 = vrot.slane %v2054_v58, 4  ;;  %v8822_v17 = vld [vmem:[#allocation18_spill] sm:$0xff] }
 0x284   : > { %v2871_v8 = vrot.slane %v2842_v21, 4  ;;  %v6818_v9 = vpop.permute.xlu2 %1589  ;;  %v1520_v38 = vpop.permute.xlu1 %1519  ;;  %v2874_v3 = vsel %vm2127_vm1, %v2842_v21, %v2873_v12  ;;  %v2884_v35 = vsel %vm2127_vm1, %v2883_v62, %v2834_v27  ;;  %v2858_v21 = vperm.slane %v6751_v20, %v6148_v1 }
 0x285   : > { %v2057_v39 = vsel %vm1997_vm0, %v8822_v17, %v1520_v38  ;;  %v1513_v50 = vpop.permute.xlu0 %1512  ;;  %v2882_v48 = vperm.slane %v2874_v3, %v6148_v1  ;;  %v2848_v3 = vsel %vm2127_vm1, %v2847_v59, %v6719_v46 }
 0x286   : > { %v2923_v43 = vrot.slane %v2057_v39, 4  ;;  %v2926_v34 = vsel %vm2127_vm1, %v2057_v39, %v2925_v45  ;;  %v2056_v61 = vsel %vm1997_vm0, %v8823_v10, %v1513_v50  ;;  %v2872_v38 = vsel %vm2127_vm1, %v2871_v8, %v2830_v32  ;;  %v8824_v50 = vld [vmem:[#allocation35_spill] sm:$0xff] }
 0x287   : > { %v6832_v62 = vperm.slane %v2926_v34, %v6083_v29  ;;  %v2911_v27 = vrot.slane %v2056_v61, 4  ;;  %v2914_v12 = vsel %vm2127_vm1, %v2056_v61, %v2913_v37  ;;  %v6839_v17 = vperm.slane %v2872_v38, %v6148_v1 }
 0x288   : > { %v2899_v45 = vrot.slane %v2882_v48, 4  ;;  %v2890_v10 = vperm.slane %v2884_v35, %v6148_v1  ;;  %v2061_v20 = vsel %vm1997_vm0, %v8824_v50, %v6733_v47  ;;  %v1857_v61 = vperm.slane %v6800_v36, 4 }
 0x289   : > { %v2971_v39 = vrot.slane %v6832_v62, 4  ;;  %v2912_v34 = vsel %vm2127_vm1, %v2911_v27, %v2054_v58  ;;  %v2924_v32 = vsel %vm2127_vm1, %v2923_v43, %v2055_v7  ;;  %v6851_v59 = vperm.slane %v2914_v12, %v6083_v29 }
 0x28a   : > { %v2918_v46 = vperm.slane %v2912_v34, %v6083_v29  ;;  %1841 = vperm.xlu2 %5594, %v1836_v52   ;;  %1834 = vperm.xlu1 %5593, %v1829_v28   ;;  %v2901_v8 = vrot.slane %v2858_v21, 4  ;;  %v1850_v35 = vperm.slane %v6800_v36, 3  ;;  %v6855_v47 = vperm.slane %v2848_v3, %v6148_v1  ;;  %v8826_v3 = vld [vmem:[#allocation21_spill] sm:$0xff] }
 0x28b   : > { %1827 = vperm.xlu0 %5592, %v1822_v25   ;;  %v6858_v58 = vsel %vm2127_vm1, %v2899_v45, %v2858_v21  ;;  %v2895_v37 = vrot.slane %v6839_v17, 4  ;;  %v2903_v52 = vrot.slane %v2890_v10, 4  ;;  %v2972_v28 = vsel %vm2127_vm1, %v2971_v39, %v6851_v59 }
 0x28c   : > { %v2961_v7 = vrot.slane %v2918_v46, 4  ;;  %v6861_v43 = vpop.permute.xlu2 %1610  ;;  %v1541_v27 = vpop.permute.xlu1 %1540  ;;  %v6864_v12 = vsel %vm2127_vm1, %v2882_v48, %v2901_v8  ;;  %v2947_v25 = vrot.slane %v2061_v20, 4  ;;  %v2930_v38 = vperm.slane %v2924_v32, %v6083_v29  ;;  %v8828_v48 = vld [vmem:[#allocation31_spill] sm:$0xff] }
 0x28d   : > { %8825 = vst [vmem:[#allocation26_spill] sm:$0xff] %v6864_v12  ;;  %v2060_v21 = vsel %vm1997_vm0, %v8826_v3, %v1541_v27  ;;  %v1534_v45 = vpop.permute.xlu0 %1533  ;;  %v6873_v50 = vsel %vm2127_vm1, %v2895_v37, %v6855_v47  ;;  %v2866_v39 = vperm.slane %v6774_v13, %v6148_v1  ;;  %v1878_v27 = vperm.slane %v6800_v36, 7 }
 0x28e   : > { %8827 = vst [vmem:[#allocation22_spill] sm:$0xff] %v6873_v50  ;;  %v2935_v34 = vrot.slane %v2060_v21, 4  ;;  %v2938_v18 = vsel %vm2127_vm1, %v2060_v21, %v2937_v33  ;;  %v2059_v8 = vsel %vm1997_vm0, %v8828_v48, %v1534_v45  ;;  %v2962_v33 = vsel %vm2127_vm1, %v2930_v38, %v2961_v7  ;;  %v8830_v7 = vld [vmem:[#allocation38_spill] sm:$0xff] }
 0x28f   : > { %v2948_v12 = vsel %vm2127_vm1, %v2947_v25, %v2059_v8  ;;  %v2949_v32 = vrot.slane %v2059_v8, 4  ;;  %v6888_v21 = vsel %vm2127_vm1, %v2903_v52, %v2866_v39  ;;  %v2959_v45 = vrot.slane %v2930_v38, 4 }
 0x290   : > { %v2936_v37 = vsel %vm2127_vm1, %v2935_v34, %v6805_v11  ;;  %v2954_v3 = vperm.slane %v2948_v12, %v6083_v29  ;;  %8829 = vst [vmem:[#allocation12_spill] sm:$0xff] %v6888_v21  ;;  %v1871_v48 = vperm.slane %v6800_v36, 6  ;;  %v1864_v11 = vperm.slane %v6800_v36, 5  ;;  %v8832_v21 = vld [vmem:[#allocation34_spill] sm:$0xff] }
 0x291   : > { %v2942_v13 = vperm.slane %v2936_v37, %v6083_v29  ;;  %v2950_v25 = vsel %vm2127_vm1, %v2061_v20, %v2949_v32  ;;  %v2905_v12 = vrot.slane %v2866_v39, 4  ;;  %v2064_v52 = vsel %vm1997_vm0, %v8830_v7, %v6783_v24 }
 0x292   : > { %v2958_v8 = vperm.slane %v2950_v25, %v6083_v29  ;;  %v2983_v14 = vrot.slane %v2954_v3, 4  ;;  %1862 = vperm.xlu2 %5594, %v1857_v61   ;;  %1855 = vperm.xlu1 %5593, %v1850_v35   ;;  %v2870_v38 = vperm.slane %v6777_v19, %v6148_v1  ;;  %v2894_v20 = vperm.slane %v6812_v57, %v6148_v1 }
 0x293   : > { %v2985_v34 = vrot.slane %v2942_v13, 4  ;;  %1848 = vperm.xlu0 %5592, %v1843_v63   ;;  %v2946_v32 = vperm.slane %v2938_v18, %v6083_v29  ;;  %v6907_v37 = vsel %vm2127_vm1, %v2890_v10, %v2905_v12  ;;  %v2960_v19 = vsel %vm2127_vm1, %v2959_v45, %v2918_v46 }
 0x294   : > { %v2995_v61 = vrot.slane %v2958_v8, 4  ;;  %v6903_v35 = vpop.permute.xlu2 %1631  ;;  %v1562_v36 = vpop.permute.xlu1 %1561  ;;  %v2984_v39 = vsel %vm2127_vm1, %v2983_v14, %v2942_v13  ;;  %8831 = vst [vmem:[#allocation25_spill] sm:$0xff] %v6907_v37  ;;  %v2970_v18 = vperm.slane %v2962_v33, %v6148_v1  ;;  %v3023_v57 = vrot.slane %v2064_v52, 4  ;;  %v6920_v13 = vld [vmem:[%s5794_s4 + $0xf0] sm:$0xff] }
 0x295   : > { %v2986_v63 = vsel %vm2127_vm1, %v2954_v3, %v2985_v34  ;;  %v1555_v24 = vpop.permute.xlu0 %1554  ;;  %v6912_v25 = vperm.slane %v2984_v39, %v6148_v1  ;;  %v2973_v7 = vrot.slane %v6851_v59, 4  ;;  %v2978_v46 = vperm.slane %v2972_v28, %v6148_v1  ;;  %v8833_v39 = vld [vmem:[#allocation24_spill] sm:$0xff] }
 0x296   : > { %v2062_v60 = vsel %vm1997_vm0, %v8832_v21, %v1555_v24  ;;  %v2994_v14 = vperm.slane %v2986_v63, %v6148_v1  ;;  %v2907_v45 = vrot.slane %v2894_v20, 4  ;;  %v2997_v12 = vrot.slane %v2946_v32, 4 }
 0x297   : > { %v3025_v10 = vrot.slane %v2062_v60, 4  ;;  %v3007_v3 = vrot.slane %v6912_v25, 4  ;;  %v6925_v34 = vperm.slane %v2960_v19, %v6148_v1  ;;  %v2996_v59 = vsel %vm2127_vm1, %v2995_v61, %v2946_v32 }
 0x298   : > { %v3011_v33 = vrot.slane %v2994_v14, 4  ;;  %v2063_v21 = vsel %vm1997_vm0, %v8833_v39, %v1562_v36  ;;  %v3013_v24 = vrot.slane %v2970_v18, 4  ;;  %v2909_v37 = vrot.slane %v2870_v38, 4 }
 0x299   : > { %v3026_v63 = vsel %vm2127_vm1, %v2064_v52, %v3025_v10  ;;  %v3024_v31 = vsel %vm2127_vm1, %v3023_v57, %v2062_v60  ;;  %v1899_v28 = vperm.slane %v6920_v13, 2  ;;  %v6935_v19 = vsel %vm2127_vm1, %v3007_v3, %v6925_v34 }
 0x29a   : > { %1883 = vperm.xlu2 %5594, %v1878_v27   ;;  %1876 = vperm.xlu1 %5593, %v1871_v48   ;;  %v6938_v50 = vsel %vm2127_vm1, %v3011_v33, %v2970_v18  ;;  %v6941_v32 = vsel %vm2127_vm1, %v2994_v14, %v3013_v24  ;;  %v3002_v52 = vperm.slane %v2996_v59, %v6148_v1  ;;  %v3017_v61 = vrot.slane %v2978_v46, 4  ;;  %v8839_v33 = vld [vmem:[#allocation37_spill] sm:$0xff] }
 0x29b   : > { %8834 = vst [vmem:[#allocation29_spill] sm:$0xff] %v6938_v50  ;;  %1869 = vperm.xlu0 %5592, %v1864_v11   ;;  %v6945_v60 = vsel %vm2127_vm1, %v2907_v45, %v2870_v38  ;;  %v3034_v27 = vperm.slane %v3026_v63, %v6083_v29  ;;  %v2974_v57 = vsel %vm2127_vm1, %v6832_v62, %v2973_v7  ;;  %v3037_v14 = vrot.slane %v2063_v21, 4 }
 0x29c   : > { %8835 = vst [vmem:[#allocation32_spill] sm:$0xff] %v6941_v32  ;;  %v6948_v48 = vpop.permute.xlu2 %1652  ;;  %v1583_v36 = vpop.permute.xlu1 %1582  ;;  %v2998_v18 = vsel %vm2127_vm1, %v2958_v8, %v2997_v12  ;;  %v6954_v11 = vsel %vm2127_vm1, %v2894_v20, %v2909_v37  ;;  %v6957_v10 = vperm.slane %v3024_v31, %v6083_v29  ;;  %v3015_v38 = vrot.slane %v3002_v52, 4  ;;  %v8841_v12 = vld [vmem:[#allocation41_spill] sm:$0xff] }
 0x29d   : > { %8836 = vst [vmem:[#allocation15_spill] sm:$0xff] %v6945_v60  ;;  %v1576_v3 = vpop.permute.xlu0 %1575  ;;  %v6960_v45 = vsel %vm2127_vm1, %v3002_v52, %v3017_v61  ;;  %v1892_v39 = vperm.slane %v6920_v13, 1  ;;  %v1885_v62 = vperm.slane %v6920_v13, 0  ;;  %v2982_v8 = vperm.slane %v2974_v57, %v6148_v1 }
 0x29e   : > { %8837 = vst [vmem:[#allocation18_spill] sm:$0xff] %v6954_v11  ;;  %v2065_v59 = vsel %vm1997_vm0, %v8839_v33, %v1576_v3  ;;  %v6969_v31 = vsel %vm2127_vm1, %v3015_v38, %v2978_v46  ;;  %v3006_v7 = vperm.slane %v2998_v18, %v6148_v1  ;;  %v2067_v63 = vsel %vm1997_vm0, %v8841_v12, %v6818_v9  ;;  %v8842_v3 = vld [vmem:[#allocation27_spill] sm:$0xff] }
 0x29f   : > { %8838 = vst [vmem:[#allocation28_spill] sm:$0xff] %v6960_v45  ;;  %v3035_v20 = vrot.slane %v2065_v59, 4  ;;  %v3038_v37 = vsel %vm2127_vm1, %v2065_v59, %v3037_v14  ;;  %v3085_v24 = vrot.slane %v3034_v27, 4  ;;  %v3073_v61 = vrot.slane %v6957_v10, 4 }
 0x2a0   : > { %8840 = vst [vmem:[#allocation35_spill] sm:$0xff] %v6969_v31  ;;  %v3046_v52 = vperm.slane %v3038_v37, %v6083_v29  ;;  %v2066_v57 = vsel %vm1997_vm0, %v8842_v3, %v1583_v36  ;;  %v3021_v14 = vrot.slane %v2982_v8, 4  ;;  %v3019_v59 = vrot.slane %v3006_v7, 4  ;;  %v8846_v3 = vld [vmem:[#allocation44_spill] sm:$0xff] }
 0x2a1   : > { %v3036_v33 = vsel %vm2127_vm1, %v3035_v20, %v2063_v21  ;;  %v3061_v37 = vrot.slane %v2067_v63, 4 }
 0x2a2   : > { %v3042_v46 = vperm.slane %v3036_v33, %v6083_v29  ;;  %v3083_v38 = vrot.slane %v3046_v52, 4  ;;  %1904 = vperm.xlu2 %5594, %v1899_v28   ;;  %1897 = vperm.xlu1 %5593, %v1892_v39   ;;  %v3086_v18 = vsel %vm2127_vm1, %v3046_v52, %v3085_v24  ;;  %v6983_v9 = vsel %vm2127_vm1, %v3006_v7, %v3021_v14  ;;  %v8845_v39 = vld [vmem:[#allocation30_spill] sm:$0xff] }
 0x2a3   : > { %1890 = vperm.xlu0 %5592, %v1885_v62   ;;  %8843 = vst [vmem:[#allocation21_spill] sm:$0xff] %v6983_v9  ;;  %v6990_v20 = vsel %vm2127_vm1, %v3019_v59, %v2982_v8  ;;  %v3049_v28 = vrot.slane %v2066_v57, 4  ;;  %v1920_v7 = vperm.slane %v6920_v13, 5  ;;  %v1913_v52 = vperm.slane %v6920_v13, 4  ;;  %v7006_v9 = vld [vmem:[%s5794_s4 + $0xf8] sm:$0xff]  ;;  %s5494_s4 = sshll.u32 %s154_s3, 4 }
 0x2a4   : > { %v6985_v12 = vpop.permute.xlu2 %1673  ;;  %v1604_v11 = vpop.permute.xlu1 %1603  ;;  %v3074_v36 = vsel %vm2127_vm1, %v3042_v46, %v3073_v61  ;;  %v3084_v21 = vsel %vm2127_vm1, %v3083_v38, %v3034_v27  ;;  %8844 = vst [vmem:[#allocation31_spill] sm:$0xff] %v6990_v20  ;;  %v2070_v33 = vsel %vm1997_vm0, %v8846_v3, %v6861_v43  ;;  %v8847_v27 = vld [vmem:[#allocation40_spill] sm:$0xff]  ;;  %v8848_v20 = vld [vmem:[#allocation47_spill] sm:$0xff]  ;;  %v3071_v43 = vrot.slane %v3042_v46, 4 }
 0x2a5   : > { %v2069_v24 = vsel %vm1997_vm0, %v8845_v39, %v1604_v11  ;;  %v1597_v62 = vpop.permute.xlu0 %1596  ;;  %v1906_v39 = vperm.slane %v6920_v13, 3  ;;  %v2073_v60 = vsel %vm1997_vm0, %v8848_v20, %v6903_v35  ;;  %v1941_v45 = vperm.slane %v7006_v9, 0 }
 0x2a6   : > { %v3059_v61 = vrot.slane %v2069_v24, 4  ;;  %v3062_v14 = vsel %vm2127_vm1, %v2069_v24, %v3061_v37  ;;  %v2068_v8 = vsel %vm1997_vm0, %v8847_v27, %v1597_v62  ;;  %v3137_v24 = vrot.slane %v2070_v33, 4 }
 0x2a7   : > { %v3070_v38 = vperm.slane %v3062_v14, %v6083_v29  ;;  %v3047_v59 = vrot.slane %v2068_v8, 4  ;;  %v3050_v11 = vsel %vm2127_vm1, %v2068_v8, %v3049_v28  ;;  %v1934_v35 = vperm.slane %v6920_v13, 7 }
 0x2a8   : > { %v3060_v3 = vsel %vm2127_vm1, %v3059_v61, %v2067_v63  ;;  %v3058_v37 = vperm.slane %v3050_v11, %v6083_v29  ;;  %v3147_v46 = vrot.slane %v2073_v60, 4  ;;  %v1927_v61 = vperm.slane %v6920_v13, 6 }
 0x2a9   : > { %v3066_v62 = vperm.slane %v3060_v3, %v6083_v29  ;;  %v3107_v14 = vrot.slane %v3070_v38, 4  ;;  %v3048_v27 = vsel %vm2127_vm1, %v3047_v59, %v2066_v57  ;;  %v3072_v59 = vsel %vm2127_vm1, %v3071_v43, %v6957_v10 }
 0x2aa   : > { %v3054_v28 = vperm.slane %v3048_v27, %v6083_v29  ;;  %v3109_v8 = vrot.slane %v3058_v37, 4  ;;  %1925 = vperm.xlu2 %5594, %v1920_v7   ;;  %1918 = vperm.xlu1 %5593, %v1913_v52   ;;  %v8849_v27 = vld [vmem:[#allocation33_spill] sm:$0xff]  ;;  %v3094_v13 = vperm.slane %v3086_v18, %v6148_v1  ;;  %v3082_v43 = vperm.slane %v3074_v36, %v6148_v1 }
 0x2ab   : > { %v3095_v20 = vrot.slane %v3066_v62, 4  ;;  %v3108_v63 = vsel %vm2127_vm1, %v3107_v14, %v3058_v37  ;;  %1911 = vperm.xlu0 %5592, %v1906_v39   ;;  %v3090_v39 = vperm.slane %v3084_v21, %v6148_v1 }
 0x2ac   : > { %v3097_v11 = vrot.slane %v3054_v28, 4  ;;  %v7020_v3 = vpop.permute.xlu2 %1694  ;;  %v1625_v57 = vpop.permute.xlu1 %1624  ;;  %v3114_v7 = vperm.slane %v3108_v63, %v6148_v1  ;;  %v3110_v52 = vsel %vm2127_vm1, %v3070_v38, %v3109_v8  ;;  %v7036_v38 = vperm.slane %v3072_v59, %v6148_v1 }
 0x2ad   : > { %v2072_v31 = vsel %vm1997_vm0, %v8849_v27, %v1625_v57  ;;  %v1618_v32 = vpop.permute.xlu0 %1617  ;;  %v3096_v37 = vsel %vm2127_vm1, %v3095_v20, %v3054_v28  ;;  %v3118_v28 = vperm.slane %v3110_v52, %v6148_v1  ;;  %v3129_v20 = vrot.slane %v3090_v39, 4 }
 0x2ae   : > { %v3135_v14 = vrot.slane %v2072_v31, 4  ;;  %v3138_v50 = vsel %vm2127_vm1, %v2072_v31, %v3137_v24  ;;  %v2071_v10 = vsel %vm1997_vm0, %v8850_v56, %v1618_v32  ;;  %v7039_v8 = vperm.slane %v3096_v37, %v6148_v1 }
 0x2af   : > { %v3149_v63 = vrot.slane %v2071_v10, 4  ;;  %v3148_v18 = vsel %vm2127_vm1, %v3147_v46, %v2071_v10  ;;  %v3098_v31 = vsel %vm2127_vm1, %v3066_v62, %v3097_v11  ;;  %v3127_v24 = vrot.slane %v3114_v7, 4 }
 0x2b0   : > { %v3136_v21 = vsel %vm2127_vm1, %v3135_v14, %v2070_v33  ;;  %v3146_v32 = vperm.slane %v3138_v50, %v6083_v29  ;;  %v3119_v59 = vrot.slane %v7039_v8, 4  ;;  %v3106_v33 = vperm.slane %v3098_v31, %v6148_v1 }
 0x2b1   : > { %v7046_v56 = vperm.slane %v3136_v21, %v6083_v29  ;;  %v3150_v36 = vsel %vm2127_vm1, %v2073_v60, %v3149_v63  ;;  %v3125_v46 = vrot.slane %v3082_v43, 4  ;;  %v7055_v11 = vperm.slane %v3148_v18, %v6083_v29  ;;  %v8855_v18 = vld [vmem:[#allocation46_spill] sm:$0xff] }
 0x2b2   : > { %v3158_v57 = vperm.slane %v3150_v36, %v6083_v29  ;;  %1946 = vperm.xlu2 %5594, %v1941_v45   ;;  %1939 = vperm.xlu1 %5593, %v1934_v35   ;;  %v7058_v50 = vsel %vm2127_vm1, %v3127_v24, %v3090_v39  ;;  %v7061_v60 = vsel %vm2127_vm1, %v3114_v7, %v3129_v20  ;;  %v3131_v14 = vrot.slane %v3118_v28, 4 }
 0x2b3   : > { %v3185_v62 = vrot.slane %v7046_v56, 4  ;;  %1932 = vperm.xlu0 %5592, %v1927_v61   ;;  %8851 = vst [vmem:[#allocation38_spill] sm:$0xff] %v7058_v50  ;;  %v7067_v27 = vsel %vm2127_vm1, %v3119_v59, %v7036_v38  ;;  %v7070_v37 = vsel %vm2127_vm1, %v3106_v33, %v3125_v46  ;;  %v8854_v61 = vld [vmem:[#allocation50_spill] sm:$0xff]  ;;  %v3197_v10 = vrot.slane %v3146_v32, 4 }
 0x2b4   : > { %8852 = vst [vmem:[#allocation34_spill] sm:$0xff] %v7061_v60  ;;  %v3195_v52 = vrot.slane %v3158_v57, 4  ;;  %v7063_v45 = vpop.permute.xlu2 %1715  ;;  %v1646_v35 = vpop.permute.xlu1 %1645  ;;  %v2076_v39 = vsel %vm1997_vm0, %v8854_v61, %v6948_v48  ;;  %v2225_v7 = vrot.slane %v6195_v51, 4  ;;  %v1962_v24 = vperm.slane %v7006_v9, 3 }
 0x2b5   : > { %8853 = vst [vmem:[#allocation24_spill] sm:$0xff] %v7070_v37  ;;  %v1639_v63 = vpop.permute.xlu0 %1638  ;;  %v3186_v21 = vsel %vm2127_vm1, %v7055_v11, %v3185_v62  ;;  %v1955_v36 = vperm.slane %v7006_v9, 2  ;;  %v2337_v20 = vrot.slane %v6267_v6, 4  ;;  %v1948_v46 = vperm.slane %v7006_v9, 1 }
 0x2b6   : > { %v2074_v31 = vsel %vm1997_vm0, %v8855_v18, %v1639_v63  ;;  %v2449_v48 = vrot.slane %v6414_v0, 4  ;;  %v3123_v61 = vrot.slane %v3106_v33, 4  ;;  %v3159_v60 = vrot.slane %v2076_v39, 4  ;;  %v8857_v0 = vld [vmem:[#allocation36_spill] sm:$0xff] }
 0x2b7   : > { %v3161_v59 = vrot.slane %v2074_v31, 4  ;;  %v7086_v51 = vsel %vm2127_vm1, %v3195_v52, %v3146_v32  ;;  %v7089_v62 = vsel %vm2127_vm1, %v3131_v14, %v3094_v13  ;;  %v3133_v63 = vrot.slane %v3094_v13, 4 }
 0x2b8   : > { %8856 = vst [vmem:[#allocation37_spill] sm:$0xff] %v7089_v62  ;;  %v2561_v50 = vrot.slane %v6520_v49, 4  ;;  %v7094_v6 = vsel %vm2127_vm1, %v3123_v61, %v3082_v43  ;;  %v7097_v37 = vsel %vm2127_vm1, %v3158_v57, %v3197_v10  ;;  %v2075_v33 = vsel %vm1997_vm0, %v8857_v0, %v1646_v35 }
 0x2b9   : > { %v3162_v18 = vsel %vm2127_vm1, %v2076_v39, %v3161_v59  ;;  %v3160_v32 = vsel %vm2127_vm1, %v3159_v60, %v2074_v31  ;;  %v2673_v52 = vrot.slane %v6596_v5, 4  ;;  %v7104_v13 = vsel %vm2127_vm1, %v3118_v28, %v3133_v63 }
 0x2ba   : > { %1967 = vperm.xlu2 %5594, %v1962_v24   ;;  %1960 = vperm.xlu1 %5593, %v1955_v36   ;;  %8858 = vst [vmem:[#allocation41_spill] sm:$0xff] %v7104_v13  ;;  %v7108_v49 = vsel %vm2127_vm1, %v6183_v30, %v2225_v7  ;;  %v7112_v43 = vsel %vm2127_vm1, %v6253_v4, %v2337_v20  ;;  %v2785_v57 = vrot.slane %v6747_v54, 4  ;;  %v3173_v4 = vrot.slane %v2075_v33, 4 }
 0x2bb   : > { %1953 = vperm.xlu0 %5592, %v1948_v46   ;;  %v3170_v60 = vperm.slane %v3162_v18, %v6083_v29  ;;  %v7120_v5 = vsel %vm2127_vm1, %v6380_v42, %v2449_v48  ;;  %v7124_v28 = vsel %vm2127_vm1, %v6508_v2, %v2561_v50  ;;  %v7128_v30 = vsel %vm2127_vm1, %v6585_v23, %v2673_v52  ;;  %v8859_v42 = vld [vmem:[#allocation53_spill] sm:$0xff]  ;;  %v8861_v46 = vld [vmem:[#allocation56_spill] sm:$0xff]  ;;  %v8862_v52 = vld [vmem:[#allocation39_spill] sm:$0xff] }
 0x2bc   : > { %v7116_v35 = vpop.permute.xlu2 %1736  ;;  %v1667_v14 = vpop.permute.xlu1 %1666  ;;  %v3166_v54 = vperm.slane %v3160_v32, %v6083_v29  ;;  %v7133_v10 = vsel %vm2127_vm1, %v6713_v16, %v2785_v57  ;;  %v2079_v31 = vsel %vm1997_vm0, %v8859_v42, %v6985_v12  ;;  %v8860_v2 = vld [vmem:[#allocation49_spill] sm:$0xff]  ;;  %v1983_v23 = vperm.slane %v7006_v9, 6 }
 0x2bd   : > { %v1660_v39 = vpop.permute.xlu0 %1659  ;;  %v1976_v24 = vperm.slane %v7006_v9, 5  ;;  %v3183_v36 = vrot.slane %v7055_v11, 4  ;;  %v1969_v16 = vperm.slane %v7006_v9, 4  ;;  %v7149_v48 = vsel %vm1997_vm0, %v8861_v46, %v7020_v3 }
 0x2be   : > { %v2077_v50 = vsel %vm1997_vm0, %v8860_v2, %v1660_v39  ;;  %v3221_v12 = vrot.slane %v3170_v60, 4  ;;  %v3194_v63 = vperm.slane %v3186_v21, %v6148_v1  ;;  %v3261_v18 = vrot.slane %v2079_v31, 4  ;;  %v8863_v21 = vld [vmem:[#allocation59_spill] sm:$0xff] }
 0x2bf   : > { %v3171_v20 = vrot.slane %v2077_v50, 4  ;;  %v3174_v59 = vsel %vm2127_vm1, %v2077_v50, %v3173_v4  ;;  %v3209_v0 = vrot.slane %v3166_v54, 4  ;;  %v2078_v57 = vsel %vm1997_vm0, %v8862_v52, %v1667_v14  ;;  %v8865_v52 = vld [vmem:[#allocation52_spill] sm:$0xff] }
 0x2c0   : > { %v3182_v61 = vperm.slane %v3174_v59, %v6083_v29  ;;  %v3273_v42 = vrot.slane %v7149_v48, 4  ;;  %v7163_v2 = vsel %vm1997_vm0, %v8863_v21, %v7063_v45  ;;  %v3184_v14 = vsel %vm2127_vm1, %v3183_v36, %v7046_v56 }
 0x2c1   : > { %v3172_v32 = vsel %vm2127_vm1, %v3171_v20, %v2075_v33  ;;  %v1990_v33 = vperm.slane %v7006_v9, 7  ;;  %v3202_v9 = vperm.slane %v7086_v51, %v6148_v1 }
 0x2c2   : > { %v3178_v4 = vperm.slane %v3172_v32, %v6083_v29  ;;  %v3219_v39 = vrot.slane %v3182_v61, 4  ;;  %v3222_v3 = vsel %vm2127_vm1, %v3182_v61, %v3221_v12  ;;  %1988 = vperm.xlu2 %5594, %v1983_v23   ;;  %1981 = vperm.xlu1 %5593, %v1976_v24   ;;  %v3237_v24 = vrot.slane %v3194_v63, 4  ;;  %v8864_v61 = vld [vmem:[#allocation42_spill] sm:$0xff] }
 0x2c3   : > { %1974 = vperm.xlu0 %5592, %v1969_v16   ;;  %v3249_v12 = vrot.slane %v2078_v57, 4 }
 0x2c4   : > { %v3207_v50 = vrot.slane %v3178_v4, 4  ;;  %v7168_v20 = vpop.permute.xlu2 %1757  ;;  %v1688_v59 = vpop.permute.xlu1 %1687  ;;  %v3210_v23 = vsel %vm2127_vm1, %v3178_v4, %v3209_v0  ;;  %v3220_v46 = vsel %vm2127_vm1, %v3219_v39, %v3170_v60  ;;  %v7182_v0 = vperm.slane %v7097_v37, %v6148_v1 }
 0x2c5   : > { %v2081_v45 = vsel %vm1997_vm0, %v8864_v61, %v1688_v59  ;;  %v1681_v32 = vpop.permute.xlu0 %1680  ;;  %v3218_v16 = vperm.slane %v3210_v23, %v6148_v1  ;;  %v3226_v61 = vperm.slane %v3220_v46, %v6148_v1 }
 0x2c6   : > { %v3259_v56 = vrot.slane %v2081_v45, 4  ;;  %v3262_v36 = vsel %vm2127_vm1, %v2081_v45, %v3261_v18  ;;  %v2080_v21 = vsel %vm1997_vm0, %v8865_v52, %v1681_v32  ;;  %v3208_v59 = vsel %vm2127_vm1, %v3207_v50, %v3166_v54 }
 0x2c7   : > { %v3270_v60 = vperm.slane %v3262_v36, %v6083_v29  ;;  %v3247_v4 = vrot.slane %v2080_v21, 4  ;;  %v3250_v39 = vsel %vm2127_vm1, %v2080_v21, %v3249_v12  ;;  %v7189_v51 = vperm.slane %v3208_v59, %v6148_v1 }
 0x2c8   : > { %v3260_v23 = vsel %vm2127_vm1, %v3259_v56, %v2079_v31  ;;  %v3235_v18 = vrot.slane %v3218_v16, 4  ;;  %v3258_v37 = vperm.slane %v3250_v39, %v6083_v29  ;;  %v7195_v36 = vsel %vm2127_vm1, %v3218_v16, %v3237_v24 }
 0x2c9   : > { %v3307_v45 = vrot.slane %v3270_v60, 4  ;;  %v3248_v32 = vsel %vm2127_vm1, %v3247_v4, %v2078_v57  ;;  %v3266_v12 = vperm.slane %v3260_v23, %v6083_v29  ;;  %v3241_v57 = vrot.slane %v3202_v9, 4  ;;  %v8868_v4 = vld [vmem:[#allocation45_spill] sm:$0xff] }
 0x2ca   : > { %v3254_v54 = vperm.slane %v3248_v32, %v6083_v29  ;;  %3935 = vrot.lane.b32.xlu1 %v7108_v49, %s5693_s5  ;;  %3937 = vrot.lane.b32.xlu2 %v7112_v43, %s5693_s5  ;;  %v7204_v31 = vsel %vm2127_vm1, %v3235_v18, %v3194_v63  ;;  %v7207_v50 = vperm.slane %v3184_v14, %v6148_v1  ;;  %v3231_v24 = vrot.slane %v7189_v51, 4 }
 0x2cb   : > { %1995 = vperm.xlu0 %5592, %v1990_v33   ;;  %v3308_v46 = vsel %vm2127_vm1, %v3307_v45, %v3258_v37  ;;  %v3230_v16 = vperm.slane %v3222_v3, %v6148_v1  ;;  %v3283_v56 = vrot.slane %v7163_v2, 4  ;;  %v3239_v21 = vrot.slane %v3226_v61, 4  ;;  %v8867_v33 = vld [vmem:[#allocation62_spill] sm:$0xff] }
 0x2cc   : > { %v3297_v49 = vrot.slane %v3254_v54, 4  ;;  %v7213_v52 = vpop.permute.xlu2 %1778  ;;  %v1709_v43 = vpop.permute.xlu1 %1708  ;;  %v7216_v63 = vsel %vm2127_vm1, %v3226_v61, %v3241_v57  ;;  %v2088_v14 = vsel %vm1997_vm0, %v8867_v33, %v7116_v35  ;;  %v7225_v3 = vsel %vm2127_vm1, %v3231_v24, %v7207_v50  ;;  %v8869_v61 = vld [vmem:[#allocation55_spill] sm:$0xff] }
 0x2cd   : > { %8866 = vst [vmem:[#allocation27_spill] sm:$0xff] %v7216_v63  ;;  %v2084_v39 = vsel %vm1997_vm0, %v8868_v4, %v1709_v43  ;;  %v1702_v59 = vpop.permute.xlu0 %1701  ;;  %v3245_v23 = vrot.slane %v7182_v0, 4  ;;  %v3295_v18 = vrot.slane %v3266_v12, 4  ;;  %v3309_v11 = vrot.slane %v3258_v37, 4 }
 0x2ce   : > { %v3271_v45 = vrot.slane %v2084_v39, 4  ;;  %v3274_v32 = vsel %vm2127_vm1, %v2084_v39, %v3273_v42  ;;  %v2083_v57 = vsel %vm1997_vm0, %v8869_v61, %v1702_v59  ;;  %v3243_v7 = vrot.slane %v3230_v16, 4 }
 0x2cf   : > { %v3284_v35 = vsel %vm2127_vm1, %v3283_v56, %v2083_v57  ;;  %v3285_v33 = vrot.slane %v2083_v57, 4  ;;  %v3298_v4 = vsel %vm2127_vm1, %v3266_v12, %v3297_v49  ;;  %v7237_v13 = vsel %vm2127_vm1, %v3239_v21, %v3202_v9 }
 0x2d0   : > { %v3272_v43 = vsel %vm2127_vm1, %v3271_v45, %v7149_v48  ;;  %v3290_v24 = vperm.slane %v3284_v35, %v6083_v29  ;;  %v3282_v39 = vperm.slane %v3274_v32, %v6083_v29  ;;  %v3314_v56 = vperm.slane %v3308_v46, %v6148_v1  ;;  %v8874_v32 = vld [vmem:[#allocation58_spill] sm:$0xff] }
 0x2d1   : > { %v3278_v42 = vperm.slane %v3272_v43, %v6083_v29  ;;  %v3286_v37 = vsel %vm2127_vm1, %v7163_v2, %v3285_v33  ;;  %v3296_v48 = vsel %vm2127_vm1, %v3295_v18, %v3254_v54  ;;  %v3306_v9 = vperm.slane %v3298_v4, %v6148_v1  ;;  %v8875_v4 = vld [vmem:[#allocation48_spill] sm:$0xff] }
 0x2d2   : > { %v3294_v59 = vperm.slane %v3286_v37, %v6083_v29  ;;  %v3319_v61 = vrot.slane %v3290_v24, 4  ;;  %3941 = vrot.lane.b32.xlu1 %v7124_v28, %s5693_s5  ;;  %3943 = vrot.lane.b32.xlu2 %v7128_v30, %s5693_s5  ;;  %v7255_v2 = vsel %vm2127_vm1, %v3243_v7, %v7182_v0  ;;  %v3310_v46 = vsel %vm2127_vm1, %v3270_v60, %v3309_v11 }
 0x2d3   : > { %v3321_v12 = vrot.slane %v3278_v42, 4  ;;  %3939 = vrot.lane.b32.xlu0 %v7120_v5, %s5693_s5  ;;  %8870 = vst [vmem:[#allocation30_spill] sm:$0xff] %v7255_v2  ;;  %v7259_v49 = vsel %vm2127_vm1, %v3230_v16, %v3245_v23  ;;  %v8872_v54 = vrot.slane %v6855_v47, 4  ;;  %v8873_v5 = vrot.slane %v6925_v34, 4 }
 0x2d4   : > { %8871 = vst [vmem:[#allocation44_spill] sm:$0xff] %v7259_v49  ;;  %v3331_v28 = vrot.slane %v3294_v59, 4  ;;  %v7261_v21 = vpop.permute.xlu2 %1799  ;;  %v1730_v30 = vpop.permute.xlu1 %1729  ;;  %v3320_v0 = vsel %vm2127_vm1, %v3319_v61, %v3278_v42  ;;  %v3359_v11 = vrot.slane %v2088_v14, 4  ;;  %v3333_v60 = vrot.slane %v3282_v39, 4  ;;  %v8900_v49 = vld [vmem:[#allocation66_spill] sm:$0xff] }
 0x2d5   : > { %v2898_v18 = vsel %vm2127_vm1, %v6839_v17, %v8872_v54  ;;  %v3010_v7 = vsel %vm2127_vm1, %v6912_v25, %v8873_v5  ;;  %v3322_v16 = vsel %vm2127_vm1, %v3290_v24, %v3321_v12  ;;  %v1723_v23 = vpop.permute.xlu0 %1722  ;;  %v3326_v45 = vperm.slane %v3320_v0, %v6148_v1 }
 0x2d6   : > { %v2086_v47 = vsel %vm1997_vm0, %v8874_v32, %v1723_v23  ;;  %v3302_v57 = vperm.slane %v3296_v48, %v6148_v1  ;;  %v3330_v17 = vperm.slane %v3322_v16, %v6148_v1  ;;  %v3349_v34 = vrot.slane %v3306_v9, 4  ;;  %v8879_v32 = vld [vmem:[#allocation61_spill] sm:$0xff] }
 0x2d7   : > { %v3361_v35 = vrot.slane %v2086_v47, 4  ;;  %v3343_v33 = vrot.slane %v3326_v45, 4  ;;  %v3353_v25 = vrot.slane %v3314_v56, 4  ;;  %v3318_v43 = vperm.slane %v3310_v46, %v6148_v1 }
 0x2d8   : > { %v2087_v42 = vsel %vm1997_vm0, %v8875_v4, %v1730_v30  ;;  %v3347_v24 = vrot.slane %v3330_v17, 4  ;;  %v7282_v37 = vsel %vm2127_vm1, %v3330_v17, %v3349_v34  ;;  %v3332_v61 = vsel %vm2127_vm1, %v3331_v28, %v3282_v39 }
 0x2d9   : > { %v3362_v12 = vsel %vm2127_vm1, %v2088_v14, %v3361_v35  ;;  %v7287_v48 = vsel %vm2127_vm1, %v3343_v33, %v3302_v57  ;;  %v3338_v54 = vperm.slane %v3332_v61, %v6148_v1  ;;  %v3334_v5 = vsel %vm2127_vm1, %v3294_v59, %v3333_v60 }
 0x2da   : > { %v3360_v46 = vsel %vm2127_vm1, %v3359_v11, %v2086_v47  ;;  %3947 = vrot.lane.b32.xlu1 %v2898_v18, %s5693_s5  ;;  %3949 = vrot.lane.b32.xlu2 %v3010_v7, %s5693_s5  ;;  %v7295_v30 = vsel %vm2127_vm1, %v3347_v24, %v3306_v9  ;;  %v3342_v39 = vperm.slane %v3334_v5, %v6148_v1  ;;  %v3357_v0 = vrot.slane %v3318_v43, 4 }
 0x2db   : > { %3945 = vrot.lane.b32.xlu0 %v7133_v10, %s5693_s5  ;;  %v3351_v14 = vrot.slane %v3338_v54, 4  ;;  %v7301_v28 = vsel %vm2127_vm1, %v3338_v54, %v3353_v25  ;;  %v3370_v59 = vperm.slane %v3362_v12, %v6083_v29  ;;  %v3373_v7 = vrot.slane %v2087_v42, 4 }
 0x2dc   : > { %8876 = vst [vmem:[#allocation40_spill] sm:$0xff] %v7301_v28  ;;  %v7304_v11 = vpop.permute.xlu2 %1820  ;;  %v1751_v18 = vpop.permute.xlu1 %1750  ;;  %v3355_v60 = vrot.slane %v3342_v39, 4  ;;  %v3366_v9 = vperm.slane %v3360_v46, %v6083_v29  ;;  %v7311_v10 = vsel %vm2127_vm1, %v3342_v39, %v3357_v0  ;;  %v3121_v17 = vrot.slane %v7036_v38, 4 }
 0x2dd   : > { %v1744_v16 = vpop.permute.xlu0 %1743  ;;  %v7308_v23 = vsel %vm2127_vm1, %v3351_v14, %v3314_v56  ;;  %8878 = vst [vmem:[#allocation33_spill] sm:$0xff] %v7311_v10  ;;  %v3233_v25 = vrot.slane %v7207_v50, 4  ;;  %v3345_v4 = vrot.slane %v3302_v57, 4  ;;  %v8881_v56 = vld [vmem:[#allocation65_spill] sm:$0xff]  ;;  %v3421_v61 = vrot.slane %v3370_v59, 4  ;;  %v8882_v50 = vld [vmem:[#allocation51_spill] sm:$0xff] }
 0x2de   : > { %8877 = vst [vmem:[#allocation47_spill] sm:$0xff] %v7308_v23  ;;  %v2089_v47 = vsel %vm1997_vm0, %v8879_v32, %v1744_v16  ;;  %v7317_v34 = vsel %vm2127_vm1, %v3355_v60, %v3318_v43  ;;  %v2091_v24 = vsel %vm1997_vm0, %v8881_v56, %v7168_v20  ;;  %v3122_v54 = vsel %vm2127_vm1, %v7039_v8, %v3121_v17 }
 0x2df   : > { %8880 = vst [vmem:[#allocation43_spill] sm:$0xff] %v7317_v34  ;;  %v3371_v35 = vrot.slane %v2089_v47, 4  ;;  %v3374_v33 = vsel %vm2127_vm1, %v2089_v47, %v3373_v7  ;;  %v3409_v38 = vrot.slane %v3366_v9, 4  ;;  %v3234_v5 = vsel %vm2127_vm1, %v7189_v51, %v3233_v25  ;;  %v8883_v7 = vld [vmem:[#allocation54_spill] sm:$0xff]  ;;  %v8885_v25 = vld [vmem:[#allocation68_spill] sm:$0xff] }
 0x2e0   : > { %v3382_v12 = vperm.slane %v3374_v33, %v6083_v29  ;;  %v3346_v46 = vsel %vm2127_vm1, %v3326_v45, %v3345_v4  ;;  %v2090_v57 = vsel %vm1997_vm0, %v8882_v50, %v1751_v18  ;;  %v2094_v4 = vsel %vm1997_vm0, %v8885_v25, %v7213_v52 }
 0x2e1   : > { %v3372_v43 = vsel %vm2127_vm1, %v3371_v35, %v2087_v42  ;;  %v3397_v42 = vrot.slane %v2091_v24, 4  ;;  %v3385_v60 = vrot.slane %v2090_v57, 4  ;;  %v8884_v35 = vld [vmem:[#allocation64_spill] sm:$0xff]  ;;  %v3473_v50 = vrot.slane %v2094_v4, 4 }
 0x2e2   : > { %v3378_v39 = vperm.slane %v3372_v43, %v6083_v29  ;;  %v3419_v20 = vrot.slane %v3382_v12, 4  ;;  %3953 = vrot.lane.b32.xlu1 %v3234_v5, %s5693_s5  ;;  %3955 = vrot.lane.b32.xlu2 %v3346_v46, %s5693_s5  ;;  %v7337_v8 = vsel %vm2127_vm1, %v3382_v12, %v3421_v61 }
 0x2e3   : > { %3951 = vrot.lane.b32.xlu0 %v3122_v54, %s5693_s5 }
 0x2e4   : > { %v3407_v14 = vrot.slane %v3378_v39, 4  ;;  %v7340_v51 = vpop.permute.xlu2 %1841  ;;  %v1772_v45 = vpop.permute.xlu1 %1771  ;;  %v3410_v0 = vsel %vm2127_vm1, %v3378_v39, %v3409_v38  ;;  %v3420_v18 = vsel %vm2127_vm1, %v3419_v20, %v3370_v59  ;;  %v8886_v39 = vld [vmem:[#allocation71_spill] sm:$0xff] }
 0x2e5   : > { %v2093_v16 = vsel %vm1997_vm0, %v8883_v7, %v1772_v45  ;;  %v1765_v32 = vpop.permute.xlu0 %1764  ;;  %v2097_v52 = vsel %vm1997_vm0, %v8886_v39, %v7261_v21 }
 0x2e6   : > { %v3395_v47 = vrot.slane %v2093_v16, 4  ;;  %v3398_v17 = vsel %vm2127_vm1, %v2093_v16, %v3397_v42  ;;  %v2092_v33 = vsel %vm1997_vm0, %v8884_v35, %v1765_v32  ;;  %v3408_v38 = vsel %vm2127_vm1, %v3407_v14, %v3366_v9 }
 0x2e7   : > { %v3406_v56 = vperm.slane %v3398_v17, %v6083_v29  ;;  %v3383_v61 = vrot.slane %v2092_v33, 4  ;;  %v3386_v59 = vsel %vm2127_vm1, %v2092_v33, %v3385_v60  ;;  %v3414_v60 = vperm.slane %v3408_v38, %v6148_v1 }
 0x2e8   : > { %v3396_v12 = vsel %vm2127_vm1, %v3395_v47, %v2091_v24  ;;  %v3394_v54 = vperm.slane %v3386_v59, %v6083_v29  ;;  %v3418_v9 = vperm.slane %v3410_v0, %v6148_v1  ;;  %v8887_v47 = vld [vmem:[#allocation57_spill] sm:$0xff]  ;;  %v3483_v25 = vrot.slane %v2097_v52, 4  ;;  %v8888_v59 = vld [vmem:[#allocation67_spill] sm:$0xff] }
 0x2e9   : > { %v3402_v43 = vperm.slane %v3396_v12, %v6083_v29  ;;  %v3443_v5 = vrot.slane %v3406_v56, 4  ;;  %v3384_v46 = vsel %vm2127_vm1, %v3383_v61, %v2090_v57  ;;  %v3426_v57 = vperm.slane %v3420_v18, %v6148_v1 }
 0x2ea   : > { %v3390_v20 = vperm.slane %v3384_v46, %v6083_v29  ;;  %v3445_v42 = vrot.slane %v3394_v54, 4  ;;  %v3457_v38 = vrot.slane %v3414_v60, 4 }
 0x2eb   : > { %v3431_v45 = vrot.slane %v3402_v43, 4  ;;  %v3444_v24 = vsel %vm2127_vm1, %v3443_v5, %v3394_v54  ;;  %v3461_v5 = vrot.slane %v3418_v9, 4 }
 0x2ec   : > { %v3433_v14 = vrot.slane %v3390_v20, 4  ;;  %v7366_v7 = vpop.permute.xlu2 %1862  ;;  %v1793_v16 = vpop.permute.xlu1 %1792  ;;  %v3450_v32 = vperm.slane %v3444_v24, %v6148_v1  ;;  %v3446_v21 = vsel %vm2127_vm1, %v3406_v56, %v3445_v42  ;;  %v3465_v42 = vrot.slane %v3426_v57, 4 }
 0x2ed   : > { %v2096_v17 = vsel %vm1997_vm0, %v8887_v47, %v1793_v16  ;;  %v1786_v35 = vpop.permute.xlu0 %1785  ;;  %v3432_v33 = vsel %vm2127_vm1, %v3431_v45, %v3390_v20  ;;  %v3454_v24 = vperm.slane %v3446_v21, %v6148_v1 }
 0x2ee   : > { %v3471_v61 = vrot.slane %v2096_v17, 4  ;;  %v3474_v0 = vsel %vm2127_vm1, %v2096_v17, %v3473_v50  ;;  %v2095_v12 = vsel %vm1997_vm0, %v8888_v59, %v1786_v35  ;;  %v3438_v18 = vperm.slane %v3432_v33, %v6148_v1  ;;  %v8890_v59 = vld [vmem:[#allocation74_spill] sm:$0xff] }
 0x2ef   : > { %v3485_v54 = vrot.slane %v2095_v12, 4  ;;  %v3482_v56 = vperm.slane %v3474_v0, %v6083_v29  ;;  %v3434_v46 = vsel %vm2127_vm1, %v3402_v43, %v3433_v14  ;;  %v3463_v39 = vrot.slane %v3450_v32, 4 }
 0x2f0   : > { %v3484_v20 = vsel %vm2127_vm1, %v3483_v25, %v2095_v12  ;;  %v3458_v50 = vsel %vm2127_vm1, %v3438_v18, %v3457_v38  ;;  %v3472_v16 = vsel %vm2127_vm1, %v3471_v61, %v2094_v4  ;;  %v3455_v17 = vrot.slane %v3438_v18, 4 }
 0x2f1   : > { %v3486_v45 = vsel %vm2127_vm1, %v2097_v52, %v3485_v54  ;;  %3957 = vrot.lane.b32.xlu0 %v3458_v50, %s5693_s5  ;;  %v3442_v35 = vperm.slane %v3434_v46, %v6148_v1  ;;  %v7389_v43 = vsel %vm2127_vm1, %v3463_v39, %v3426_v57  ;;  %v7392_v14 = vsel %vm2127_vm1, %v3450_v32, %v3465_v42 }
 0x2f2   : > { %v3494_v47 = vperm.slane %v3486_v45, %v6083_v29  ;;  %8889 = vst [vmem:[#allocation50_spill] sm:$0xff] %v7392_v14  ;;  %v3430_v52 = vperm.slane %v7337_v8, %v6148_v1  ;;  %v3533_v33 = vrot.slane %v3482_v56, 4  ;;  %v7397_v61 = vsel %vm2127_vm1, %v3455_v17, %v3414_v60  ;;  %v8891_v8 = vld [vmem:[#allocation70_spill] sm:$0xff] }
 0x2f3   : > { %v7400_v0 = vsel %vm2127_vm1, %v3442_v35, %v3461_v5  ;;  %v2100_v57 = vsel %vm1997_vm0, %v8890_v59, %v7304_v11  ;;  %v3478_v32 = vperm.slane %v3472_v16, %v6083_v29  ;;  %v3490_v12 = vperm.slane %v3484_v20, %v6083_v29  ;;  %v8892_v20 = vld [vmem:[#allocation60_spill] sm:$0xff] }
 0x2f4   : > { %v3531_v21 = vrot.slane %v3494_v47, 4  ;;  %v1884_v25 = vpop.permute.xlu2 %1883  ;;  %v1814_v4 = vpop.permute.xlu1 %1813  ;;  %v3467_v38 = vrot.slane %v3454_v24, 4  ;;  %v3459_v39 = vrot.slane %v3442_v35, 4  ;;  %v3495_v60 = vrot.slane %v2100_v57, 4 }
 0x2f5   : > { %v1807_v54 = vpop.permute.xlu0 %1806  ;;  %v3534_v5 = vsel %vm2127_vm1, %v3494_v47, %v3533_v33  ;;  %v3469_v45 = vrot.slane %v3430_v52, 4  ;;  %v3521_v50 = vrot.slane %v3478_v32, 4  ;;  %v3519_v17 = vrot.slane %v3490_v12, 4 }
 0x2f6   : > { %v2098_v18 = vsel %vm1997_vm0, %v8891_v8, %v1807_v54  ;;  %v3532_v42 = vsel %vm2127_vm1, %v3531_v21, %v3482_v56  ;;  %v7413_v16 = vsel %vm2127_vm1, %v3459_v39, %v3418_v9  ;;  %v2099_v59 = vsel %vm1997_vm0, %v8892_v20, %v1814_v4  ;;  %v8895_v4 = vld [vmem:[#allocation73_spill] sm:$0xff] }
 0x2f7   : > { %v3497_v46 = vrot.slane %v2098_v18, 4  ;;  %v3496_v54 = vsel %vm2127_vm1, %v3495_v60, %v2098_v18  ;;  %v7419_v35 = vsel %vm2127_vm1, %v3467_v38, %v3430_v52  ;;  %v7422_v56 = vsel %vm2127_vm1, %v3454_v24, %v3469_v45  ;;  %v8896_v39 = vld [vmem:[#allocation77_spill] sm:$0xff] }
 0x2f8   : > { %8893 = vst [vmem:[#allocation46_spill] sm:$0xff] %v7419_v35  ;;  %v3502_v9 = vperm.slane %v3496_v54, %v6083_v29  ;;  %v3522_v52 = vsel %vm2127_vm1, %v3490_v12, %v3521_v50  ;;  %v2103_v60 = vsel %vm1997_vm0, %v8896_v39, %v7340_v51  ;;  %v8904_v35 = vld [vmem:[#allocation79_spill] sm:$0xff] }
 0x2f9   : > { %v3498_v11 = vsel %vm2127_vm1, %v2100_v57, %v3497_v46  ;;  %8894 = vst [vmem:[#allocation36_spill] sm:$0xff] %v7422_v56  ;;  %v3509_v57 = vrot.slane %v2099_v59, 4  ;;  %v3520_v46 = vsel %vm2127_vm1, %v3519_v17, %v3478_v32  ;;  %v7440_v17 = vperm.slane %v3522_v52, %v6148_v1 }
 0x2fa   : > { %v3506_v47 = vperm.slane %v3498_v11, %v6083_v29  ;;  %v3526_v20 = vperm.slane %v3520_v46, %v6148_v1  ;;  %v3545_v54 = vrot.slane %v3502_v9, 4  ;;  %v3597_v51 = vrot.slane %v2103_v60, 4  ;;  %v8899_v46 = vld [vmem:[#allocation83_spill] sm:$0xff] }
 0x2fb   : > { %v2109_v39 = vsel %vm1997_vm0, %v8899_v46, %v1884_v25  ;;  %v3573_v34 = vrot.slane %v7440_v17, 4  ;;  %v8901_v46 = vld [vmem:[#allocation76_spill] sm:$0xff] }
 0x2fc   : > { %v7425_v33 = vpop.permute.xlu2 %1904  ;;  %v1835_v21 = vpop.permute.xlu1 %1834  ;;  %v3557_v45 = vrot.slane %v3506_v47, 4  ;;  %v3569_v10 = vrot.slane %v3526_v20, 4 }
 0x2fd   : > { %v1828_v8 = vpop.permute.xlu0 %1827 }
 0x2fe   : > { %v2101_v18 = vsel %vm1997_vm0, %v8895_v4, %v1828_v8  ;;  %v8897_v8 = vld [vmem:[#allocation63_spill] sm:$0xff] }
 0x2ff   : > { %v3507_v38 = vrot.slane %v2101_v18, 4  ;;  %v3510_v24 = vsel %vm2127_vm1, %v2101_v18, %v3509_v57  ;;  %v2102_v12 = vsel %vm1997_vm0, %v8897_v8, %v1835_v21  ;;  %v8898_v18 = vld [vmem:[#allocation80_spill] sm:$0xff] }
 0x300   : > { %v3518_v11 = vperm.slane %v3510_v24, %v6083_v29  ;;  %v2106_v24 = vsel %vm1997_vm0, %v8898_v18, %v7366_v7  ;;  %v3585_v8 = vrot.slane %v2102_v12, 4  ;;  %v3538_v7 = vperm.slane %v3532_v42, %v6148_v1 }
 0x301   : > { %v3508_v32 = vsel %vm2127_vm1, %v3507_v38, %v2099_v59 }
 0x302   : > { %v3514_v50 = vperm.slane %v3508_v32, %v6083_v29  ;;  %v3555_v57 = vrot.slane %v3518_v11, 4  ;;  %v3558_v4 = vsel %vm2127_vm1, %v3518_v11, %v3557_v45 }
 0x304   : > { %v3543_v59 = vrot.slane %v3514_v50, 4  ;;  %v7451_v38 = vpop.permute.xlu2 %1925  ;;  %v1856_v52 = vpop.permute.xlu1 %1855  ;;  %v3546_v21 = vsel %vm2127_vm1, %v3514_v50, %v3545_v54  ;;  %v3556_v32 = vsel %vm2127_vm1, %v3555_v57, %v3506_v47 }
 0x305   : > { %v2105_v45 = vsel %vm1997_vm0, %v8900_v49, %v1856_v52  ;;  %v1849_v11 = vpop.permute.xlu0 %1848  ;;  %v7463_v2 = vperm.slane %v3546_v21, %v6148_v1  ;;  %v3562_v52 = vperm.slane %v3556_v32, %v6148_v1  ;;  %v3577_v32 = vrot.slane %v3538_v7, 4 }
 0x306   : > { %v3595_v18 = vrot.slane %v2105_v45, 4  ;;  %v3598_v25 = vsel %vm2127_vm1, %v2105_v45, %v3597_v51  ;;  %v2104_v56 = vsel %vm1997_vm0, %v8901_v46, %v1849_v11  ;;  %v3544_v49 = vsel %vm2127_vm1, %v3543_v59, %v3502_v9 }
 0x307   : > { %v3606_v47 = vperm.slane %v3598_v25, %v6083_v29  ;;  %v3583_v54 = vrot.slane %v2104_v56, 4  ;;  %v3586_v50 = vsel %vm2127_vm1, %v2104_v56, %v3585_v8  ;;  %v3550_v42 = vperm.slane %v3544_v49, %v6148_v1 }
 0x308   : > { %v3596_v57 = vsel %vm2127_vm1, %v3595_v18, %v2103_v60  ;;  %v7472_v51 = vperm.slane %v3534_v5, %v6148_v1  ;;  %v3594_v25 = vperm.slane %v3586_v50, %v6083_v29  ;;  %v7483_v5 = vsel %vm2127_vm1, %v7463_v2, %v3573_v34 }
 0x309   : > { %v3602_v45 = vperm.slane %v3596_v57, %v6083_v29  ;;  %v3643_v21 = vrot.slane %v3606_v47, 4  ;;  %v3584_v11 = vsel %vm2127_vm1, %v3583_v54, %v2102_v12  ;;  %v3570_v9 = vsel %vm2127_vm1, %v3550_v42, %v3569_v10  ;;  %v8902_v10 = vld [vmem:[#allocation69_spill] sm:$0xff] }
 0x30a   : > { %v3590_v56 = vperm.slane %v3584_v11, %v6083_v29  ;;  %v3567_v59 = vrot.slane %v3550_v42, 4  ;;  %3959 = vrot.lane.b32.xlu1 %v3570_v9, %s5693_s5  ;;  %v3609_v18 = vrot.slane %v2106_v24, 4  ;;  %v3619_v46 = vrot.slane %v2109_v39, 4 }
 0x30b   : > { %v3631_v60 = vrot.slane %v3602_v45, 4  ;;  %v3644_v8 = vsel %vm2127_vm1, %v3643_v21, %v3594_v25  ;;  %v3575_v21 = vrot.slane %v3562_v52, 4  ;;  %v7493_v11 = vsel %vm2127_vm1, %v3562_v52, %v3577_v32 }
 0x30c   : > { %v3633_v12 = vrot.slane %v3590_v56, 4  ;;  %v7485_v54 = vpop.permute.xlu2 %1946  ;;  %v1877_v50 = vpop.permute.xlu1 %1876  ;;  %v7488_v49 = vsel %vm2127_vm1, %v3567_v59, %v3526_v20  ;;  %8903 = vst [vmem:[#allocation53_spill] sm:$0xff] %v7493_v11  ;;  %v3581_v34 = vrot.slane %v7472_v51, 4  ;;  %v3645_v20 = vrot.slane %v3594_v25, 4 }
 0x30d   : > { %v2108_v57 = vsel %vm1997_vm0, %v8902_v10, %v1877_v50  ;;  %v1870_v42 = vpop.permute.xlu0 %1869  ;;  %v3632_v63 = vsel %vm2127_vm1, %v3631_v60, %v3590_v56  ;;  %v3566_v50 = vperm.slane %v3558_v4, %v6148_v1  ;;  %v8905_v10 = vld [vmem:[#allocation86_spill] sm:$0xff] }
 0x30e   : > { %v3607_v9 = vrot.slane %v2108_v57, 4  ;;  %v3610_v28 = vsel %vm2127_vm1, %v2108_v57, %v3609_v18  ;;  %v2107_v62 = vsel %vm1997_vm0, %v8904_v35, %v1870_v42  ;;  %v2112_v52 = vsel %vm1997_vm0, %v8905_v10, %v7425_v33 }
 0x30f   : > { %v3620_v59 = vsel %vm2127_vm1, %v3619_v46, %v2107_v62  ;;  %v3621_v23 = vrot.slane %v2107_v62, 4  ;;  %v3634_v18 = vsel %vm2127_vm1, %v3602_v45, %v3633_v12  ;;  %v3618_v56 = vperm.slane %v3610_v28, %v6083_v29 }
 0x310   : > { %v3608_v32 = vsel %vm2127_vm1, %v3607_v9, %v2106_v24  ;;  %v3626_v14 = vperm.slane %v3620_v59, %v6083_v29  ;;  %v3638_v62 = vperm.slane %v3632_v63, %v6148_v1  ;;  %v3642_v46 = vperm.slane %v3634_v18, %v6148_v1 }
 0x311   : > { %v3614_v35 = vperm.slane %v3608_v32, %v6083_v29  ;;  %v3622_v25 = vsel %vm2127_vm1, %v2109_v39, %v3621_v23  ;;  %v7515_v33 = vsel %vm2127_vm1, %v3575_v21, %v3538_v7  ;;  %v3650_v57 = vperm.slane %v3644_v8, %v6148_v1  ;;  %v8907_v32 = vld [vmem:[#allocation82_spill] sm:$0xff] }
 0x312   : > { %v3630_v4 = vperm.slane %v3622_v25, %v6083_v29  ;;  %v3655_v60 = vrot.slane %v3626_v14, 4  ;;  %v3646_v45 = vsel %vm2127_vm1, %v3606_v47, %v3645_v20  ;;  %v7520_v12 = vsel %vm2127_vm1, %v3566_v50, %v3581_v34 }
 0x313   : > { %v3657_v24 = vrot.slane %v3614_v35, 4  ;;  %8906 = vst [vmem:[#allocation49_spill] sm:$0xff] %v7520_v12  ;;  %v3695_v28 = vrot.slane %v2112_v52, 4  ;;  %v3681_v21 = vrot.slane %v3638_v62, 4  ;;  %v3579_v10 = vrot.slane %v3566_v50, 4 }
 0x314   : > { %v3667_v23 = vrot.slane %v3630_v4, 4  ;;  %v7522_v39 = vpop.permute.xlu2 %1967  ;;  %v1898_v63 = vpop.permute.xlu1 %1897  ;;  %v3656_v42 = vsel %vm2127_vm1, %v3655_v60, %v3614_v35  ;;  %v3669_v8 = vrot.slane %v3618_v56, 4  ;;  %v3685_v20 = vrot.slane %v3642_v46, 4 }
 0x315   : > { %v3658_v9 = vsel %vm2127_vm1, %v3626_v14, %v3657_v24  ;;  %v1891_v59 = vpop.permute.xlu0 %1890  ;;  %v3662_v7 = vperm.slane %v3656_v42, %v6148_v1  ;;  %v3689_v11 = vrot.slane %v3650_v57, 4  ;;  %v3654_v50 = vperm.slane %v3646_v45, %v6148_v1 }
 0x316   : > { %v2110_v47 = vsel %vm1997_vm0, %v8907_v32, %v1891_v59  ;;  %v3666_v34 = vperm.slane %v3658_v9, %v6148_v1  ;;  %v3668_v35 = vsel %vm2127_vm1, %v3667_v23, %v3618_v56  ;;  %v7544_v59 = vsel %vm2127_vm1, %v3579_v10, %v7472_v51 }
 0x317   : > { %v3697_v18 = vrot.slane %v2110_v47, 4  ;;  %v3682_v25 = vsel %vm2127_vm1, %v3662_v7, %v3681_v21  ;;  %v3679_v12 = vrot.slane %v3662_v7, 4  ;;  %v3674_v9 = vperm.slane %v3668_v35, %v6148_v1  ;;  %v8908_v7 = vld [vmem:[#allocation72_spill] sm:$0xff] }
 0x318   : > { %3961 = vrot.lane.b32.xlu2 %v3682_v25, %s5693_s5  ;;  %v3683_v14 = vrot.slane %v3666_v34, 4  ;;  %v7534_v60 = vsel %vm2127_vm1, %v3666_v34, %v3685_v20  ;;  %v2111_v21 = vsel %vm1997_vm0, %v8908_v7, %v1898_v63  ;;  %v3696_v56 = vsel %vm2127_vm1, %v3695_v28, %v2110_v47 }
 0x319   : > { %v3698_v24 = vsel %vm2127_vm1, %v2112_v52, %v3697_v18  ;;  %v7539_v42 = vsel %vm2127_vm1, %v3679_v12, %v3638_v62  ;;  %v3670_v45 = vsel %vm2127_vm1, %v3630_v4, %v3669_v8  ;;  %v7554_v52 = vsel %vm2127_vm1, %v3674_v9, %v3689_v11  ;;  %v8909_v8 = vld [vmem:[#allocation85_spill] sm:$0xff] }
 0x31a   : > { %v7550_v23 = vsel %vm2127_vm1, %v3683_v14, %v3642_v46  ;;  %v3687_v62 = vrot.slane %v3674_v9, 4  ;;  %v3678_v12 = vperm.slane %v3670_v45, %v6148_v1  ;;  %v3706_v32 = vperm.slane %v3698_v24, %v6083_v29  ;;  %v8912_v45 = vld [vmem:[#allocation75_spill] sm:$0xff] }
 0x31b   : > { %v3693_v34 = vrot.slane %v3654_v50, 4  ;;  %v3709_v63 = vrot.slane %v2111_v21, 4  ;;  %v3702_v28 = vperm.slane %v3696_v56, %v6083_v29 }
 0x31c   : > { %v7558_v51 = vpop.permute.xlu2 %1988  ;;  %v1919_v10 = vpop.permute.xlu1 %1918  ;;  %v7562_v46 = vsel %vm2127_vm1, %v3687_v62, %v3650_v57  ;;  %v3691_v4 = vrot.slane %v3678_v12, 4  ;;  %v3757_v35 = vrot.slane %v3706_v32, 4  ;;  %v8911_v57 = vld [vmem:[#allocation88_spill] sm:$0xff] }
 0x31d   : > { %v1912_v47 = vpop.permute.xlu0 %1911  ;;  %v7567_v20 = vsel %vm2127_vm1, %v3678_v12, %v3693_v34  ;;  %v2115_v9 = vsel %vm1997_vm0, %v8911_v57, %v7451_v38  ;;  %v3745_v7 = vrot.slane %v3702_v28, 4  ;;  %v2114_v62 = vsel %vm1997_vm0, %v8912_v45, %v1919_v10 }
 0x31e   : > { %v2113_v11 = vsel %vm1997_vm0, %v8909_v8, %v1912_v47  ;;  %8910 = vst [vmem:[#allocation56_spill] sm:$0xff] %v7567_v20  ;;  %v7571_v14 = vsel %vm2127_vm1, %v3691_v4, %v3654_v50 }
 0x31f   : > { %v3707_v18 = vrot.slane %v2113_v11, 4  ;;  %v3710_v25 = vsel %vm2127_vm1, %v2113_v11, %v3709_v63  ;;  %v3733_v63 = vrot.slane %v2115_v9, 4  ;;  %v3721_v11 = vrot.slane %v2114_v62, 4 }
 0x320   : > { %v3718_v24 = vperm.slane %v3710_v25, %v6083_v29  ;;  %3999 = vrot.lane.b32.xlu2 %v6198_v26, %s5694_s14 }
 0x321   : > { %v3708_v56 = vsel %vm2127_vm1, %v3707_v18, %v2111_v21  ;;  %v8913_v21 = vld [vmem:[#allocation78_spill] sm:$0xff] }
 0x322   : > { %v3714_v50 = vperm.slane %v3708_v56, %v6083_v29  ;;  %v3755_v12 = vrot.slane %v3718_v24, 4  ;;  %v7584_v34 = vsel %vm2127_vm1, %v3718_v24, %v3757_v35  ;;  %v8914_v24 = vld [vmem:[#allocation87_spill] sm:$0xff] }
 0x324   : > { %v3743_v47 = vrot.slane %v3714_v50, 4  ;;  %v1940_v26 = vpop.permute.xlu1 %1939  ;;  %v3938_v4 = vpop.permute.xlu2 %3937  ;;  %v3746_v8 = vsel %vm2127_vm1, %v3714_v50, %v3745_v7  ;;  %v3756_v38 = vsel %vm2127_vm1, %v3755_v12, %v3706_v32  ;;  %v8915_v12 = vld [vmem:[#allocation90_spill] sm:$0xff] }
 0x325   : > { %v2117_v18 = vsel %vm1997_vm0, %v8913_v21, %v1940_v26  ;;  %v7592_v10 = vsel %vm4367_vm2, %v6279_v53, %v3938_v4  ;;  %v1933_v25 = vpop.permute.xlu0 %1932  ;;  %v2118_v26 = vsel %vm1997_vm0, %v8915_v12, %v7485_v54  ;;  %v8917_v12 = vld [vmem:[#allocation81_spill] sm:$0xff] }
 0x326   : > { %v3731_v57 = vrot.slane %v2117_v18, 4  ;;  %v3734_v35 = vsel %vm2127_vm1, %v2117_v18, %v3733_v63  ;;  %v2116_v56 = vsel %vm1997_vm0, %v8914_v24, %v1933_v25  ;;  %v3744_v50 = vsel %vm2127_vm1, %v3743_v47, %v3702_v28 }
 0x327   : > { %v3742_v45 = vperm.slane %v3734_v35, %v6083_v29  ;;  %v3719_v7 = vrot.slane %v2116_v56, 4  ;;  %v3722_v32 = vsel %vm2127_vm1, %v2116_v56, %v3721_v11  ;;  %v3750_v28 = vperm.slane %v3744_v50, %v6148_v1 }
 0x328   : > { %v3732_v53 = vsel %vm2127_vm1, %v3731_v57, %v2115_v9  ;;  %v3730_v4 = vperm.slane %v3722_v32, %v6083_v29  ;;  %4005 = vrot.lane.b32.xlu2 %v6523_v40, %s5694_s14  ;;  %v3809_v47 = vrot.slane %v2118_v26, 4  ;;  %v3754_v9 = vperm.slane %v3746_v8, %v6148_v1  ;;  %v8916_v57 = vld [vmem:[#allocation92_spill] sm:$0xff] }
 0x329   : > { %v3738_v63 = vperm.slane %v3732_v53, %v6083_v29  ;;  %v3779_v21 = vrot.slane %v3742_v45, 4  ;;  %v3720_v18 = vsel %vm2127_vm1, %v3719_v7, %v2114_v62  ;;  %v2121_v40 = vsel %vm1997_vm0, %v8916_v57, %v7522_v39 }
 0x32a   : > { %v3726_v11 = vperm.slane %v3720_v18, %v6083_v29  ;;  %v3781_v25 = vrot.slane %v3730_v4, 4  ;;  %v3762_v62 = vperm.slane %v3756_v38, %v6148_v1  ;;  %v8918_v18 = vld [vmem:[#allocation89_spill] sm:$0xff] }
 0x32b   : > { %v3767_v35 = vrot.slane %v3738_v63, 4  ;;  %v3780_v54 = vsel %vm2127_vm1, %v3779_v21, %v3730_v4 }
 0x32c   : > { %v3769_v24 = vrot.slane %v3726_v11, 4  ;;  %v1961_v56 = vpop.permute.xlu1 %1960  ;;  %v3944_v32 = vpop.permute.xlu2 %3943  ;;  %v3782_v7 = vsel %vm2127_vm1, %v3742_v45, %v3781_v25  ;;  %v3786_v21 = vperm.slane %v3780_v54, %v6148_v1  ;;  %v3793_v45 = vrot.slane %v3750_v28, 4 }
 0x32d   : > { %v2120_v50 = vsel %vm1997_vm0, %v8917_v12, %v1961_v56  ;;  %v7622_v53 = vsel %vm4367_vm2, %v6608_v44, %v3944_v32  ;;  %v1954_v4 = vpop.permute.xlu0 %1953  ;;  %v3768_v8 = vsel %vm2127_vm1, %v3767_v35, %v3726_v11  ;;  %v3819_v25 = vrot.slane %v2121_v40, 4 }
 0x32e   : > { %v3810_v39 = vsel %vm2127_vm1, %v2120_v50, %v3809_v47  ;;  %v2119_v57 = vsel %vm1997_vm0, %v8918_v18, %v1954_v4  ;;  %v3774_v38 = vperm.slane %v3768_v8, %v6148_v1  ;;  %v3770_v56 = vsel %vm2127_vm1, %v3738_v63, %v3769_v24 }
 0x32f   : > { %v3821_v20 = vrot.slane %v2119_v57, 4  ;;  %v3797_v12 = vrot.slane %v3754_v9, 4  ;;  %v3778_v11 = vperm.slane %v3770_v56, %v6148_v1  ;;  %v3801_v35 = vrot.slane %v3762_v62, 4 }
 0x330   : > { %4011 = vrot.lane.b32.xlu2 %v6858_v58, %s5694_s14  ;;  %v3794_v44 = vsel %vm2127_vm1, %v3774_v38, %v3793_v45  ;;  %v3790_v47 = vperm.slane %v3782_v7, %v6148_v1  ;;  %v3807_v54 = vrot.slane %v2120_v50, 4  ;;  %v3818_v32 = vperm.slane %v3810_v39, %v6083_v29 }
 0x331   : > { %v3822_v4 = vsel %vm2127_vm1, %v2121_v40, %v3821_v20  ;;  %3963 = vrot.lane.b32.xlu0 %v3794_v44, %s5693_s5  ;;  %v3799_v8 = vrot.slane %v3786_v21, 4  ;;  %v7641_v24 = vsel %vm2127_vm1, %v3778_v11, %v3797_v12  ;;  %v3795_v58 = vrot.slane %v3778_v11, 4 }
 0x332   : > { %v3830_v63 = vperm.slane %v3822_v4, %v6083_v29  ;;  %v3820_v18 = vsel %vm2127_vm1, %v3819_v25, %v2119_v57  ;;  %v7648_v7 = vsel %vm2127_vm1, %v3786_v21, %v3801_v35  ;;  %v3766_v20 = vperm.slane %v7584_v34, %v6148_v1  ;;  %v8919_v25 = vld [vmem:[#allocation94_spill] sm:$0xff]  ;;  %v8920_v35 = vld [vmem:[#allocation91_spill] sm:$0xff] }
 0x333   : > { %v7645_v45 = vsel %vm2127_vm1, %v3799_v8, %v3762_v62  ;;  %v7653_v56 = vsel %vm2127_vm1, %v3795_v58, %v3754_v9  ;;  %v3791_v12 = vrot.slane %v3774_v38, 4  ;;  %v3803_v44 = vrot.slane %v3790_v47, 4 }
 0x334   : > { %v3867_v40 = vrot.slane %v3830_v63, 4  ;;  %v1982_v50 = vpop.permute.xlu1 %1981  ;;  %v3950_v39 = vpop.permute.xlu2 %3949  ;;  %v3808_v11 = vsel %vm2127_vm1, %v3807_v54, %v2118_v26  ;;  %v3869_v57 = vrot.slane %v3818_v32, 4  ;;  %v2124_v34 = vsel %vm1997_vm0, %v8919_v25, %v7558_v51 }
 0x335   : > { %v7658_v62 = vsel %vm4367_vm2, %v6935_v19, %v3950_v39  ;;  %v1975_v21 = vpop.permute.xlu0 %1974  ;;  %v3826_v38 = vperm.slane %v3820_v18, %v6083_v29  ;;  %v3805_v58 = vrot.slane %v3766_v20, 4  ;;  %v3814_v26 = vperm.slane %v3808_v11, %v6083_v29 }
 0x336   : > { %v2122_v4 = vsel %vm1997_vm0, %v8920_v35, %v1975_v21  ;;  %v3868_v9 = vsel %vm2127_vm1, %v3867_v40, %v3818_v32  ;;  %v7671_v19 = vsel %vm2127_vm1, %v3791_v12, %v3750_v28  ;;  %v7674_v54 = vsel %vm2127_vm1, %v3803_v44, %v3766_v20  ;;  %v8921_v40 = vld [vmem:[#allocation84_spill] sm:$0xff] }
 0x337   : > { %v3833_v8 = vrot.slane %v2122_v4, 4  ;;  %v3831_v51 = vrot.slane %v2124_v34, 4  ;;  %v3870_v32 = vsel %vm2127_vm1, %v3830_v63, %v3869_v57  ;;  %v7681_v18 = vsel %vm2127_vm1, %v3790_v47, %v3805_v58  ;;  %v8922_v57 = vld [vmem:[#allocation93_spill] sm:$0xff] }
 0x338   : > { %4017 = vrot.lane.b32.xlu2 %v7204_v31, %s5694_s14  ;;  %v2123_v31 = vsel %vm1997_vm0, %v8921_v40, %v1982_v50  ;;  %v3855_v11 = vrot.slane %v3826_v38, 4  ;;  %v3571_v20 = vrot.slane %v7463_v2, 4  ;;  %v3857_v12 = vrot.slane %v3814_v26, 4 }
 0x339   : > { %v3834_v39 = vsel %vm2127_vm1, %v2124_v34, %v3833_v8  ;;  %4001 = vrot.lane.b32.xlu0 %v6282_v41, %s5694_s14  ;;  %v3832_v28 = vsel %vm2127_vm1, %v3831_v51, %v2122_v4  ;;  %v3845_v34 = vrot.slane %v2123_v31, 4 }
 0x33a   : > { %v3842_v44 = vperm.slane %v3834_v39, %v6083_v29  ;;  %v3838_v50 = vperm.slane %v3832_v28, %v6083_v29  ;;  %v3572_v8 = vsel %vm2127_vm1, %v3571_v20, %v7440_v17  ;;  %v3856_v58 = vsel %vm2127_vm1, %v3855_v11, %v3814_v26 }
 0x33b   : > { %v3878_v39 = vperm.slane %v3870_v32, %v6148_v1  ;;  %v3874_v28 = vperm.slane %v3868_v9, %v6148_v1 }
 0x33c   : > { %v3936_v21 = vpop.permute.xlu1 %3935  ;;  %v3956_v25 = vpop.permute.xlu2 %3955 }
 0x33d   : > { %v7690_v41 = vsel %vm4367_vm2, %v6213_v22, %v3936_v21  ;;  %v7694_v47 = vsel %vm4367_vm2, %v7287_v48, %v3956_v25  ;;  %v1996_v63 = vpop.permute.xlu0 %1995  ;;  %v3893_v22 = vrot.slane %v3842_v44, 4  ;;  %v3858_v48 = vsel %vm2127_vm1, %v3826_v38, %v3857_v12 }
 0x33e   : > { %v2125_v2 = vsel %vm1997_vm0, %v8922_v57, %v1996_v63  ;;  %v3881_v21 = vrot.slane %v3838_v50, 4  ;;  %v7714_v20 = vperm.slane %v3858_v48, %v6148_v1  ;;  %v3862_v38 = vperm.slane %v3856_v58, %v6148_v1 }
 0x33f   : > { %v3843_v35 = vrot.slane %v2125_v2, 4  ;;  %v3846_v4 = vsel %vm2127_vm1, %v2125_v2, %v3845_v34  ;;  %v3917_v9 = vrot.slane %v3878_v39, 4  ;;  %v3913_v58 = vrot.slane %v3874_v28, 4 }
 0x340   : > { %v3854_v51 = vperm.slane %v3846_v4, %v6083_v29  ;;  %4023 = vrot.lane.b32.xlu2 %v3572_v8, %s5694_s14  ;;  %vm5367_vm0 = vcmask 916480  }
 0x341   : > { %v3844_v40 = vsel %vm2127_vm1, %v3843_v35, %v2123_v31  ;;  %4007 = vrot.lane.b32.xlu0 %v6611_v15, %s5694_s14  ;;  %v8923_v35 = vld [vmem:[#allocation107_spill] sm:$0xff] }
 0x342   : > { %v3850_v17 = vperm.slane %v3844_v40, %v6083_v29  ;;  %v3891_v26 = vrot.slane %v3854_v51, 4  ;;  %v3894_v11 = vsel %vm2127_vm1, %v3854_v51, %v3893_v22  ;;  %v3905_v51 = vrot.slane %v3862_v38, 4 }
 0x343   : > { %v3902_v32 = vperm.slane %v3894_v11, %v6148_v1 }
 0x344   : > { %v3879_v12 = vrot.slane %v3850_v17, 4  ;;  %v3942_v31 = vpop.permute.xlu1 %3941  ;;  %v3882_v25 = vsel %vm2127_vm1, %v3850_v17, %v3881_v21  ;;  %v3892_v15 = vsel %vm2127_vm1, %v3891_v26, %v3842_v44  ;;  %v8924_v17 = vld [vmem:[#allocation29_spill] sm:$0xff] }
 0x345   : > { %v7722_v29 = vsel %vm4367_vm2, %v6541_v55, %v3942_v31  ;;  %v3940_v34 = vpop.permute.xlu0 %3939  ;;  %v7725_v63 = vperm.slane %v3882_v25, %v6148_v1  ;;  %v3898_v57 = vperm.slane %v3892_v15, %v6148_v1  ;;  %v3915_v2 = vrot.slane %v3902_v32, 4  ;;  %v8925_v31 = vld [vmem:[#allocation22_spill] sm:$0xff] }
 0x346   : > { %v7730_v4 = vsel %vm4367_vm2, %v8923_v35, %v3940_v34  ;;  %v3880_v8 = vsel %vm2127_vm1, %v3879_v12, %v3838_v50  ;;  %v7734_v44 = vsel %vm2127_vm1, %v3902_v32, %v3917_v9  ;;  %v8926_v9 = vld [vmem:[#allocation16_spill] sm:$0xff] }
 0x347   : > { %v3907_v55 = vrot.slane %v7725_v63, 4  ;;  %v3886_v22 = vperm.slane %v3880_v8, %v6148_v1  ;;  %v3911_v48 = vrot.slane %v3898_v57, 4  ;;  %v7739_v40 = vsel %vm2127_vm1, %v3898_v57, %v3913_v58  ;;  %v8928_v57 = vld [vmem:[#allocation109_spill] sm:$0xff]  ;;  %v8930_v58 = vld [vmem:[#allocation23_spill] sm:$0xff] }
 0x348   : > { %v7742_v21 = vsel %vm2127_vm1, %v3915_v2, %v3878_v39 }
 0x349   : > { %4013 = vrot.lane.b32.xlu0 %v8924_v17, %s5694_s14  ;;  %v3908_v50 = vsel %vm2127_vm1, %v3907_v55, %v7714_v20  ;;  %v3906_v26 = vsel %vm2127_vm1, %v3886_v22, %v3905_v51  ;;  %v7750_v11 = vsel %vm2127_vm1, %v3911_v48, %v3874_v28  ;;  %v3903_v32 = vrot.slane %v3886_v22, 4  ;;  %v8927_v28 = vld [vmem:[#allocation108_spill] sm:$0xff]  ;;  %v8931_v55 = vld [vmem:[#allocation95_spill] sm:$0xff]  ;;  %v8934_v51 = vld [vmem:[#allocation26_spill] sm:$0xff] }
 0x34a   : > { %4029 = vrot.lane.b32.xlu2 %v3908_v50, %s5694_s14  ;;  %3965 = vrot.lane.b32.xlu1 %v3906_v26, %s5693_s5  ;;  %v8932_v22 = vld [vmem:[#allocation24_spill] sm:$0xff]  ;;  %v8937_v17 = vld [vmem:[#allocation6_spill] sm:$0xff]  ;;  %v8938_v50 = vld [vmem:[#allocation9_spill] sm:$0xff]  ;;  %s156_s5 = scalar_lea.vmem [#allocation2], %s5494_s4 }
 0x34b   : > { %v7755_v12 = vsel %vm2127_vm1, %v3903_v32, %v3862_v38 }
 0x34c   : > { %v3948_v39 = vpop.permute.xlu1 %3947 }
 0x34d   : > { %v4374_v25 = vsel %vm4367_vm2, %v8925_v31, %v3948_v39  ;;  %v3946_v15 = vpop.permute.xlu0 %3945 }
 0x34e   : > { %v7761_v34 = vsel %vm4367_vm2, %v8926_v9, %v3946_v15 }
 0x351   : > { %4019 = vrot.lane.b32.xlu0 %v7295_v30, %s5694_s14  ;;  %v8929_v30 = vld [vmem:[#allocation20_spill] sm:$0xff] }
 0x352   : > { %4067 = vrot.lane.b32.xlu2 %v8927_v28, %s5695_s15  ;;  %4003 = vrot.lane.b32.xlu1 %v8928_v57, %s5694_s14 }
 0x354   : > { %v3954_v38 = vpop.permute.xlu1 %3953 }
 0x355   : > { %v4377_v2 = vsel %vm4367_vm2, %v7225_v3, %v3954_v38  ;;  %v3952_v35 = vpop.permute.xlu0 %3951  ;;  %v8945_v38 = vld [vmem:[#allocation12_spill] sm:$0xff] }
 0x356   : > { %v7773_v8 = vsel %vm4367_vm2, %v7067_v27, %v3952_v35 }
 0x359   : > { %4025 = vrot.lane.b32.xlu0 %v7550_v23, %s5694_s14  ;;  %v8933_v23 = vld [vmem:[#allocation112_spill] sm:$0xff] }
 0x35a   : > { %4073 = vrot.lane.b32.xlu2 %v8929_v30, %s5695_s15  ;;  %4009 = vrot.lane.b32.xlu1 %v8930_v58, %s5694_s14 }
 0x361   : > { %4063 = vrot.lane.b32.xlu0 %v8931_v55, %s5695_s15 }
 0x362   : > { %4079 = vrot.lane.b32.xlu2 %v8932_v22, %s5695_s15  ;;  %4015 = vrot.lane.b32.xlu1 %v7094_v6, %s5694_s14 }
 0x363   : > { %v3958_v27 = vpop.permute.xlu0 %3957 }
 0x364   : > { %v7789_v3 = vsel %vm4367_vm2, %v7397_v61, %v3958_v27 }
 0x369   : > { %4069 = vrot.lane.b32.xlu0 %v8933_v23, %s5695_s15 }
 0x36a   : > { %4085 = vrot.lane.b32.xlu2 %v7400_v0, %s5695_s15  ;;  %4021 = vrot.lane.b32.xlu1 %v7413_v16, %s5694_s14  ;;  %v8935_v0 = vld [vmem:[#allocation100_spill] sm:$0xff]  ;;  %v8936_v16 = vld [vmem:[#allocation98_spill] sm:$0xff] }
 0x371   : > { %4075 = vrot.lane.b32.xlu0 %v8934_v51, %s5695_s15 }
 0x372   : > { %v3962_v48 = vpop.permute.xlu2 %3961  ;;  %4091 = vrot.lane.b32.xlu2 %v7641_v24, %s5695_s15  ;;  %4027 = vrot.lane.b32.xlu1 %v7653_v56, %s5694_s14  ;;  %s5500_s14 = sshll.u32 %s5673_s9, 1  ;;  %s5396_s9 = sshll.u32 %s156_s5, 4  ;;  %s5397_s9 = int_to_ptr.vmem [resolvable:$true] %s5396_s9 }
 0x373   : > { %v7805_v6 = vsel %vm4367_vm2, %v7539_v42, %v3962_v48 }
 0x379   : > { %4081 = vrot.lane.b32.xlu0 %v7195_v36, %s5695_s15 }
 0x37a   : > { %v4000_v61 = vpop.permute.xlu2 %3999  ;;  %4129 = vrot.lane.b32.xlu2 %v8935_v0, %s5696_s18  ;;  %4065 = vrot.lane.b32.xlu1 %v8936_v16, %s5695_s15  ;;  %v8952_v16 = vld [vmem:[#allocation47_spill] sm:$0xff] }
 0x37b   : > { %v7815_v24 = vsel %vm4384_vm3, %v7690_v41, %v4000_v61  ;;  %v3909_v41 = vrot.slane %v7714_v20, 4 }
 0x37c   : > { %v3960_v56 = vpop.permute.xlu1 %3959 }
 0x37d   : > { %v4380_v42 = vsel %vm4367_vm2, %v7488_v49, %v3960_v56  ;;  %v3910_v32 = vsel %vm2127_vm1, %v7725_v63, %v3909_v41  ;;  %v8941_v63 = vld [vmem:[#allocation7_spill] sm:$0xff] }
 0x381   : > { %4087 = vrot.lane.b32.xlu0 %v7483_v5, %s5695_s15  ;;  %v8939_v5 = vld [vmem:[#allocation32_spill] sm:$0xff] }
 0x382   : > { %v4006_v36 = vpop.permute.xlu2 %4005  ;;  %4135 = vrot.lane.b32.xlu2 %v8937_v17, %s5696_s18  ;;  %4071 = vrot.lane.b32.xlu1 %v8938_v50, %s5695_s15  ;;  %v8953_v50 = vld [vmem:[#allocation27_spill] sm:$0xff] }
 0x383   : > { %v7827_v26 = vsel %vm4384_vm3, %v7722_v29, %v4006_v36  ;;  %v8940_v29 = vld [vmem:[#allocation105_spill] sm:$0xff] }
 0x389   : > { %4093 = vrot.lane.b32.xlu0 %v3910_v32, %s5695_s15 }
 0x38a   : > { %v4012_v49 = vpop.permute.xlu2 %4011  ;;  %4155 = vrot.lane.b32.xlu2 %v7645_v45, %s5696_s18  ;;  %4077 = vrot.lane.b32.xlu1 %v8939_v5, %s5695_s15 }
 0x38b   : > { %v7838_v39 = vsel %vm4384_vm3, %v4374_v25, %v4012_v49 }
 0x391   : > { %4131 = vrot.lane.b32.xlu0 %v8940_v29, %s5696_s18  ;;  %v8955_v29 = vld [vmem:[#allocation49_spill] sm:$0xff] }
 0x392   : > { %v4018_v31 = vpop.permute.xlu2 %4017  ;;  %4217 = vrot.lane.b32.xlu2 %v7554_v52, %s5697_s21  ;;  %4083 = vrot.lane.b32.xlu1 %v7282_v37, %s5695_s15  ;;  %v8942_v37 = vld [vmem:[#allocation38_spill] sm:$0xff]  ;;  %v8943_v52 = vld [vmem:[#allocation96_spill] sm:$0xff] }
 0x393   : > { %v7847_v20 = vsel %vm4384_vm3, %v4377_v2, %v4018_v31  ;;  %v8947_v2 = vld [vmem:[#allocation53_spill] sm:$0xff] }
 0x394   : > { %v8956_v31 = vld [vmem:[#allocation37_spill] sm:$0xff] }
 0x399   : > { %4151 = vrot.lane.b32.xlu0 %v7515_v33, %s5696_s18 }
 0x39a   : > { %v4024_v45 = vpop.permute.xlu2 %4023  ;;  %4137 = vrot.lane.b32.xlu2 %v8941_v63, %s5696_s18  ;;  %4089 = vrot.lane.b32.xlu1 %v7534_v60, %s5695_s15  ;;  %v8944_v60 = vld [vmem:[#allocation5_spill] sm:$0xff]  ;;  %s5501_s15 = sshll.u32 %s5677_s10, 3 }
 0x39b   : > { %v7856_v25 = vsel %vm4384_vm3, %v4380_v42, %v4024_v45 }
 0x3a1   : > { %4157 = vrot.lane.b32.xlu0 %v7750_v11, %s5696_s18 }
 0x3a2   : > { %4143 = vrot.lane.b32.xlu2 %v8942_v37, %s5696_s18  ;;  %4127 = vrot.lane.b32.xlu1 %v8943_v52, %s5696_s18 }
 0x3a3   : > { %v3964_v33 = vpop.permute.xlu0 %3963 }
 0x3a4   : > { %v4030_v15 = vpop.permute.xlu2 %4029  ;;  %v7866_v9 = vsel %vm4367_vm2, %v7671_v19, %v3964_v33 }
 0x3a9   : > { %4219 = vrot.lane.b32.xlu0 %v7648_v7, %s5697_s21 }
 0x3aa   : > { %4149 = vrot.lane.b32.xlu2 %v7389_v43, %s5696_s18  ;;  %4133 = vrot.lane.b32.xlu1 %v8944_v60, %s5696_s18  ;;  %v8959_v60 = vld [vmem:[#allocation28_spill] sm:$0xff] }
 0x3ab   : > { %v4002_v11 = vpop.permute.xlu0 %4001 }
 0x3ac   : > { %v4068_v28 = vpop.permute.xlu2 %4067  ;;  %v7876_v57 = vsel %vm4384_vm3, %v7592_v10, %v4002_v11  ;;  %v8946_v10 = vld [vmem:[#allocation8_spill] sm:$0xff] }
 0x3b1   : > { %4139 = vrot.lane.b32.xlu0 %v8945_v38, %s5696_s18 }
 0x3b2   : > { %4283 = vrot.lane.b32.xlu2 %v7674_v54, %s5698_s22  ;;  %4153 = vrot.lane.b32.xlu1 %v7562_v46, %s5696_s18 }
 0x3b3   : > { %v4008_v43 = vpop.permute.xlu0 %4007 }
 0x3b4   : > { %v4074_v7 = vpop.permute.xlu2 %4073  ;;  %v7886_v19 = vsel %vm4384_vm3, %v7622_v53, %v4008_v43 }
 0x3b9   : > { %4145 = vrot.lane.b32.xlu0 %v7237_v13, %s5696_s18  ;;  %v8948_v13 = vld [vmem:[#allocation34_spill] sm:$0xff] }
 0x3ba   : > { %4201 = vrot.lane.b32.xlu2 %v8946_v10, %s5697_s21  ;;  %4215 = vrot.lane.b32.xlu1 %v8947_v2, %s5697_s21  ;;  %v8962_v10 = vld [vmem:[#allocation40_spill] sm:$0xff] }
 0x3bb   : > { %v4014_v35 = vpop.permute.xlu0 %4013 }
 0x3bc   : > { %v4080_v54 = vpop.permute.xlu2 %4079  ;;  %v3966_v30 = vpop.permute.xlu1 %3965  ;;  %v7896_v46 = vsel %vm4384_vm3, %v7658_v62, %v4014_v35 }
 0x3bd   : > { %v4383_v53 = vsel %vm4367_vm2, %v7755_v12, %v3966_v30 }
 0x3be   : > { %v7901_v58 = vsel %vm4384_vm3, %v4383_v53, %v4030_v15  ;;  %v8958_v15 = vld [vmem:[#allocation46_spill] sm:$0xff] }
 0x3c1   : > { %4279 = vrot.lane.b32.xlu0 %v7544_v59, %s5698_s22  ;;  %v8949_v59 = vld [vmem:[#allocation50_spill] sm:$0xff] }
 0x3c2   : > { %4207 = vrot.lane.b32.xlu2 %v8948_v13, %s5697_s21  ;;  %4221 = vrot.lane.b32.xlu1 %v7739_v40, %s5697_s21  ;;  %v8950_v40 = vld [vmem:[#allocation35_spill] sm:$0xff]  ;;  %v8963_v13 = vld [vmem:[#allocation30_spill] sm:$0xff] }
 0x3c3   : > { %v4020_v55 = vpop.permute.xlu0 %4019 }
 0x3c4   : > { %v4086_v22 = vpop.permute.xlu2 %4085  ;;  %v4004_v62 = vpop.permute.xlu1 %4003  ;;  %v7911_v27 = vsel %vm4384_vm3, %v7694_v47, %v4020_v55  ;;  %v8964_v55 = vld [vmem:[#allocation10_spill] sm:$0xff] }
 0x3c5   : > { %v4387_v12 = vsel %vm4384_vm3, %v7730_v4, %v4004_v62 }
 0x3c6   : > { %v7916_v23 = vsel %vm4401_vm4, %v4387_v12, %v4068_v28 }
 0x3c9   : > { %4285 = vrot.lane.b32.xlu0 %v7742_v21, %s5698_s22  ;;  %v8951_v21 = vld [vmem:[#allocation25_spill] sm:$0xff] }
 0x3ca   : > { %4213 = vrot.lane.b32.xlu2 %v8949_v59, %s5697_s21  ;;  %4141 = vrot.lane.b32.xlu1 %v8950_v40, %s5696_s18 }
 0x3cb   : > { %v4026_v51 = vpop.permute.xlu0 %4025 }
 0x3cc   : > { %v4092_v48 = vpop.permute.xlu2 %4091  ;;  %v4010_v61 = vpop.permute.xlu1 %4009  ;;  %v7926_v47 = vsel %vm4384_vm3, %v7805_v6, %v4026_v51  ;;  %v8966_v51 = vld [vmem:[#allocation97_spill] sm:$0xff] }
 0x3cd   : > { %v4390_v4 = vsel %vm4384_vm3, %v7761_v34, %v4010_v61  ;;  %v8968_v61 = vld [vmem:[#allocation13_spill] sm:$0xff] }
 0x3ce   : > { %v4407_v0 = vsel %vm4401_vm4, %v4390_v4, %v4074_v7  ;;  %v8961_v7 = vld [vmem:[#allocation106_spill] sm:$0xff] }
 0x3d1   : > { %4203 = vrot.lane.b32.xlu0 %v8951_v21, %s5697_s21 }
 0x3d2   : > { %4347 = vrot.lane.b32.xlu2 %v7681_v18, %s5699_s23  ;;  %4147 = vrot.lane.b32.xlu1 %v8952_v16, %s5696_s18  ;;  %v8954_v18 = vld [vmem:[#allocation19_spill] sm:$0xff]  ;;  %s5392_s18 = sadd.s32 %s5501_s15, %s5500_s14 }
 0x3d3   : > { %v4064_v56 = vpop.permute.xlu0 %4063 }
 0x3d4   : > { %v4130_v42 = vpop.permute.xlu2 %4129  ;;  %v4016_v36 = vpop.permute.xlu1 %4015  ;;  %v7939_v6 = vsel %vm4401_vm4, %v7815_v24, %v4064_v56  ;;  %v8969_v56 = vld [vmem:[#allocation14_spill] sm:$0xff] }
 0x3d5   : > { %v4393_v34 = vsel %vm4384_vm3, %v7773_v8, %v4016_v36  ;;  %v8971_v36 = vld [vmem:[#allocation31_spill] sm:$0xff] }
 0x3d6   : > { %v4410_v17 = vsel %vm4401_vm4, %v4393_v34, %v4080_v54 }
 0x3d9   : > { %4209 = vrot.lane.b32.xlu0 %v8953_v50, %s5697_s21 }
 0x3da   : > { %4265 = vrot.lane.b32.xlu2 %v8954_v18, %s5698_s22  ;;  %4281 = vrot.lane.b32.xlu1 %v7571_v14, %s5698_s22  ;;  %v8957_v14 = vld [vmem:[#allocation11_spill] sm:$0xff] }
 0x3db   : > { %v4070_v41 = vpop.permute.xlu0 %4069 }
 0x3dc   : > { %v4136_v32 = vpop.permute.xlu2 %4135  ;;  %v4022_v49 = vpop.permute.xlu1 %4021  ;;  %v7952_v24 = vsel %vm4401_vm4, %v7827_v26, %v4070_v41  ;;  %v8973_v41 = vld [vmem:[#allocation111_spill] sm:$0xff] }
 0x3dd   : > { %v4396_v8 = vsel %vm4384_vm3, %v7789_v3, %v4022_v49 }
 0x3de   : > { %v4413_v5 = vsel %vm4401_vm4, %v4396_v8, %v4086_v22  ;;  %v8965_v22 = vld [vmem:[#allocation56_spill] sm:$0xff] }
 0x3e1   : > { %4343 = vrot.lane.b32.xlu0 %v8955_v29, %s5699_s23 }
 0x3e2   : > { %4271 = vrot.lane.b32.xlu2 %v8956_v31, %s5698_s22  ;;  %4199 = vrot.lane.b32.xlu1 %v8957_v14, %s5697_s21  ;;  %v8975_v14 = vld [vmem:[#allocation44_spill] sm:$0xff] }
 0x3e3   : > { %v4076_v45 = vpop.permute.xlu0 %4075 }
 0x3e4   : > { %v4156_v63 = vpop.permute.xlu2 %4155  ;;  %v4028_v37 = vpop.permute.xlu1 %4027  ;;  %v7965_v26 = vsel %vm4401_vm4, %v7838_v39, %v4076_v45  ;;  %v8976_v45 = vld [vmem:[#allocation101_spill] sm:$0xff] }
 0x3e5   : > { %v4399_v3 = vsel %vm4384_vm3, %v7866_v9, %v4028_v37 }
 0x3e6   : > { %v4416_v52 = vsel %vm4401_vm4, %v4399_v3, %v4092_v48  ;;  %v8967_v48 = vld [vmem:[#allocation41_spill] sm:$0xff] }
 0x3e7   : > { %v7971_v33 = vsel %vm4418_vm5, %v4416_v52, %v4156_v63  ;;  %v8977_v63 = vld [vmem:[#allocation99_spill] sm:$0xff] }
 0x3e9   : > { %4349 = vrot.lane.b32.xlu0 %v7734_v44, %s5699_s23  ;;  %v8960_v44 = vld [vmem:[#allocation15_spill] sm:$0xff] }
 0x3ea   : > { %4277 = vrot.lane.b32.xlu2 %v8958_v15, %s5698_s22  ;;  %4205 = vrot.lane.b32.xlu1 %v8959_v60, %s5697_s21 }
 0x3eb   : > { %v4082_v39 = vpop.permute.xlu0 %4081 }
 0x3ec   : > { %v7979_v11 = vpop.permute.xlu2 %4217  ;;  %v4066_v28 = vpop.permute.xlu1 %4065  ;;  %v7983_v9 = vsel %vm4401_vm4, %v7847_v20, %v4082_v39 }
 0x3ed   : > { %v4403_v38 = vsel %vm4401_vm4, %v7876_v57, %v4066_v28  ;;  %v8978_v28 = vld [vmem:[#allocation102_spill] sm:$0xff] }
 0x3ee   : > { %v7988_v43 = vsel %vm4418_vm5, %v4403_v38, %v4130_v42  ;;  %v8970_v42 = vld [vmem:[#allocation36_spill] sm:$0xff]  ;;  %v8979_v38 = vld [vmem:[#allocation17_spill] sm:$0xff] }
 0x3f1   : > { %4267 = vrot.lane.b32.xlu0 %v8960_v44, %s5698_s22 }
 0x3f2   : > { %4195 = vrot.lane.b32.xlu2 %v8961_v7, %s5697_s21  ;;  %4211 = vrot.lane.b32.xlu1 %v8962_v10, %s5697_s21 }
 0x3f3   : > { %v4088_v2 = vpop.permute.xlu0 %4087 }
 0x3f4   : > { %v4138_v35 = vpop.permute.xlu2 %4137  ;;  %v4072_v54 = vpop.permute.xlu1 %4071  ;;  %v4414_v20 = vsel %vm4401_vm4, %v7856_v25, %v4088_v2 }
 0x3f5   : > { %v4424_v57 = vsel %vm4418_vm5, %v4407_v0, %v4138_v35  ;;  %v4406_v30 = vsel %vm4401_vm4, %v7886_v19, %v4072_v54  ;;  %v8980_v54 = vld [vmem:[#allocation113_spill] sm:$0xff] }
 0x3f6   : > { %v8002_v53 = vsel %vm4418_vm5, %v4406_v30, %v4136_v32  ;;  %v8974_v32 = vld [vmem:[#allocation43_spill] sm:$0xff] }
 0x3f9   : > { %4273 = vrot.lane.b32.xlu0 %v8963_v13, %s5698_s22 }
 0x3fa   : > { %4329 = vrot.lane.b32.xlu2 %v8964_v55, %s5699_s23  ;;  %4345 = vrot.lane.b32.xlu1 %v8965_v22, %s5699_s23  ;;  %v8982_v22 = vld [vmem:[#allocation110_spill] sm:$0xff] }
 0x3fb   : > { %v4094_v62 = vpop.permute.xlu0 %4093 }
 0x3fc   : > { %v4144_v12 = vpop.permute.xlu2 %4143  ;;  %v4078_v25 = vpop.permute.xlu1 %4077  ;;  %v4417_v59 = vsel %vm4401_vm4, %v7901_v58, %v4094_v62 }
 0x3fd   : > { %v4427_v19 = vsel %vm4418_vm5, %v4410_v17, %v4144_v12  ;;  %v8015_v40 = vsel %vm4401_vm4, %v7896_v46, %v4078_v25 }
 0x401   : > { %4191 = vrot.lane.b32.xlu0 %v8966_v51, %s5697_s21 }
 0x402   : > { %4335 = vrot.lane.b32.xlu2 %v8967_v48, %s5699_s23  ;;  %4263 = vrot.lane.b32.xlu1 %v8968_v61, %s5698_s22 }
 0x403   : > { %v4132_v4 = vpop.permute.xlu0 %4131 }
 0x404   : > { %v4150_v0 = vpop.permute.xlu2 %4149  ;;  %v4084_v21 = vpop.permute.xlu1 %4083  ;;  %v8025_v58 = vsel %vm4418_vm5, %v7916_v23, %v4132_v4 }
 0x405   : > { %v4430_v16 = vsel %vm4418_vm5, %v4413_v5, %v4150_v0  ;;  %v8030_v46 = vsel %vm4401_vm4, %v7911_v27, %v4084_v21  ;;  %v8972_v27 = vld [vmem:[#allocation18_spill] sm:$0xff] }
 0x409   : > { %4197 = vrot.lane.b32.xlu0 %v8969_v56, %s5697_s21  ;;  %v8985_v56 = vld [vmem:[#allocation103_spill] sm:$0xff] }
 0x40a   : > { %4341 = vrot.lane.b32.xlu2 %v8970_v42, %s5699_s23  ;;  %4269 = vrot.lane.b32.xlu1 %v8971_v36, %s5698_s22 }
 0x40b   : > { %v4152_v34 = vpop.permute.xlu0 %4151 }
 0x40c   : > { %v4284_v17 = vpop.permute.xlu2 %4283  ;;  %v4090_v50 = vpop.permute.xlu1 %4089  ;;  %v4431_v23 = vsel %vm4418_vm5, %v4414_v20, %v4152_v34  ;;  %v8981_v20 = vld [vmem:[#allocation21_spill] sm:$0xff] }
 0x40d   : > { %v4415_v18 = vsel %vm4401_vm4, %v7926_v47, %v4090_v50 }
 0x411   : > { %4331 = vrot.lane.b32.xlu0 %v8972_v27, %s5699_s23 }
 0x412   : > { %4259 = vrot.lane.b32.xlu2 %v8973_v41, %s5698_s22  ;;  %4275 = vrot.lane.b32.xlu1 %v8974_v32, %s5698_s22 }
 0x413   : > { %v4158_v49 = vpop.permute.xlu0 %4157 }
 0x414   : > { %v4202_v8 = vpop.permute.xlu2 %4201  ;;  %v4128_v5 = vpop.permute.xlu1 %4127  ;;  %v4434_v29 = vsel %vm4418_vm5, %v4417_v59, %v4158_v49 }
 0x415   : > { %v4441_v31 = vsel %vm4435_vm6, %v4424_v57, %v4202_v8  ;;  %v8051_v47 = vsel %vm4418_vm5, %v7939_v6, %v4128_v5 }
 0x419   : > { %4337 = vrot.lane.b32.xlu0 %v8975_v14, %s5699_s23 }
 0x41a   : > { %4321 = vrot.lane.b32.xlu2 %v8976_v45, %s5699_s23  ;;  %4193 = vrot.lane.b32.xlu1 %v8977_v63, %s5697_s21  ;;  %s5502_s21 = sshll.u32 %s5392_s18, 3 }
 0x41b   : > { %v4220_v37 = vpop.permute.xlu0 %4219 }
 0x41c   : > { %v4208_v3 = vpop.permute.xlu2 %4207  ;;  %v4134_v52 = vpop.permute.xlu1 %4133  ;;  %v4450_v15 = vsel %vm4435_vm6, %v7971_v33, %v4220_v37 }
 0x41d   : > { %v4444_v60 = vsel %vm4435_vm6, %v4427_v19, %v4208_v3  ;;  %v8064_v6 = vsel %vm4418_vm5, %v7952_v24, %v4134_v52  ;;  %v8067_v39 = vsel %vm4452_vm7, %v4450_v15, %v4284_v17 }
 0x421   : > { %4255 = vrot.lane.b32.xlu0 %v8978_v28, %s5698_s22 }
 0x422   : > { %4327 = vrot.lane.b32.xlu1 %v8979_v38, %s5699_s23 }
 0x423   : > { %v4140_v44 = vpop.permute.xlu0 %4139 }
 0x424   : > { %v4214_v7 = vpop.permute.xlu2 %4213  ;;  %v4154_v10 = vpop.permute.xlu1 %4153  ;;  %v4425_v33 = vsel %vm4418_vm5, %v7965_v26, %v4140_v44 }
 0x425   : > { %v4447_v2 = vsel %vm4435_vm6, %v4430_v16, %v4214_v7  ;;  %v4432_v24 = vsel %vm4418_vm5, %v4415_v18, %v4154_v10  ;;  %v8986_v18 = vld [vmem:[#allocation114_spill] sm:$0xff] }
 0x426   : > { %v4449_v35 = vsel %vm4435_vm6, %v4432_v24, %v7979_v11  ;;  %v8983_v11 = vld [vmem:[#allocation33_spill] sm:$0xff] }
 0x429   : > { %4261 = vrot.lane.b32.xlu0 %v8980_v54, %s5698_s22 }
 0x42a   : > { %4333 = vrot.lane.b32.xlu1 %v8981_v20, %s5699_s23 }
 0x42b   : > { %v4146_v57 = vpop.permute.xlu0 %4145 }
 0x42c   : > { %v8083_v30 = vpop.permute.xlu2 %4347  ;;  %v4216_v13 = vpop.permute.xlu1 %4215  ;;  %v4428_v26 = vsel %vm4418_vm5, %v7983_v9, %v4146_v57  ;;  %v8984_v9 = vld [vmem:[#allocation104_spill] sm:$0xff] }
 0x42d   : > { %v4448_v55 = vsel %vm4435_vm6, %v4431_v23, %v4216_v13 }
 0x431   : > { %4323 = vrot.lane.b32.xlu0 %v8982_v22, %s5699_s23 }
 0x432   : > { %4339 = vrot.lane.b32.xlu1 %v8983_v11, %s5699_s23 }
 0x433   : > { %v4280_v62 = vpop.permute.xlu0 %4279 }
 0x434   : > { %v4266_v12 = vpop.permute.xlu2 %4265  ;;  %v4222_v25 = vpop.permute.xlu1 %4221  ;;  %v4465_v59 = vsel %vm4452_vm7, %v4448_v55, %v4280_v62 }
 0x435   : > { %v8094_v19 = vsel %vm4452_vm7, %v4441_v31, %v4266_v12  ;;  %v4451_v51 = vsel %vm4435_vm6, %v4434_v29, %v4222_v25 }
 0x43a   : > { %4257 = vrot.lane.b32.xlu1 %v8984_v9, %s5698_s22 }
 0x43b   : > { %v4286_v48 = vpop.permute.xlu0 %4285 }
 0x43c   : > { %v4272_v61 = vpop.permute.xlu2 %4271  ;;  %v4142_v4 = vpop.permute.xlu1 %4141  ;;  %v4468_v0 = vsel %vm4452_vm7, %v4451_v51, %v4286_v48 }
 0x43d   : > { %v4461_v21 = vsel %vm4452_vm7, %v4444_v60, %v4272_v61  ;;  %v4426_v16 = vsel %vm4418_vm5, %v8015_v40, %v4142_v4 }
 0x442   : > { %4319 = vrot.lane.b32.xlu1 %v8985_v56, %s5699_s23 }
 0x443   : > { %v4204_v42 = vpop.permute.xlu0 %4203 }
 0x444   : > { %v4278_v36 = vpop.permute.xlu2 %4277  ;;  %v4148_v34 = vpop.permute.xlu1 %4147  ;;  %v8106_v17 = vsel %vm4435_vm6, %v4425_v33, %v4204_v42 }
 0x445   : > { %v8109_v50 = vsel %vm4452_vm7, %v4447_v2, %v4278_v36  ;;  %v8113_v23 = vsel %vm4418_vm5, %v8030_v46, %v4148_v34 }
 0x44a   : > { %4325 = vrot.lane.b32.xlu1 %v8986_v18, %s5699_s23 }
 0x44b   : > { %v4210_v40 = vpop.permute.xlu0 %4209 }
 0x44c   : > { %v8117_v27 = vpop.permute.xlu2 %4195  ;;  %v4282_v41 = vpop.permute.xlu1 %4281  ;;  %v8120_v32 = vsel %vm4435_vm6, %v4428_v26, %v4210_v40 }
 0x44d   : > { %v8123_v49 = vsel %vm4452_vm7, %v4449_v35, %v4282_v41 }
 0x453   : > { %v4344_v8 = vpop.permute.xlu0 %4343 }
 0x454   : > { %v8125_v5 = vpop.permute.xlu2 %4329  ;;  %v4200_v29 = vpop.permute.xlu1 %4199  ;;  %v4482_v46 = vsel %vm4469_vm8, %v4465_v59, %v4344_v8 }
 0x455   : > { %v8130_v31 = vsel %vm4435_vm6, %v8002_v53, %v4200_v29  ;;  %v4642_v14 = vrot.slane %v4482_v46, 1  ;;  %v4643_v45 = vrot.slane %v4482_v46, 2  ;;  %v4644_v63 = vrot.slane %v4482_v46, 3 }
 0x456   : > { %v4645_v37 = vrot.slane %v4482_v46, 4  ;;  %v4646_v3 = vrot.slane %v4482_v46, 5  ;;  %v4647_v52 = vrot.slane %v4482_v46, 6  ;;  %v4648_v15 = vrot.slane %v4482_v46, 7 }
 0x457   : > { %v4702_v60 = vperm.slane %v4482_v46, 0  ;;  %v4703_v28 = vperm.slane %v4642_v14, 0  ;;  %v4704_v38 = vperm.slane %v4643_v45, 0  ;;  %v4705_v7 = vperm.slane %v4644_v63, 0 }
 0x458   : > { %v4706_v10 = vperm.slane %v4645_v37, 0  ;;  %v4707_v33 = vperm.slane %v4646_v3, 0  ;;  %v4708_v2 = vperm.slane %v4647_v52, 0  ;;  %v4709_v53 = vperm.slane %v4648_v15, 0 }
 0x45b   : > { %v4350_v44 = vpop.permute.xlu0 %4349 }
 0x45c   : > { %v4336_v24 = vpop.permute.xlu2 %4335  ;;  %v4206_v35 = vpop.permute.xlu1 %4205  ;;  %v4485_v57 = vsel %vm4469_vm8, %v4468_v0, %v4350_v44 }
 0x45d   : > { %v4478_v54 = vsel %vm4469_vm8, %v4461_v21, %v4336_v24  ;;  %v8134_v20 = vsel %vm4435_vm6, %v4426_v16, %v4206_v35  ;;  %v4663_v21 = vrot.slane %v4485_v57, 1  ;;  %v4664_v56 = vrot.slane %v4485_v57, 2 }
 0x45e   : > { %v4522_v13 = vrot.slane %v4478_v54, 1  ;;  %v4523_v26 = vrot.slane %v4478_v54, 2  ;;  %v4524_v55 = vrot.slane %v4478_v54, 3  ;;  %v4525_v22 = vrot.slane %v4478_v54, 4 }
 0x45f   : > { %v4526_v11 = vrot.slane %v4478_v54, 5  ;;  %v4527_v62 = vrot.slane %v4478_v54, 6  ;;  %v4528_v12 = vrot.slane %v4478_v54, 7  ;;  %v8138_v25 = vsel %vm4798_vm9, %v4478_v54, %v4702_v60 }
 0x460   : > { %v8141_v59 = vsel %vm4798_vm9, %v4522_v13, %v4703_v28  ;;  %v8144_v51 = vsel %vm4798_vm9, %v4523_v26, %v4704_v38  ;;  %v8147_v9 = vsel %vm4798_vm9, %v4524_v55, %v4705_v7  ;;  %v8150_v48 = vsel %vm4798_vm9, %v4525_v22, %v4706_v10 }
 0x461   : > { %v8153_v61 = vsel %vm4798_vm9, %v4526_v11, %v4707_v33  ;;  %v8156_v4 = vsel %vm4798_vm9, %v4527_v62, %v4708_v2  ;;  %v8159_v0 = vsel %vm4798_vm9, %v4528_v12, %v4709_v53  ;;  %v4665_v42 = vrot.slane %v4485_v57, 3 }
 0x462   : > { %8987 = vst [vmem:[#allocation39_spill] sm:$0xff] %v8159_v0  ;;  %v4666_v36 = vrot.slane %v4485_v57, 4  ;;  %v4667_v34 = vrot.slane %v4485_v57, 5  ;;  %v4668_v41 = vrot.slane %v4485_v57, 6  ;;  %v4669_v8 = vrot.slane %v4485_v57, 7 }
 0x463   : > { %v8161_v16 = vpop.permute.xlu0 %4267  ;;  %v4726_v29 = vperm.slane %v4485_v57, 0  ;;  %v4727_v46 = vperm.slane %v4663_v21, 0  ;;  %v4728_v14 = vperm.slane %v4664_v56, 0  ;;  %v4729_v45 = vperm.slane %v4665_v42, 0 }
 0x464   : > { %v4342_v18 = vpop.permute.xlu2 %4341  ;;  %v8163_v40 = vpop.permute.xlu1 %4211  ;;  %v4730_v63 = vperm.slane %v4666_v36, 0  ;;  %v4731_v37 = vperm.slane %v4667_v34, 0  ;;  %v4732_v3 = vperm.slane %v4668_v41, 0  ;;  %v4733_v52 = vperm.slane %v4669_v8, 0 }
 0x465   : > { %v4481_v15 = vsel %vm4469_vm8, %v8109_v50, %v4342_v18 }
 0x466   : > { %v4543_v60 = vrot.slane %v4481_v15, 1  ;;  %v4544_v28 = vrot.slane %v4481_v15, 2  ;;  %v4545_v38 = vrot.slane %v4481_v15, 3  ;;  %v4546_v44 = vrot.slane %v4481_v15, 4 }
 0x467   : > { %v4547_v7 = vrot.slane %v4481_v15, 5  ;;  %v4548_v10 = vrot.slane %v4481_v15, 6  ;;  %v4549_v33 = vrot.slane %v4481_v15, 7  ;;  %v8168_v2 = vsel %vm4798_vm9, %v4481_v15, %v4726_v29 }
 0x468   : > { %8988 = vst [vmem:[#allocation59_spill] sm:$0xff] %v8168_v2  ;;  %v8171_v24 = vsel %vm4798_vm9, %v4543_v60, %v4727_v46  ;;  %v8174_v35 = vsel %vm4798_vm9, %v4544_v28, %v4728_v14  ;;  %v8177_v53 = vsel %vm4798_vm9, %v4545_v38, %v4729_v45  ;;  %v8180_v50 = vsel %vm4798_vm9, %v4546_v44, %v4730_v63 }
 0x469   : > { %8989 = vst [vmem:[#allocation42_spill] sm:$0xff] %v8171_v24  ;;  %v8183_v54 = vsel %vm4798_vm9, %v4547_v7, %v4731_v37  ;;  %v8186_v57 = vsel %vm4798_vm9, %v4548_v10, %v4732_v3  ;;  %v8189_v13 = vsel %vm4798_vm9, %v4549_v33, %v4733_v52 }
 0x46a   : > { %8990 = vst [vmem:[#allocation52_spill] sm:$0xff] %v8174_v35 }
 0x46b   : > { %8991 = vst [vmem:[#allocation62_spill] sm:$0xff] %v8177_v53  ;;  %v4274_v26 = vpop.permute.xlu0 %4273 }
 0x46c   : > { %8992 = vst [vmem:[#allocation45_spill] sm:$0xff] %v8180_v50  ;;  %v4346_v55 = vpop.permute.xlu1 %4345  ;;  %v4462_v11 = vsel %vm4452_vm7, %v8120_v32, %v4274_v26 }
 0x46d   : > { %8993 = vst [vmem:[#allocation55_spill] sm:$0xff] %v8183_v54  ;;  %v4483_v22 = vsel %vm4469_vm8, %v8123_v49, %v4346_v55 }
 0x46e   : > { %8994 = vst [vmem:[#allocation58_spill] sm:$0xff] %v8186_v57  ;;  %v4649_v41 = vrot.slane %v4483_v22, 1  ;;  %v4651_v8 = vrot.slane %v4483_v22, 3  ;;  %v4652_v29 = vrot.slane %v4483_v22, 4  ;;  %v4653_v46 = vrot.slane %v4483_v22, 5 }
 0x46f   : > { %8995 = vst [vmem:[#allocation48_spill] sm:$0xff] %v8189_v13  ;;  %v4655_v14 = vrot.slane %v4483_v22, 7  ;;  %v4710_v45 = vperm.slane %v4483_v22, 0 }
 0x470   : > { %v4711_v63 = vperm.slane %v4649_v41, 0  ;;  %v4713_v3 = vperm.slane %v4651_v8, 0  ;;  %v4714_v52 = vperm.slane %v4652_v29, 0  ;;  %v4715_v15 = vperm.slane %v4653_v46, 0 }
 0x471   : > { %v4717_v38 = vperm.slane %v4655_v14, 0 }
 0x473   : > { %v4192_v62 = vpop.permute.xlu0 %4191 }
 0x474   : > { %v4264_v12 = vpop.permute.xlu1 %4263  ;;  %v8197_v21 = vsel %vm4435_vm6, %v8051_v47, %v4192_v62  ;;  %v4650_v47 = vrot.slane %v4483_v22, 2 }
 0x475   : > { %v8201_v56 = vsel %vm4452_vm7, %v8130_v31, %v4264_v12  ;;  %v4654_v31 = vrot.slane %v4483_v22, 6 }
 0x476   : > { %v4712_v37 = vperm.slane %v4650_v47, 0 }
 0x477   : > { %v4716_v60 = vperm.slane %v4654_v31, 0  ;;  %v8247_v31 = vsel %vm4469_vm8, %v8067_v39, %v8083_v30  ;;  %v4459_v39 = vsel %vm4452_vm7, %v8106_v17, %v8161_v16  ;;  %v4438_v17 = vsel %vm4435_vm6, %v8025_v58, %v8117_v27 }
 0x478   : > { %v4656_v14 = vrot.slane %v8247_v31, 1 }
 0x47b   : > { %v4198_v42 = vpop.permute.xlu0 %4197 }
 0x47c   : > { %v4270_v36 = vpop.permute.xlu1 %4269  ;;  %v8205_v34 = vsel %vm4435_vm6, %v8064_v6, %v4198_v42 }
 0x47d   : > { %8996 = vst [vmem:[#allocation61_spill] sm:$0xff] %v8205_v34  ;;  %v8209_v49 = vsel %vm4452_vm7, %v8134_v20, %v4270_v36 }
 0x47e   : > { %8997 = vst [vmem:[#allocation65_spill] sm:$0xff] %v8209_v49 }
 0x483   : > { %v4332_v32 = vpop.permute.xlu0 %4331 }
 0x484   : > { %v8211_v18 = vpop.permute.xlu1 %4275 }
 0x48b   : > { %v4338_v6 = vpop.permute.xlu0 %4337 }
 0x48c   : > { %v8213_v20 = vpop.permute.xlu1 %4193  ;;  %v4479_v28 = vsel %vm4469_vm8, %v4462_v11, %v4338_v6  ;;  %v4661_v6 = vrot.slane %v8247_v31, 6 }
 0x48d   : > { %v4529_v44 = vrot.slane %v4479_v28, 1  ;;  %v4530_v7 = vrot.slane %v4479_v28, 2  ;;  %v4531_v10 = vrot.slane %v4479_v28, 3  ;;  %v4532_v33 = vrot.slane %v4479_v28, 4 }
 0x48e   : > { %v4533_v26 = vrot.slane %v4479_v28, 5  ;;  %v4534_v55 = vrot.slane %v4479_v28, 6  ;;  %v4535_v62 = vrot.slane %v4479_v28, 7  ;;  %v8217_v22 = vsel %vm4798_vm9, %v4479_v28, %v4710_v45 }
 0x48f   : > { %v8220_v12 = vsel %vm4798_vm9, %v4529_v44, %v4711_v63  ;;  %v8223_v42 = vsel %vm4798_vm9, %v4530_v7, %v4712_v37  ;;  %v8226_v36 = vsel %vm4798_vm9, %v4531_v10, %v4713_v3  ;;  %v8229_v11 = vsel %vm4798_vm9, %v4532_v33, %v4714_v52 }
 0x490   : > { %v8232_v41 = vsel %vm4798_vm9, %v4533_v26, %v4715_v15  ;;  %v8235_v47 = vsel %vm4798_vm9, %v4534_v55, %v4716_v60  ;;  %v8238_v8 = vsel %vm4798_vm9, %v4535_v62, %v4717_v38  ;;  %v4657_v45 = vrot.slane %v8247_v31, 2  ;;  %v4260_v55 = vpop.permute.xlu2 %4259 }
 0x491   : > { %v4658_v63 = vrot.slane %v8247_v31, 3  ;;  %v4659_v37 = vrot.slane %v8247_v31, 4  ;;  %v4660_v3 = vrot.slane %v8247_v31, 5  ;;  %v4662_v52 = vrot.slane %v8247_v31, 7 }
 0x492   : > { %v8259_v15 = vsel %vm4469_vm8, %v8094_v19, %v8125_v5  ;;  %v4718_v60 = vperm.slane %v8247_v31, 0  ;;  %v4719_v28 = vperm.slane %v4656_v14, 0  ;;  %v8268_v38 = vsel %vm4469_vm8, %v4459_v39, %v4332_v32 }
 0x493   : > { %v8240_v29 = vpop.permute.xlu0 %4255  ;;  %v4720_v7 = vperm.slane %v4657_v45, 0  ;;  %v4721_v10 = vperm.slane %v4658_v63, 0  ;;  %v4722_v33 = vperm.slane %v4659_v37, 0  ;;  %v4723_v26 = vperm.slane %v4660_v3, 0 }
 0x494   : > { %v8242_v46 = vpop.permute.xlu1 %4327  ;;  %v4724_v19 = vperm.slane %v4661_v6, 0  ;;  %v4725_v5 = vperm.slane %v4662_v52, 0  ;;  %v4628_v62 = vrot.slane %v8268_v38, 1  ;;  %v4629_v32 = vrot.slane %v8268_v38, 2 }
 0x495   : > { %v4630_v31 = vrot.slane %v8268_v38, 3  ;;  %v4631_v14 = vrot.slane %v8268_v38, 4  ;;  %v4632_v63 = vrot.slane %v8268_v38, 5  ;;  %v4633_v37 = vrot.slane %v8268_v38, 6 }
 0x496   : > { %v4634_v3 = vrot.slane %v8268_v38, 7  ;;  %v4446_v52 = vsel %vm4435_vm6, %v8113_v23, %v8163_v40  ;;  %v4455_v45 = vsel %vm4452_vm7, %v4438_v17, %v4260_v55  ;;  %v4686_v13 = vperm.slane %v8268_v38, 0 }
 0x497   : > { %v4463_v16 = vsel %vm4452_vm7, %v4446_v52, %v8211_v18  ;;  %v4687_v34 = vperm.slane %v4628_v62, 0  ;;  %v4689_v58 = vperm.slane %v4630_v31, 0  ;;  %v4690_v57 = vperm.slane %v4631_v14, 0 }
 0x498   : > { %v4691_v54 = vperm.slane %v4632_v63, 0  ;;  %v4692_v6 = vperm.slane %v4633_v37, 0  ;;  %v4693_v50 = vperm.slane %v4634_v3, 0 }
 0x49b   : > { %v8264_v30 = vpop.permute.xlu0 %4261 }
 0x49c   : > { %8998 = vst [vmem:[#allocation51_spill] sm:$0xff] %v8264_v30  ;;  %v8270_v44 = vpop.permute.xlu1 %4333  ;;  %v4688_v30 = vperm.slane %v4629_v32, 0 }
 0x49d   : > { %8999 = vst [vmem:[#allocation54_spill] sm:$0xff] %v8270_v44 }
 0x4a3   : > { %v4324_v27 = vpop.permute.xlu0 %4323 }
 0x4a4   : > { %v4340_v53 = vpop.permute.xlu1 %4339  ;;  %v4472_v23 = vsel %vm4469_vm8, %v4455_v45, %v4324_v27 }
 0x4a5   : > { %v4480_v40 = vsel %vm4469_vm8, %v4463_v16, %v4340_v53  ;;  %v4508_v39 = vrot.slane %v4472_v23, 1  ;;  %v4509_v17 = vrot.slane %v4472_v23, 2  ;;  %v4510_v55 = vrot.slane %v4472_v23, 3 }
 0x4a6   : > { %v4536_v35 = vrot.slane %v4480_v40, 1  ;;  %v4537_v18 = vrot.slane %v4480_v40, 2  ;;  %v4538_v52 = vrot.slane %v4480_v40, 3  ;;  %v4539_v38 = vrot.slane %v4480_v40, 4 }
 0x4a7   : > { %v4540_v62 = vrot.slane %v4480_v40, 5  ;;  %v4541_v32 = vrot.slane %v4480_v40, 6  ;;  %v4542_v31 = vrot.slane %v4480_v40, 7  ;;  %v4847_v14 = vsel %vm4798_vm9, %v4480_v40, %v4718_v60 }
 0x4a8   : > { %v4848_v63 = vsel %vm4798_vm9, %v4536_v35, %v4719_v28  ;;  %v4849_v37 = vsel %vm4798_vm9, %v4537_v18, %v4720_v7  ;;  %v4850_v45 = vsel %vm4798_vm9, %v4538_v52, %v4721_v10  ;;  %v4851_v53 = vsel %vm4798_vm9, %v4539_v38, %v4722_v33 }
 0x4a9   : > { %v4852_v16 = vsel %vm4798_vm9, %v4540_v62, %v4723_v26  ;;  %v4853_v3 = vsel %vm4798_vm9, %v4541_v32, %v4724_v19  ;;  %v4854_v27 = vsel %vm4798_vm9, %v4542_v31, %v4725_v5  ;;  %v4879_v24 = vrot.slane %v4847_v14, 4 }
 0x4aa   : > { %v4911_v2 = vrot.slane %v4848_v63, 4  ;;  %v4943_v0 = vrot.slane %v4849_v37, 4  ;;  %v4975_v49 = vrot.slane %v4850_v45, 4  ;;  %v5007_v44 = vrot.slane %v4851_v53, 4 }
 0x4ab   : > { %v5039_v60 = vrot.slane %v4852_v16, 4  ;;  %v5071_v40 = vrot.slane %v4853_v3, 4  ;;  %v5103_v35 = vrot.slane %v4854_v27, 4  ;;  %v4511_v28 = vrot.slane %v4472_v23, 4 }
 0x4ac   : > { %v4512_v7 = vrot.slane %v4472_v23, 5  ;;  %v4513_v18 = vrot.slane %v4472_v23, 6  ;;  %v4514_v10 = vrot.slane %v4472_v23, 7  ;;  %v4815_v33 = vsel %vm4798_vm9, %v4472_v23, %v4686_v13  ;;  %v4258_v23 = vpop.permute.xlu1 %4257 }
 0x4ad   : > { %v4816_v26 = vsel %vm4798_vm9, %v4508_v39, %v4687_v34  ;;  %v4817_v19 = vsel %vm4798_vm9, %v4509_v17, %v4688_v30  ;;  %v4818_v5 = vsel %vm4798_vm9, %v4510_v55, %v4689_v58  ;;  %v4819_v52 = vsel %vm4798_vm9, %v4511_v28, %v4690_v57 }
 0x4ae   : > { %v4820_v38 = vsel %vm4798_vm9, %v4512_v7, %v4691_v54  ;;  %v4821_v62 = vsel %vm4798_vm9, %v4513_v18, %v4692_v6  ;;  %v4822_v32 = vsel %vm4798_vm9, %v4514_v10, %v4693_v50  ;;  %v4880_v31 = vsel %vm2127_vm1, %v4879_v24, %v4815_v33  ;;  %v4322_v7 = vpop.permute.xlu2 %4321 }
 0x4af   : > { %v8315_v14 = vperm.slane %v4880_v31, %v6148_v1  ;;  %v8318_v13 = vsel %vm2127_vm1, %v4911_v2, %v4816_v26  ;;  %v8321_v34 = vsel %vm2127_vm1, %v4943_v0, %v4817_v19  ;;  %v8324_v30 = vsel %vm2127_vm1, %v4975_v49, %v4818_v5 }
 0x4b0   : > { %v4627_v54 = vrot.slane %v8259_v15, 7  ;;  %v8328_v57 = vsel %vm2127_vm1, %v5007_v44, %v4819_v52  ;;  %v8331_v50 = vsel %vm2127_vm1, %v5039_v60, %v4820_v38  ;;  %v8334_v24 = vsel %vm2127_vm1, %v5071_v40, %v4821_v62 }
 0x4b1   : > { %5127 = vst [vmem:[#allocation1 + $0x2] ss:$4 sm:$0xff] %v8315_v14  ;;  %v4678_v2 = vperm.slane %v8259_v15, 0  ;;  %v9000_v0 = vrot.slane %v8259_v15, 1  ;;  %v9001_v49 = vrot.slane %v8259_v15, 2  ;;  %v9002_v39 = vrot.slane %v8259_v15, 3 }
 0x4b2   : > { %v9003_v17 = vrot.slane %v8259_v15, 4  ;;  %v9004_v63 = vrot.slane %v8259_v15, 5  ;;  %v9005_v45 = vrot.slane %v8259_v15, 6  ;;  %v8351_v16 = vsel %vm2127_vm1, %v5103_v35, %v4822_v32 }
 0x4b3   : > { %v4679_v58 = vperm.slane %v9000_v0, 0  ;;  %v4680_v6 = vperm.slane %v9001_v49, 0  ;;  %v4681_v44 = vperm.slane %v9002_v39, 0  ;;  %v4685_v3 = vperm.slane %v4627_v54, 0 }
 0x4b4   : > { %v4682_v55 = vperm.slane %v9003_v17, 0  ;;  %v4683_v37 = vperm.slane %v9004_v63, 0  ;;  %v4684_v53 = vperm.slane %v9005_v45, 0  ;;  %v4863_v27 = vrot.slane %v8138_v25, 4  ;;  %v9009_v25 = vld [vmem:[#allocation59_spill] sm:$0xff] }
 0x4b5   : > { %v4895_v60 = vrot.slane %v8141_v59, 4  ;;  %v4437_v40 = vsel %vm4435_vm6, %v7988_v43, %v8213_v20  ;;  %v4927_v28 = vrot.slane %v8144_v51, 4  ;;  %v4871_v18 = vrot.slane %v8217_v22, 4 }
 0x4b6   : > { %v4903_v15 = vrot.slane %v8220_v12, 4  ;;  %v4454_v10 = vsel %vm4452_vm7, %v4437_v40, %v4258_v23  ;;  %v4935_v35 = vrot.slane %v8223_v42, 4  ;;  %v4967_v33 = vrot.slane %v8226_v36, 4 }
 0x4b7   : > { %v4999_v26 = vrot.slane %v8229_v11, 4  ;;  %v4471_v19 = vsel %vm4469_vm8, %v4454_v10, %v4322_v7  ;;  %v5031_v5 = vrot.slane %v8232_v41, 4  ;;  %v5063_v43 = vrot.slane %v8235_v47, 4 }
 0x4b8   : > { %v4501_v20 = vrot.slane %v4471_v19, 1  ;;  %v4502_v52 = vrot.slane %v4471_v19, 2  ;;  %v4503_v38 = vrot.slane %v4471_v19, 3  ;;  %v4504_v22 = vrot.slane %v4471_v19, 4 }
 0x4b9   : > { %v4505_v62 = vrot.slane %v4471_v19, 5  ;;  %v4506_v12 = vrot.slane %v4471_v19, 6  ;;  %v4474_v42 = vsel %vm4469_vm8, %v8201_v56, %v8242_v46  ;;  %v4507_v32 = vrot.slane %v4471_v19, 7 }
 0x4ba   : > { %v4807_v36 = vsel %vm4798_vm9, %v4471_v19, %v4678_v2  ;;  %v4808_v11 = vsel %vm4798_vm9, %v4501_v20, %v4679_v58  ;;  %v4809_v31 = vsel %vm4798_vm9, %v4502_v52, %v4680_v6  ;;  %v4810_v41 = vsel %vm4798_vm9, %v4503_v38, %v4681_v44  ;;  %v4320_v44 = vpop.permute.xlu1 %4319 }
 0x4bb   : > { %v4811_v47 = vsel %vm4798_vm9, %v4504_v22, %v4682_v55  ;;  %v4812_v54 = vsel %vm4798_vm9, %v4505_v62, %v4683_v37  ;;  %v4813_v0 = vsel %vm4798_vm9, %v4506_v12, %v4684_v53  ;;  %v4814_v49 = vsel %vm4798_vm9, %v4507_v32, %v4685_v3 }
 0x4bc   : > { %v4872_v39 = vsel %vm2127_vm1, %v4871_v18, %v4807_v36  ;;  %v8381_v56 = vsel %vm2127_vm1, %v4903_v15, %v4808_v11  ;;  %v5095_v46 = vrot.slane %v8238_v8, 4  ;;  %v8388_v58 = vsel %vm2127_vm1, %v4935_v35, %v4809_v31  ;;  %v9006_v11 = vld [vmem:[#allocation54_spill] sm:$0xff] }
 0x4bd   : > { %v8385_v2 = vperm.slane %v4872_v39, %v6148_v1  ;;  %v8391_v6 = vsel %vm2127_vm1, %v4967_v33, %v4810_v41  ;;  %v4614_v23 = vrot.slane %v4474_v42, 1  ;;  %v4615_v17 = vrot.slane %v4474_v42, 2 }
 0x4be   : > { %v8394_v55 = vsel %vm2127_vm1, %v4999_v26, %v4811_v47  ;;  %v8397_v63 = vsel %vm2127_vm1, %v5031_v5, %v4812_v54  ;;  %v4616_v37 = vrot.slane %v4474_v42, 3  ;;  %v4617_v8 = vrot.slane %v4474_v42, 4 }
 0x4bf   : > { %v4618_v45 = vrot.slane %v4474_v42, 5  ;;  %v4453_v53 = vsel %vm4452_vm7, %v8197_v21, %v8240_v29  ;;  %5125 = vst [vmem:[#allocation1 + $0x1] ss:$4 sm:$0xff] %v8385_v2  ;;  %v4619_v3 = vrot.slane %v4474_v42, 6  ;;  %v8404_v40 = vsel %vm2127_vm1, %v5063_v43, %v4813_v0 }
 0x4c0   : > { %v8407_v7 = vsel %vm2127_vm1, %v5095_v46, %v4814_v49  ;;  %v4470_v18 = vsel %vm4469_vm8, %v4453_v53, %v4320_v44  ;;  %v4959_v15 = vrot.slane %v8147_v9, 4  ;;  %v4991_v10 = vrot.slane %v8150_v48, 4 }
 0x4c1   : > { %v5023_v35 = vrot.slane %v8153_v61, 4  ;;  %v5055_v33 = vrot.slane %v8156_v4, 4  ;;  %v4620_v21 = vrot.slane %v4474_v42, 7  ;;  %v4670_v29 = vperm.slane %v4474_v42, 0  ;;  %v9007_v4 = vld [vmem:[#allocation65_spill] sm:$0xff] }
 0x4c2   : > { %v4671_v26 = vperm.slane %v4614_v23, 0  ;;  %v4672_v19 = vperm.slane %v4615_v17, 0  ;;  %v4673_v5 = vperm.slane %v4616_v37, 0  ;;  %v4674_v43 = vperm.slane %v4617_v8, 0  ;;  %v9008_v17 = vld [vmem:[#allocation39_spill] sm:$0xff] }
 0x4c3   : > { %v4494_v20 = vrot.slane %v4470_v18, 1  ;;  %v4495_v52 = vrot.slane %v4470_v18, 2  ;;  %v4675_v38 = vperm.slane %v4618_v45, 0  ;;  %v4676_v22 = vperm.slane %v4619_v3, 0 }
 0x4c4   : > { %v4496_v62 = vrot.slane %v4470_v18, 3  ;;  %v4497_v12 = vrot.slane %v4470_v18, 4  ;;  %v4498_v32 = vrot.slane %v4470_v18, 5  ;;  %v4499_v9 = vrot.slane %v4470_v18, 6 }
 0x4c5   : > { %v4500_v36 = vrot.slane %v4470_v18, 7  ;;  %v4799_v48 = vsel %vm4798_vm9, %v4470_v18, %v4670_v29  ;;  %v4677_v61 = vperm.slane %v4620_v21, 0  ;;  %v4477_v42 = vsel %vm4469_vm8, %v9007_v4, %v9006_v11 }
 0x4c6   : > { %v4800_v31 = vsel %vm4798_vm9, %v4494_v20, %v4671_v26  ;;  %v4801_v41 = vsel %vm4798_vm9, %v4495_v52, %v4672_v19  ;;  %v4802_v47 = vsel %vm4798_vm9, %v4496_v62, %v4673_v5  ;;  %v4803_v54 = vsel %vm4798_vm9, %v4497_v12, %v4674_v43  ;;  %v9011_v5 = vld [vmem:[#allocation52_spill] sm:$0xff]  ;;  %v9012_v43 = vld [vmem:[#allocation62_spill] sm:$0xff] }
 0x4c7   : > { %v4804_v0 = vsel %vm4798_vm9, %v4498_v32, %v4675_v38  ;;  %v4805_v49 = vsel %vm4798_vm9, %v4499_v9, %v4676_v22  ;;  %v4806_v39 = vsel %vm4798_vm9, %v4500_v36, %v4677_v61  ;;  %v4864_v46 = vsel %vm2127_vm1, %v4863_v27, %v4799_v48  ;;  %v9014_v38 = vld [vmem:[#allocation55_spill] sm:$0xff]  ;;  %v9015_v62 = vld [vmem:[#allocation58_spill] sm:$0xff]  ;;  %v9017_v48 = vld [vmem:[#allocation61_spill] sm:$0xff] }
 0x4c8   : > { %v8431_v44 = vsel %vm2127_vm1, %v4895_v60, %v4800_v31  ;;  %v8436_v23 = vsel %vm2127_vm1, %v4927_v28, %v4801_v41  ;;  %v5087_v37 = vrot.slane %v9008_v17, 4  ;;  %v8440_v8 = vperm.slane %v4864_v46, %v6148_v1  ;;  %v9010_v28 = vld [vmem:[#allocation42_spill] sm:$0xff]  ;;  %v9016_v36 = vld [vmem:[#allocation51_spill] sm:$0xff] }
 0x4c9   : > { %v8443_v45 = vsel %vm2127_vm1, %v4959_v15, %v4802_v47  ;;  %v4887_v27 = vrot.slane %v9009_v25, 4  ;;  %v8447_v59 = vsel %vm2127_vm1, %v4991_v10, %v4803_v54  ;;  %v8450_v60 = vsel %vm2127_vm1, %v5023_v35, %v4804_v0  ;;  %v4326_v10 = vpop.permute.xlu1 %4325 }
 0x4ca   : > { %v8453_v51 = vsel %vm2127_vm1, %v5055_v33, %v4805_v49  ;;  %v4919_v53 = vrot.slane %v9010_v28, 4  ;;  %v4635_v3 = vrot.slane %v4477_v42, 1  ;;  %v4636_v18 = vrot.slane %v4477_v42, 2  ;;  %5123 = vst [vmem:[#allocation1] ss:$4 sm:$0xff] %v8440_v8  ;;  %v9013_v33 = vld [vmem:[#allocation45_spill] sm:$0xff] }
 0x4cb   : > { %v4637_v21 = vrot.slane %v4477_v42, 3  ;;  %v4638_v15 = vrot.slane %v4477_v42, 4  ;;  %v4639_v29 = vrot.slane %v4477_v42, 5  ;;  %v4640_v26 = vrot.slane %v4477_v42, 6 }
 0x4cc   : > { %v8458_v19 = vsel %vm2127_vm1, %v5087_v37, %v4806_v39  ;;  %v4951_v35 = vrot.slane %v9011_v5, 4  ;;  %v4983_v20 = vrot.slane %v9012_v43, 4  ;;  %v5015_v52 = vrot.slane %v9013_v33, 4 }
 0x4cd   : > { %v5047_v22 = vrot.slane %v9014_v38, 4  ;;  %v5079_v12 = vrot.slane %v9015_v62, 4  ;;  %v4641_v32 = vrot.slane %v4477_v42, 7  ;;  %v4694_v9 = vperm.slane %v4477_v42, 0 }
 0x4ce   : > { %v4456_v61 = vsel %vm4452_vm7, %v9017_v48, %v9016_v36  ;;  %v4695_v11 = vperm.slane %v4635_v3, 0  ;;  %v4696_v4 = vperm.slane %v4636_v18, 0  ;;  %v4697_v31 = vperm.slane %v4637_v21, 0  ;;  %v9018_v36 = vld [vmem:[#allocation48_spill] sm:$0xff] }
 0x4cf   : > { %v4473_v41 = vsel %vm4469_vm8, %v4456_v61, %v4326_v10  ;;  %v4698_v47 = vperm.slane %v4638_v15, 0  ;;  %v4699_v54 = vperm.slane %v4639_v29, 0  ;;  %v4700_v0 = vperm.slane %v4640_v26, 0 }
 0x4d0   : > { %v4515_v49 = vrot.slane %v4473_v41, 1  ;;  %v4516_v39 = vrot.slane %v4473_v41, 2  ;;  %v4517_v46 = vrot.slane %v4473_v41, 3  ;;  %v4518_v17 = vrot.slane %v4473_v41, 4 }
 0x4d1   : > { %v4519_v37 = vrot.slane %v4473_v41, 5  ;;  %v4701_v25 = vperm.slane %v4641_v32, 0  ;;  %v4520_v28 = vrot.slane %v4473_v41, 6  ;;  %v4521_v42 = vrot.slane %v4473_v41, 7 }
 0x4d2   : > { %v4823_v5 = vsel %vm4798_vm9, %v4473_v41, %v4694_v9  ;;  %v4824_v43 = vsel %vm4798_vm9, %v4515_v49, %v4695_v11  ;;  %v4825_v3 = vsel %vm4798_vm9, %v4516_v39, %v4696_v4  ;;  %v4826_v18 = vsel %vm4798_vm9, %v4517_v46, %v4697_v31 }
 0x4d3   : > { %v4827_v21 = vsel %vm4798_vm9, %v4518_v17, %v4698_v47  ;;  %v4828_v15 = vsel %vm4798_vm9, %v4519_v37, %v4699_v54  ;;  %v4829_v29 = vsel %vm4798_vm9, %v4520_v28, %v4700_v0  ;;  %v4830_v26 = vsel %vm4798_vm9, %v4521_v42, %v4701_v25 }
 0x4d4   : > { %v4888_v10 = vsel %vm2127_vm1, %v4887_v27, %v4823_v5  ;;  %v4920_v38 = vsel %vm2127_vm1, %v4919_v53, %v4824_v43  ;;  %v4952_v62 = vsel %vm2127_vm1, %v4951_v35, %v4825_v3  ;;  %v8482_v32 = vsel %vm2127_vm1, %v4983_v20, %v4826_v18 }
 0x4d5   : > { %v4892_v33 = vperm.slane %v4888_v10, %v6148_v1  ;;  %v8485_v9 = vsel %vm2127_vm1, %v5015_v52, %v4827_v21  ;;  %v5111_v48 = vrot.slane %v9018_v36, 4  ;;  %v8489_v61 = vsel %vm2127_vm1, %v5047_v22, %v4828_v15 }
 0x4d6   : > { %v8492_v11 = vsel %vm2127_vm1, %v5079_v12, %v4829_v29  ;;  %v4869_v53 = vrot.slane %v8440_v8, 4  ;;  %v4877_v35 = vrot.slane %v8385_v2, 4  ;;  %v4885_v20 = vrot.slane %v8315_v14, 4 }
 0x4d7   : > { %5129 = vst [vmem:[#allocation1 + $0x3] ss:$4 sm:$0xff] %v4892_v33  ;;  %v8495_v27 = vsel %vm2127_vm1, %v5111_v48, %v4830_v26  ;;  %v4893_v52 = vrot.slane %v4892_v33, 4  ;;  %v4900_v2 = vperm.slane %v8431_v44, %v6148_v1  ;;  %v4908_v14 = vperm.slane %v8381_v56, %v6148_v1 }
 0x4d8   : > { %v4870_v4 = vsel %vm2127_vm1, 0.0, %v4869_v53  ;;  %v4878_v22 = vsel %vm2127_vm1, 0.0, %v4877_v35  ;;  %v4886_v12 = vsel %vm2127_vm1, 0.0, %v4885_v20  ;;  %v4916_v47 = vperm.slane %v8318_v13, %v6148_v1 }
 0x4d9   : > { %v4894_v41 = vsel %vm2127_vm1, 0.0, %v4893_v52  ;;  %v4924_v54 = vperm.slane %v4920_v38, %v6148_v1  ;;  %v4901_v0 = vrot.slane %v4900_v2, 4  ;;  %v4909_v49 = vrot.slane %v4908_v14, 4 }
 0x4da   : > { %v4917_v39 = vrot.slane %v4916_v47, 4  ;;  %v4932_v25 = vperm.slane %v8436_v23, %v6148_v1  ;;  %v4940_v28 = vperm.slane %v8388_v58, %v6148_v1  ;;  %v4948_v5 = vperm.slane %v8321_v34, %v6148_v1 }
 0x4db   : > { %v4925_v44 = vrot.slane %v4924_v54, 4  ;;  %v4902_v46 = vsel %vm2127_vm1, 0.0, %v4901_v0  ;;  %v4910_v17 = vsel %vm2127_vm1, 0.0, %v4909_v49  ;;  %v4956_v43 = vperm.slane %v4952_v62, %v6148_v1 }
 0x4dc   : > { %v4918_v13 = vsel %vm2127_vm1, 0.0, %v4917_v39  ;;  %v4933_v3 = vrot.slane %v4932_v25, 4  ;;  %v4941_v18 = vrot.slane %v4940_v28, 4  ;;  %v4949_v21 = vrot.slane %v4948_v5, 4 }
 0x4dd   : > { %v4926_v37 = vsel %vm2127_vm1, 0.0, %v4925_v44  ;;  %v4957_v15 = vrot.slane %v4956_v43, 4  ;;  %v4964_v10 = vperm.slane %v8443_v45, %v6148_v1  ;;  %v4972_v33 = vperm.slane %v8391_v6, %v6148_v1 }
 0x4de   : > { %v8501_v31 = vld.sshfl [vmem:[#allocation1] sm:$0xff pattern:$0x73625140]  ;;  %v4934_v23 = vsel %vm2127_vm1, 0.0, %v4933_v3  ;;  %v4942_v58 = vsel %vm2127_vm1, 0.0, %v4941_v18  ;;  %v4950_v26 = vsel %vm2127_vm1, 0.0, %v4949_v21  ;;  %v4980_v62 = vperm.slane %v8324_v30, %v6148_v1 }
 0x4df   : > { %5136 = vst [vmem:[#allocation1] ss:$4 sm:$0xff] %v4870_v4  ;;  %v4958_v34 = vsel %vm2127_vm1, 0.0, %v4957_v15  ;;  %v4988_v36 = vperm.slane %v8482_v32, %v6148_v1  ;;  %v4965_v48 = vrot.slane %v4964_v10, 4  ;;  %v4973_v53 = vrot.slane %v4972_v33, 4 }
 0x4e0   : > { %5138 = vst [vmem:[#allocation1 + $0x1] ss:$4 sm:$0xff] %v4878_v22  ;;  %v4981_v35 = vrot.slane %v4980_v62, 4  ;;  %v4996_v32 = vperm.slane %v8447_v59, %v6148_v1  ;;  %v5004_v22 = vperm.slane %v8394_v55, %v6148_v1  ;;  %v5036_v39 = vperm.slane %v8397_v63, %v6148_v1 }
 0x4e1   : > { %5140 = vst [vmem:[#allocation1 + $0x2] ss:$4 sm:$0xff] %v4886_v12  ;;  %v4989_v20 = vrot.slane %v4988_v36, 4  ;;  %v4966_v45 = vsel %vm2127_vm1, 0.0, %v4965_v48  ;;  %v4974_v6 = vsel %vm2127_vm1, 0.0, %v4973_v53  ;;  %v5076_v3 = vperm.slane %v8334_v24, %v6148_v1 }
 0x4e2   : > { %5142 = vst [vmem:[#allocation1 + $0x3] ss:$4 sm:$0xff] %v4894_v41  ;;  %v4982_v30 = vsel %vm2127_vm1, 0.0, %v4981_v35  ;;  %v5012_v41 = vperm.slane %v8328_v57, %v6148_v1  ;;  %v5084_v18 = vperm.slane %v8492_v11, %v6148_v1 }
 0x4e3   : > { %v4990_v4 = vsel %vm2127_vm1, 0.0, %v4989_v20 }
 0x4e9   : > { %v5143_v8 = vld.sshfl [vmem:[#allocation1] sm:$0xff pattern:$0x73625140] }
 0x4ea   : > { %5151 = vst [vmem:[#allocation1] ss:$4 sm:$0xff] %v4900_v2  ;;  %5144 = vrot.lane.b32.xlu2 %v5143_v8, %s5700_s25  ;;  %v5020_v2 = vperm.slane %v8485_v9, %v6148_v1  ;;  %v5005_v8 = vrot.slane %v5004_v22, 4  ;;  %v5028_v9 = vperm.slane %v8450_v60, %v6148_v1 }
 0x4eb   : > { %5153 = vst [vmem:[#allocation1 + $0x1] ss:$4 sm:$0xff] %v4908_v14  ;;  %v4997_v14 = vrot.slane %v4996_v32, 4 }
 0x4ec   : > { %5155 = vst [vmem:[#allocation1 + $0x2] ss:$4 sm:$0xff] %v4916_v47  ;;  %v5013_v47 = vrot.slane %v5012_v41, 4  ;;  %v5006_v55 = vsel %vm2127_vm1, 0.0, %v5005_v8 }
 0x4ed   : > { %5157 = vst [vmem:[#allocation1 + $0x3] ss:$4 sm:$0xff] %v4924_v54  ;;  %v5021_v54 = vrot.slane %v5020_v2, 4  ;;  %v4998_v59 = vsel %vm2127_vm1, 0.0, %v4997_v14 }
 0x4ee   : > { %v5014_v57 = vsel %vm2127_vm1, 0.0, %v5013_v47 }
 0x4ef   : > { %v5022_v49 = vsel %vm2127_vm1, 0.0, %v5021_v54 }
 0x4f4   : > { %v5158_v56 = vld.sshfl [vmem:[#allocation1] sm:$0xff pattern:$0x73625140] }
 0x4f5   : > { %5166 = vst [vmem:[#allocation1] ss:$4 sm:$0xff] %v4902_v46  ;;  %5159 = vrot.lane.b32.xlu1 %v5158_v56, %s5701_s26  ;;  %v5044_v46 = vperm.slane %v8331_v50, %v6148_v1  ;;  %v5052_v56 = vperm.slane %v8489_v61, %v6148_v1 }
 0x4f6   : > { %5168 = vst [vmem:[#allocation1 + $0x1] ss:$4 sm:$0xff] %v4910_v17 }
 0x4f7   : > { %5170 = vst [vmem:[#allocation1 + $0x2] ss:$4 sm:$0xff] %v4918_v13  ;;  %v5053_v17 = vrot.slane %v5052_v56, 4  ;;  %v5029_v13 = vrot.slane %v5028_v9, 4  ;;  %v5045_v63 = vrot.slane %v5044_v46, 4 }
 0x4f8   : > { %5172 = vst [vmem:[#allocation1 + $0x3] ss:$4 sm:$0xff] %v4926_v37  ;;  %v5037_v37 = vrot.slane %v5036_v39, 4 }
 0x4f9   : > { %v5054_v60 = vsel %vm2127_vm1, 0.0, %v5053_v17  ;;  %v5030_v50 = vsel %vm2127_vm1, 0.0, %v5029_v13 }
 0x4fa   : > { %v5038_v61 = vsel %vm2127_vm1, 0.0, %v5037_v37 }
 0x4ff   : > { %v8523_v42 = vld.sshfl [vmem:[#allocation1] sm:$0xff pattern:$0x73625140] }
 0x500   : > { %5181 = vst [vmem:[#allocation1] ss:$4 sm:$0xff] %v4932_v25 }
 0x501   : > { %5183 = vst [vmem:[#allocation1 + $0x1] ss:$4 sm:$0xff] %v4940_v28  ;;  %v5046_v28 = vsel %vm2127_vm1, 0.0, %v5045_v63 }
 0x502   : > { %5185 = vst [vmem:[#allocation1 + $0x2] ss:$4 sm:$0xff] %v4948_v5  ;;  %v5068_v5 = vperm.slane %v8404_v40, %v6148_v1 }
 0x503   : > { %5187 = vst [vmem:[#allocation1 + $0x3] ss:$4 sm:$0xff] %v4956_v43 }
 0x504   : > { %v5069_v15 = vrot.slane %v5068_v5, 4 }
 0x506   : > { %v5070_v24 = vsel %vm2127_vm1, 0.0, %v5069_v15 }
 0x50a   : > { %v8529_v29 = vld.sshfl [vmem:[#allocation1] sm:$0xff pattern:$0x73625140] }
 0x50b   : > { %5196 = vst [vmem:[#allocation1] ss:$4 sm:$0xff] %v4934_v23  ;;  %v5077_v23 = vrot.slane %v5076_v3, 4 }
 0x50c   : > { %5198 = vst [vmem:[#allocation1 + $0x1] ss:$4 sm:$0xff] %v4942_v58 }
 0x50d   : > { %5200 = vst [vmem:[#allocation1 + $0x2] ss:$4 sm:$0xff] %v4950_v26  ;;  %v5078_v58 = vsel %vm2127_vm1, 0.0, %v5077_v23  ;;  %v5092_v26 = vperm.slane %v8458_v19, %v6148_v1 }
 0x50e   : > { %5202 = vst [vmem:[#allocation1 + $0x3] ss:$4 sm:$0xff] %v4958_v34  ;;  %v5100_v34 = vperm.slane %v8407_v7, %v6148_v1 }
 0x515   : > { %v8538_v38 = vld.sshfl [vmem:[#allocation1] sm:$0xff pattern:$0x73625140] }
 0x516   : > { %5211 = vst [vmem:[#allocation1] ss:$4 sm:$0xff] %v4964_v10 }
 0x517   : > { %5213 = vst [vmem:[#allocation1 + $0x1] ss:$4 sm:$0xff] %v4972_v33  ;;  %v5108_v33 = vperm.slane %v8351_v16, %v6148_v1 }
 0x518   : > { %5215 = vst [vmem:[#allocation1 + $0x2] ss:$4 sm:$0xff] %v4980_v62  ;;  %v5093_v62 = vrot.slane %v5092_v26, 4 }
 0x519   : > { %5217 = vst [vmem:[#allocation1 + $0x3] ss:$4 sm:$0xff] %v4988_v36  ;;  %v5101_v36 = vrot.slane %v5100_v34, 4  ;;  %v5109_v48 = vrot.slane %v5108_v33, 4 }
 0x51a   : > { %v5094_v7 = vsel %vm2127_vm1, 0.0, %v5093_v62 }
 0x51b   : > { %v5102_v16 = vsel %vm2127_vm1, 0.0, %v5101_v36  ;;  %v5110_v35 = vsel %vm2127_vm1, 0.0, %v5109_v48 }
 0x520   : > { %v8545_v52 = vld.sshfl [vmem:[#allocation1] sm:$0xff pattern:$0x73625140] }
 0x521   : > { %5226 = vst [vmem:[#allocation1] ss:$4 sm:$0xff] %v4966_v45 }
 0x522   : > { %5228 = vst [vmem:[#allocation1 + $0x1] ss:$4 sm:$0xff] %v4974_v6 }
 0x523   : > { %5230 = vst [vmem:[#allocation1 + $0x2] ss:$4 sm:$0xff] %v4982_v30 }
 0x524   : > { %5232 = vst [vmem:[#allocation1 + $0x3] ss:$4 sm:$0xff] %v4990_v4 }
 0x52b   : > { %v8554_v12 = vld.sshfl [vmem:[#allocation1] sm:$0xff pattern:$0x73625140] }
 0x52c   : > { %5241 = vst [vmem:[#allocation1] ss:$4 sm:$0xff] %v4996_v32 }
 0x52d   : > { %5243 = vst [vmem:[#allocation1 + $0x1] ss:$4 sm:$0xff] %v5004_v22 }
 0x52e   : > { %5245 = vst [vmem:[#allocation1 + $0x2] ss:$4 sm:$0xff] %v5012_v41 }
 0x52f   : > { %5247 = vst [vmem:[#allocation1 + $0x3] ss:$4 sm:$0xff] %v5020_v2 }
 0x536   : > { %v8561_v0 = vld.sshfl [vmem:[#allocation1] sm:$0xff pattern:$0x73625140] }
 0x537   : > { %5254 = vst [vmem:[#allocation1] ss:$4 sm:$0xff] %v4998_v59 }
 0x538   : > { %5256 = vst [vmem:[#allocation1 + $0x1] ss:$4 sm:$0xff] %v5006_v55 }
 0x539   : > { %5258 = vst [vmem:[#allocation1 + $0x2] ss:$4 sm:$0xff] %v5014_v57 }
 0x53a   : > { %5260 = vst [vmem:[#allocation1 + $0x3] ss:$4 sm:$0xff] %v5022_v49 }
 0x541   : > { %v5261_v44 = vld.sshfl [vmem:[#allocation1] sm:$0xff pattern:$0x73625140] }
 0x542   : > { %5269 = vst [vmem:[#allocation1] ss:$4 sm:$0xff] %v5028_v9  ;;  %5262 = vrot.lane.b32.xlu0 %v5261_v44, %s5700_s25  ;;  %s5394_s25 = scalar_lea.hbm %s8674_s1, %s5502_s21 }
 0x543   : > { %5271 = vst [vmem:[#allocation1 + $0x1] ss:$4 sm:$0xff] %v5036_v39  ;;  %s5398_s10 = sshll.u32 %s5394_s25, 4  ;;  %s5399_s10 = int_to_ptr.hbm [resolvable:$true] %s5398_s10 }
 0x544   : > { %5273 = vst [vmem:[#allocation1 + $0x2] ss:$4 sm:$0xff] %v5044_v46  ;;  %v5145_v20 = vpop.permute.xlu2 %5144 }
 0x545   : > { %5275 = vst [vmem:[#allocation1 + $0x3] ss:$4 sm:$0xff] %v5052_v56  ;;  %v5356_v41 = vsel %vm5355_vm10, %v8501_v31, %v5145_v20 }
 0x54a   : > { %5174 = vrot.lane.b32.xlu0 %v8523_v42, %s5702_s27  ;;  %v5060_v42 = vperm.slane %v8453_v51, %v6148_v1  ;;  %v5085_v51 = vrot.slane %v5084_v18, 4 }
 0x54c   : > { %v5276_v25 = vld.sshfl [vmem:[#allocation1] sm:$0xff pattern:$0x73625140]  ;;  %v5061_v21 = vrot.slane %v5060_v42, 4  ;;  %v5086_v11 = vsel %vm2127_vm1, 0.0, %v5085_v51 }
 0x54d   : > { %5290 = vst [vmem:[#allocation1 + $0x3] ss:$4 sm:$0xff] %v5054_v60  ;;  %5277 = vrot.lane.b32.xlu2 %v5276_v25, %s5701_s26  ;;  %s5379_s26 = scalar_lea.sflag [#allocation3], %s154_s3 }
 0x54e   : > { %5284 = vst [vmem:[#allocation1] ss:$4 sm:$0xff] %v5030_v50  ;;  %v5062_v40 = vsel %vm2127_vm1, 0.0, %v5061_v21 }
 0x54f   : > { %5286 = vst [vmem:[#allocation1 + $0x1] ss:$4 sm:$0xff] %v5038_v61 }
 0x550   : > { %5288 = vst [vmem:[#allocation1 + $0x2] ss:$4 sm:$0xff] %v5046_v28 }
 0x555   : > { %5189 = vrot.lane.b32.xlu2 %v8529_v29, %s5703_s28 }
 0x557   : > { %v5291_v43 = vld.sshfl [vmem:[#allocation1] sm:$0xff pattern:$0x73625140] }
 0x558   : > { %5292 = vrot.lane.b32.xlu1 %v5291_v43, %s5702_s27  ;;  %5299 = vst [vmem:[#allocation1] ss:$4 sm:$0xff] %v5060_v42  ;;  %s5609_s27 = sshra.s32 %s5399_s10, 4  ;;  %s5610_s27 = int_to_ptr.hbm [resolvable:$true] %s5609_s27 }
 0x559   : > { %5301 = vst [vmem:[#allocation1 + $0x1] ss:$4 sm:$0xff] %v5068_v5  ;;  %p5616_p4 = scmp.lt.s32.totalorder %s5610_s27, %s8674_s1 }
 0x55a   : > { %5303 = vst [vmem:[#allocation1 + $0x2] ss:$4 sm:$0xff] %v5076_v3 }
 0x55b   : > { %5305 = vst [vmem:[#allocation1 + $0x3] ss:$4 sm:$0xff] %v5084_v18 }
 0x560   : > { %5204 = vrot.lane.b32.xlu1 %v8538_v38, %s5704_s29  ;;  %v5116_v38 = vperm.slane %v8495_v27, %v6148_v1 }
 0x562   : > { %v5306_v29 = vld.sshfl [vmem:[#allocation1] sm:$0xff pattern:$0x73625140]  ;;  %v5117_v19 = vrot.slane %v5116_v38, 4 }
 0x563   : > { %5307 = vrot.lane.b32.xlu0 %v5306_v29, %s5703_s28  ;;  %5314 = vst [vmem:[#allocation1] ss:$4 sm:$0xff] %v5062_v40  ;;  %s5611_s28 = scalar_lea.hbm %s5610_s27, 16 }
 0x564   : > { %5316 = vst [vmem:[#allocation1 + $0x1] ss:$4 sm:$0xff] %v5070_v24  ;;  %v5118_v1 = vsel %vm2127_vm1, 0.0, %v5117_v19  ;;  %p5612_p0 = scmp.ne.s32.totalorder %s5610_s27, %s5611_s28 }
 0x565   : > { %5318 = vst [vmem:[#allocation1 + $0x2] ss:$4 sm:$0xff] %v5078_v58 }
 0x566   : > { %5320 = vst [vmem:[#allocation1 + $0x3] ss:$4 sm:$0xff] %v5086_v11  ;;  %p5613_p1 = pnand %p5612_p0, %p5768_p3 }
 0x567   : > { %v5160_v6 = vpop.permute.xlu1 %5159 }
 0x568   : > { %v5358_v2 = vsel %vm5357_vm11, %v5356_v41, %v5160_v6  ;;  %p5614_p2 = pneg %p5613_p1 }
 0x56b   : > { %5219 = vrot.lane.b32.xlu0 %v8545_v52, %s5705_s30 }
 0x56d   : > { %v5321_v10 = vld.sshfl [vmem:[#allocation1] sm:$0xff pattern:$0x73625140] }
 0x56e   : > { %5322 = vrot.lane.b32.xlu2 %v5321_v10, %s5704_s29  ;;  %5329 = vst [vmem:[#allocation1] ss:$4 sm:$0xff] %v5092_v26 }
 0x56f   : > { %5331 = vst [vmem:[#allocation1 + $0x1] ss:$4 sm:$0xff] %v5100_v34 }
 0x570   : > { %5333 = vst [vmem:[#allocation1 + $0x2] ss:$4 sm:$0xff] %v5108_v33 }
 0x571   : > { %5335 = vst [vmem:[#allocation1 + $0x3] ss:$4 sm:$0xff] %v5116_v38 }
 0x576   : > { %5234 = vrot.lane.b32.xlu2 %v8554_v12, %s5706_s2 }
 0x578   : > { %v5336_v53 = vld.sshfl [vmem:[#allocation1] sm:$0xff pattern:$0x73625140] }
 0x579   : > { %5337 = vrot.lane.b32.xlu1 %v5336_v53, %s5705_s30  ;;  %5344 = vst [vmem:[#allocation1] ss:$4 sm:$0xff] %v5094_v7 }
 0x57a   : > { %5346 = vst [vmem:[#allocation1 + $0x1] ss:$4 sm:$0xff] %v5102_v16 }
 0x57b   : > { %5348 = vst [vmem:[#allocation1 + $0x2] ss:$4 sm:$0xff] %v5110_v35 }
 0x57c   : > { %5350 = vst [vmem:[#allocation1 + $0x3] ss:$4 sm:$0xff] %v5118_v1 }
 0x583   : > { %v5351_v27 = vld.sshfl [vmem:[#allocation1] sm:$0xff pattern:$0x73625140] }
 0x584   : > { %5352 = vrot.lane.b32.xlu0 %v5351_v27, %s5706_s2  ;;  %s5615_s2 = scalar_lea.hbm %s8674_s1, 128 }
 0x585   : > { %p5617_p5 = scmp.lt.s32.totalorder %s5615_s2, %s5611_s28 }
 0x587   : > { %p5618_p6 = por %p5617_p5, %p5616_p4 }
 0x589   : > { %p5619_p7 = pnand %p5618_p6, %p5614_p2 }
 0x5a7   : > { %v5278_v45 = vpop.permute.xlu2 %5277 }
 0x5af   : > { %v5190_v30 = vpop.permute.xlu2 %5189 }
 0x5b4   : > { %v5263_v52 = vpop.permute.xlu0 %5262 }
 0x5b5   : > { %v5369_v49 = vsel %vm5355_vm10, %v8561_v0, %v5263_v52 }
 0x5b6   : > { %v5370_v9 = vsel %vm5357_vm11, %v5369_v49, %v5278_v45 }
 0x5bc   : > { %v5175_v4 = vpop.permute.xlu0 %5174 }
 0x5bd   : > { %v5360_v14 = vsel %vm5359_vm12, %v5358_v2, %v5175_v4 }
 0x5be   : > { %v5362_v47 = vsel %vm5361_vm13, %v5360_v14, %v5190_v30 }
 0x5c8   : > { %v5323_v22 = vpop.permute.xlu2 %5322 }
 0x5ca   : > { %v5293_v32 = vpop.permute.xlu1 %5292 }
 0x5cb   : > { %v5371_v39 = vsel %vm5359_vm12, %v5370_v9, %v5293_v32 }
 0x5d0   : > { %v5235_v31 = vpop.permute.xlu2 %5234 }
 0x5d2   : > { %v5205_v8 = vpop.permute.xlu1 %5204 }
 0x5d3   : > { %v5364_v54 = vsel %vm5363_vm14, %v5362_v47, %v5205_v8 }
 0x5d5   : > { %v5308_v12 = vpop.permute.xlu0 %5307 }
 0x5d6   : > { %v5372_v44 = vsel %vm5361_vm13, %v5371_v39, %v5308_v12 }
 0x5d7   : > { %v5373_v56 = vsel %vm5363_vm14, %v5372_v44, %v5323_v22 }
 0x5dd   : > { %v5220_v59 = vpop.permute.xlu0 %5219 }
 0x5de   : > { %v5366_v55 = vsel %vm5365_vm15, %v5364_v54, %v5220_v59 }
 0x5df   : > { %v5368_v57 = vsel %vm5367_vm0, %v5366_v55, %v5235_v31 }
 0x5e0   : > { %5376 = vst [vmem:[%s156_s5] sm:$0xff] %v5368_v57 }
 0x5eb   : > { %v5338_v46 = vpop.permute.xlu1 %5337 }
 0x5ec   : > { %v5374_v0 = vsel %vm5365_vm15, %v5373_v56, %v5338_v46 }
 0x5f6   : > { %v5353_v17 = vpop.permute.xlu0 %5352 }
 0x5f7   : > { %v5375_v13 = vsel %vm5367_vm0, %v5374_v0, %v5353_v17 }
 0x5f8   : > { %5377 = vst [vmem:[%s156_s5 + $0x8] sm:$0xff] %v5375_v13 }
 0x5f9   : > { %5622 = shalt.err (!%p5619_p7)
}
 0x5fa   : > { %5505 = dma.vmem_to_hbm [thread:$0]  (%p5768_p3), %s5397_s9, 256, %s5399_s10, %s5379_s26  }
 0x5fb PF: > { %p5511_p9 = scmp.ge.s32.totalorder %s5689_s13, 2  ;;  %s5410_s3 = sand.u32 1, %s5661_s6  }
 0x5fc   : > { %s5411_s5 = scalar_lea.sflag [#allocation3], %s5410_s3 }
 0x5fd   : > { %p5508_p10 = pnand %p5511_p9, %p5777_p8 }
 0x5ff   : > { %p5509_p11 = pneg %p5508_p10 }
 0x601   : > { %5656 = dma.done.wait (%p5509_p11), %s5411_s5, 256  }
 0x602   : > { %5658 = vsyncadd (%p5509_p11), %s5411_s5, 4294967040  ;;  %s14_s13 = sadd.s32 1, %s5689_s13   ;;  %s9019_s6 = smov %s5665_s7 }
 0x603   : > { %p11_p12 = scmp.ge.s32.totalorder %s14_s13, 10   ;;  %s9020_s7 = smov %s5669_s8 }
 0x604   : > { %s9021_s8 = smov %s5786_s24  ;;  %s9022_s9 = smov %s5681_s11 }
 0x605   : > { %s9023_s10 = smov %s5685_s12  ;;  %s9024_s11 = smov %s9027_s16 }
 0x606   : > { %s9025_s12 = smov %s9031_s17  ;;  %13 = sbr.rel (!%p11_p12) target bundleno = 5 (0x5), region = 107 }
 0x60b   :  { %5417 = vsyncpa [#allocation3], 1 }
 0x60c   :  { %5419 = vsyncpa [#allocation3 + $0x1], 1 }

</bundles_post_ra>
